<compile_context>
chip_gen: v5e
topology: v5e:2x2
jax: 0.10.0
libtpu: 0.0.40
codegen_flags: <defaults>
</compile_context>

<pallas_src>
import functools

import jax
import jax.numpy as jnp
from jax import lax
from jax.experimental import pallas as pl
from jax.experimental.pallas import tpu as pltpu


_VMEM_LIMIT_BYTES = 32 * 1024 * 1024       # explicit; safe on v5e/v6e/v7x
_NT_DIMS = (((1,), (1,)), ((), ()))        # contract both operands on last dim


# ----------------------------------------------------------------------------
# Pallas kernel: K-tiled matmul, f32 VMEM accumulator, fused bias (+ ReLU).
# BN scale is pre-folded into the weight, so the body is dot + bias (+relu).
# ----------------------------------------------------------------------------
def _mm_bias_kernel(x_ref, w_ref, b_ref, o_ref, acc_ref, *, relu, rhs_is_nk):
    @pl.when(pl.program_id(1) == 0)
    def _():
        acc_ref[...] = jnp.zeros_like(acc_ref)

    if rhs_is_nk:
        # Weight stored lane-dense as (N, K); contract over the lane dim of
        # both operands (NT dot).  Avoids any (tk, 32) lane-padded block.
        acc_ref[...] += lax.dot_general(
            x_ref[...], w_ref[...], dimension_numbers=_NT_DIMS,
            preferred_element_type=jnp.float32)
    else:
        acc_ref[...] += jnp.dot(x_ref[...], w_ref[...],
                                preferred_element_type=jnp.float32)

    @pl.when(pl.program_id(1) == pl.num_programs(1) - 1)
    def _():
        y = acc_ref[...] + b_ref[...]          # f32 epilogue (no bf16 VPU on v5e)
        if relu:
            y = jnp.maximum(y, 0.0)
        o_ref[...] = y.astype(o_ref.dtype)


@functools.lru_cache(maxsize=None)
def _num_tensorcores_per_device():
    # TODO(synk): no stable cross-version API for TensorCores-per-device;
    # default to 1 (no M split) when the attribute is unavailable.
    try:
        return int(getattr(jax.devices()[0], "num_cores", 1) or 1)
    except Exception:
        return 1


def _choose_tm(M):
    """Full-M tile on single-TC chips (v5e/v6e); split two ways only when a
    second TensorCore exists (v7x) and M is large enough to pay for the extra
    grid step.  Block dim == full array dim is exempt from (8,128), so odd M
    (e.g. 98) never needs padding or output slicing."""
    if _num_tensorcores_per_device() >= 2 and M >= 256 and M % 16 == 0:
        return M // 2
    return M


def _choose_tk(K, N, itemsize=2, tile_budget_bytes=1 << 20):
    """Full K unless the weight tile would exceed ~1 MiB; otherwise the
    largest 128-multiple divisor of K under the budget (the 25088->32 Linear
    lands on 2 K steps; the convs on 1)."""
    if K % 128 != 0 or K * N * itemsize <= tile_budget_bytes:
        return K
    chunks = K // 128
    for d in range(chunks, 0, -1):
        if chunks % d == 0 and 128 * d * N * itemsize <= tile_budget_bytes:
            return 128 * d
    return 128


def matmul_bias_act(x, w, bias, *, relu, out_dtype, rhs_is_nk):
    """out = relu?( x @ W + bias ).
    x: (M, K).  w: (N, K) if rhs_is_nk (lane-dense; used for the Linear whose
    N=32 < 128 lanes) else (K, N) (used for convs where N is a multiple of
    128).  Any per-channel BN scale is already folded into w / bias."""
    M, K = x.shape
    if rhs_is_nk:
        N, K2 = w.shape
    else:
        K2, N = w.shape
    assert K == K2
    tm = _choose_tm(M)
    tk = _choose_tk(K, N)
    b2 = bias.reshape(1, N).astype(jnp.float32)

    if rhs_is_nk:
        w_spec = pl.BlockSpec((N, tk), lambda i, k: (0, k))
    else:
        w_spec = pl.BlockSpec((tk, N), lambda i, k: (k, 0))

    return pl.pallas_call(
        functools.partial(_mm_bias_kernel, relu=relu, rhs_is_nk=rhs_is_nk),
        out_shape=jax.ShapeDtypeStruct((M, N), out_dtype),
        grid_spec=pltpu.PrefetchScalarGridSpec(
            num_scalar_prefetch=0,
            grid=(M // tm, K // tk),
            in_specs=[
                pl.BlockSpec((tm, tk), lambda i, k: (i, k)),   # activations
                w_spec,                                        # folded weight
                pl.BlockSpec((1, N), lambda i, k: (0, 0)),     # folded bias
            ],
            out_specs=pl.BlockSpec((tm, N), lambda i, k: (i, 0)),
            scratch_shapes=[pltpu.VMEM((tm, N), jnp.float32)],
        ),
        compiler_params=pltpu.CompilerParams(
            dimension_semantics=("parallel", "arbitrary"),
            vmem_limit_bytes=_VMEM_LIMIT_BYTES),
    )(x, w, b2)


# ----------------------------------------------------------------------------
# Conv3x3(pad=1) + folded-BN + ReLU
#   * big Cout (>=128): im2col glue + Pallas MXU matmul
#   * tiny Cout (8/16): fused XLA conv (Pallas launch would cost more than
#     the compute; N=8/16 wastes 90%+ of each output vreg)
# ----------------------------------------------------------------------------
def conv3x3_bn_relu_pallas(x_nhwc, w_hwio, bias):
    B, H, W, Cin = x_nhwc.shape
    Cout = w_hwio.shape[-1]
    xp = jnp.pad(x_nhwc, ((0, 0), (1, 1), (1, 1), (0, 0)))
    # TODO(synk): the 3x3 patch gather could move inside the kernel (9
    # accumulating dots on shifted VMEM slices) to avoid the 9x im2col blow-up;
    # negligible at B=2, kept as jit-fused bf16 glue for lowering robustness.
    patches = jnp.concatenate(
        [xp[:, dy:dy + H, dx:dx + W, :] for dy in range(3) for dx in range(3)],
        axis=-1,
    ).reshape(B * H * W, 9 * Cin)
    w_mat = w_hwio.reshape(9 * Cin, Cout)        # (dy,dx,cin) rows match patches
    y = matmul_bias_act(patches, w_mat, bias, relu=True,
                        out_dtype=jnp.bfloat16, rhs_is_nk=False)
    return y.reshape(B, H, W, Cout)


def conv3x3_bn_relu_xla(x_nhwc, w_hwio, bias):
    y = lax.conv_general_dilated(
        x_nhwc, w_hwio, window_strides=(1, 1), padding=((1, 1), (1, 1)),
        dimension_numbers=("NHWC", "HWIO", "NHWC"),
        preferred_element_type=jnp.float32)
    y = jnp.maximum(y + bias.reshape(1, 1, 1, -1), 0.0)
    return y.astype(jnp.bfloat16)


# ----------------------------------------------------------------------------
# Pooling glue (cheap, fused by jit)
# ----------------------------------------------------------------------------
def maxpool2x2(x):
    B, H, W, C = x.shape
    return jnp.max(x.reshape(B, H // 2, 2, W // 2, 2, C), axis=(2, 4))


def adaptive_avg_pool_nhwc(x, out_hw=(7, 7)):
    B, H, W, C = x.shape
    OH, OW = out_hw
    if (H, W) == (OH, OW):
        return x                                       # identity here
    if H % OH == 0 and W % OW == 0:                    # single reshape+mean
        return jnp.mean(x.reshape(B, OH, H // OH, OW, W // OW, C), axis=(2, 4))
    rows = []                                          # general PyTorch windows
    for i in range(OH):
        hs, he = (i * H) // OH, -(-((i + 1) * H) // OH)
        cols = []
        for j in range(OW):
            ws, we = (j * W) // OW, -(-((j + 1) * W) // OW)
            cols.append(jnp.mean(x[:, hs:he, ws:we, :], axis=(1, 2)))
        rows.append(jnp.stack(cols, axis=1))
    return jnp.stack(rows, axis=1)


# ----------------------------------------------------------------------------
# Parameters: PyTorch-style init, then a one-time inference fold
# ----------------------------------------------------------------------------
def init_params(key, layer_cfg, embed_size):
    params = {"convs": []}
    in_ch = 3
    for v in layer_cfg:
        if v == "M":
            continue
        key, k1, k2, k3, k4, k5, k6 = jax.random.split(key, 7)
        fan_in = in_ch * 9
        params["convs"].append(dict(
            w=jax.random.normal(k1, (v, in_ch, 3, 3), jnp.float32)
              * jnp.sqrt(2.0 / fan_in),
            b=0.01 * jax.random.normal(k2, (v,), jnp.float32),
            gamma=1.0 + 0.1 * jax.random.normal(k3, (v,), jnp.float32),
            beta=0.1 * jax.random.normal(k4, (v,), jnp.float32),
            rmean=0.1 * jax.random.normal(k5, (v,), jnp.float32),
            rvar=1.0 + 0.1 * jax.random.uniform(k6, (v,), jnp.float32),
        ))
        in_ch = v
    feat = in_ch * 7 * 7
    assert feat == 25088, "Linear in EncoderCNN_prune is hard-coded to 25088"
    key, k1, k2, k3, k4, k5, k6 = jax.random.split(key, 7)
    params["linear_bn"] = dict(
        w=jax.random.normal(k1, (embed_size, feat), jnp.float32)
          * jnp.sqrt(1.0 / feat),
        b=0.01 * jax.random.normal(k2, (embed_size,), jnp.float32),
        gamma=1.0 + 0.1 * jax.random.normal(k3, (embed_size,), jnp.float32),
        beta=0.1 * jax.random.normal(k4, (embed_size,), jnp.float32),
        rmean=0.1 * jax.random.normal(k5, (embed_size,), jnp.float32),
        rvar=1.0 + 0.1 * jax.random.uniform(k6, (embed_size,), jnp.float32),
    )
    return params


def fold_params_for_inference(params, embed_size, eps=1e-5):
    """One-time prep: fold conv-bias + BN (inference mode) into weight/bias,
    keep conv weights HWIO (bf16), and store the Linear weight LANE-DENSE as
    (embed, 25088) in NHWC feature order so no per-call weight transpose,
    activation transpose, or lane-padded DMA is needed."""
    folded = {"convs": []}
    for p in params["convs"]:
        scale = p["gamma"] / jnp.sqrt(p["rvar"] + eps)
        bias = p["beta"] + (p["b"] - p["rmean"]) * scale
        # (Cout,Cin,3,3) -> HWIO (3,3,Cin,Cout); reshape to (9*Cin,Cout) later
        # matches the (dy,dx,cin)-ordered im2col patches.
        w_hwio = jnp.transpose(p["w"], (2, 3, 1, 0)) * scale[None, None, None, :]
        folded["convs"].append(dict(w=w_hwio.astype(jnp.bfloat16),
                                    b=bias.astype(jnp.float32)))

    lp = params["linear_bn"]
    scale = lp["gamma"] / jnp.sqrt(lp["rvar"] + eps)
    bias = lp["beta"] + (lp["b"] - lp["rmean"]) * scale
    # PyTorch Linear weight (embed, 25088) indexes features NCHW (c*49+h*7+w).
    # Permute columns to NHWC flatten order (h*7*C + w*C + c) and KEEP the
    # (embed, 25088) orientation: K=25088 on the lane dim => dense HBM layout
    # (~1.6 MiB bf16 instead of ~6.3 MiB lane-padded for (25088, 32)).
    C = lp["w"].shape[1] // 49
    w_lin = jnp.transpose(lp["w"].reshape(embed_size, C, 7, 7), (0, 2, 3, 1))
    w_lin = (w_lin.reshape(embed_size, 49 * C) * scale[:, None]).astype(jnp.bfloat16)
    folded["linear"] = dict(w=w_lin, b=bias.astype(jnp.float32))
    return folded


# ----------------------------------------------------------------------------
# EncoderCNN_prune forward
# ----------------------------------------------------------------------------
def encoder_cnn_prune_forward(folded, images_nchw, layer_cfg):
    x = jnp.transpose(images_nchw, (0, 2, 3, 1)).astype(jnp.bfloat16)  # ->NHWC
    ci = 0
    for v in layer_cfg:
        if v == "M":
            x = maxpool2x2(x)
        else:
            p = folded["convs"][ci]
            ci += 1
            if v >= 128:                      # static decision (layer_cfg static)
                x = conv3x3_bn_relu_pallas(x, p["w"], p["b"])
            else:                             # tiny Cout: fused XLA conv
                x = conv3x3_bn_relu_xla(x, p["w"], p["b"])
    x = adaptive_avg_pool_nhwc(x, (7, 7))
    B = x.shape[0]
    flat = x.reshape(B, -1)                   # NHWC flatten (weight pre-permuted)
    lp = folded["linear"]
    # TODO(synk): conv3 -> (identity pool) -> Linear could be fused into one
    # pallas_call to skip one HBM round-trip of the (B,7,7,512) activation.
    return matmul_bias_act(flat, lp["w"], lp["b"], relu=False,
                           out_dtype=jnp.float32, rhs_is_nk=True)


if __name__ == "__main__":
    # Pruned VGG config: last conv must be 512 so the hard-coded Linear(25088)
    # is shape-compatible.  28x28 input -> two maxpools -> 7x7, so the
    # AdaptiveAvgPool2d((7,7)) is the identity.
    layer_cfg = (8, "M", 16, "M", 512)
    embed_size = 32

    key = jax.random.PRNGKey(0)
    key, pkey, xkey = jax.random.split(key, 3)
    params = init_params(pkey, layer_cfg, embed_size)
    folded = fold_params_for_inference(params, embed_size)
    images = jax.random.normal(xkey, (2, 3, 28, 28), jnp.float32)  # NCHW input

    fwd = jax.jit(encoder_cnn_prune_forward, static_argnums=(2,))
    out = jax.block_until_ready(fwd(folded, images, layer_cfg))
    assert out.shape == (2, embed_size), out.shape
    assert bool(jnp.all(jnp.isfinite(out)))
    print("KERNEL_OK")
</pallas_src>

<mosaic_0001>
module attributes {stable_mosaic.version = 11 : i64} {
  func.func @_mm_bias_kernel(%arg0: i32, %arg1: i32, %arg2: memref<98x144xbf16, #tpu.memory_space<vmem>>, %arg3: memref<144x512xbf16, #tpu.memory_space<vmem>>, %arg4: memref<1x512xf32, #tpu.memory_space<vmem>>, %arg5: memref<98x512xbf16, #tpu.memory_space<vmem>>, %arg6: memref<98x512xf32, #tpu.memory_space<vmem>>) attributes {dimension_semantics = [#tpu.dimension_semantics<parallel>, #tpu.dimension_semantics<arbitrary>], iteration_bounds = array<i64: 1, 1>, scalar_prefetch = 0 : i64, scratch_operands = 1 : i64, tpu.core_type = #tpu.core_type<tc>, window_params = [{transform_indices = @transform_0, window_bounds = array<i64: 98, 144>}, {transform_indices = @transform_1, window_bounds = array<i64: 144, 512>}, {pipeline_mode = #tpu.pipeline_mode<synchronous>, transform_indices = @transform_2, window_bounds = array<i64: 1, 512>}, {transform_indices = @transform_3, window_bounds = array<i64: 98, 512>}]} {
    %c0_i32 = arith.constant 0 : i32
    %0 = arith.cmpi eq, %arg1, %c0_i32 : i32
    %1 = arith.extui %0 : i1 to i32
    %c0_i32_0 = arith.constant 0 : i32
    %2 = arith.cmpi ne, %1, %c0_i32_0 : i32
    scf.if %2 {
      %cst_10 = arith.constant 0.000000e+00 : f32
      %12 = vector.broadcast %cst_10 : f32 to vector<98x512xf32>
      %c0_11 = arith.constant 0 : index
      %c0_12 = arith.constant 0 : index
      %13 = vector.load %arg6[%c0_11, %c0_12] : memref<98x512xf32, #tpu.memory_space<vmem>>, vector<98x512xf32>
      tpu.vector_store %arg6[%c0_11, %c0_12], %12 {strides = array<i32>} : memref<98x512xf32, #tpu.memory_space<vmem>>, vector<98x512xf32>,
    } else {
    }
    %c0 = arith.constant 0 : index
    %c0_1 = arith.constant 0 : index
    %3 = vector.load %arg6[%c0, %c0_1] : memref<98x512xf32, #tpu.memory_space<vmem>>, vector<98x512xf32>
    %c0_2 = arith.constant 0 : index
    %c0_3 = arith.constant 0 : index
    %4 = vector.load %arg2[%c0_2, %c0_3] : memref<98x144xbf16, #tpu.memory_space<vmem>>, vector<98x144xbf16>
    %c0_4 = arith.constant 0 : index
    %c0_5 = arith.constant 0 : index
    %5 = vector.load %arg3[%c0_4, %c0_5] : memref<144x512xbf16, #tpu.memory_space<vmem>>, vector<144x512xbf16>
    %cst = arith.constant dense<0.000000e+00> : vector<98x512xf32>
    %6 = tpu.matmul %4, %5, %cst {dimension_numbers = #tpu.dot_dimension_numbers<[1], [0], [0], [1], [0, 0, 1, 1], [], []>} : vector<98x144xbf16>, vector<144x512xbf16>, vector<98x512xf32> -> vector<98x512xf32>
    %7 = arith.addf %3, %6 : vector<98x512xf32>
    %c0_6 = arith.constant 0 : index
    %c0_7 = arith.constant 0 : index
    %8 = vector.load %arg6[%c0_6, %c0_7] : memref<98x512xf32, #tpu.memory_space<vmem>>, vector<98x512xf32>
    tpu.vector_store %arg6[%c0_6, %c0_7], %7 {strides = array<i32>} : memref<98x512xf32, #tpu.memory_space<vmem>>, vector<98x512xf32>,
    %c0_i32_8 = arith.constant 0 : i32
    %9 = arith.cmpi eq, %arg1, %c0_i32_8 : i32
    %10 = arith.extui %9 : i1 to i32
    %c0_i32_9 = arith.constant 0 : i32
    %11 = arith.cmpi ne, %10, %c0_i32_9 : i32
    scf.if %11 {
      %c0_10 = arith.constant 0 : index
      %c0_11 = arith.constant 0 : index
      %12 = vector.load %arg6[%c0_10, %c0_11] : memref<98x512xf32, #tpu.memory_space<vmem>>, vector<98x512xf32>
      %c0_12 = arith.constant 0 : index
      %c0_13 = arith.constant 0 : index
      %13 = vector.load %arg4[%c0_12, %c0_13] : memref<1x512xf32, #tpu.memory_space<vmem>>, vector<1x512xf32>
      %14 = vector.broadcast %13 : vector<1x512xf32> to vector<98x512xf32>
      %15 = arith.addf %12, %14 : vector<98x512xf32>
      %cst_14 = arith.constant 0.000000e+00 : f32
      %16 = vector.broadcast %cst_14 : f32 to vector<98x512xf32>
      %17 = arith.maximumf %15, %16 : vector<98x512xf32>
      %18 = arith.truncf %17 : vector<98x512xf32> to vector<98x512xbf16>
      %c0_15 = arith.constant 0 : index
      %c0_16 = arith.constant 0 : index
      %19 = vector.load %arg5[%c0_15, %c0_16] : memref<98x512xbf16, #tpu.memory_space<vmem>>, vector<98x512xbf16>
      tpu.vector_store %arg5[%c0_15, %c0_16], %18 {strides = array<i32>} : memref<98x512xbf16, #tpu.memory_space<vmem>>, vector<98x512xbf16>,
    } else {
    }
    return
  }
  func.func @transform_0(%arg0: i32, %arg1: i32) -> (i32, i32) {
    %c0_i32 = arith.constant 0 : i32
    return %arg0, %arg1 : i32, i32
  }
  func.func @transform_1(%arg0: i32, %arg1: i32) -> (i32, i32) {
    %c0_i32 = arith.constant 0 : i32
    %c0_i32_0 = arith.constant 0 : i32
    return %arg1, %c0_i32 : i32, i32
  }
  func.func @transform_2(%arg0: i32, %arg1: i32) -> (i32, i32) {
    %c0_i32 = arith.constant 0 : i32
    %c0_i32_0 = arith.constant 0 : i32
    %c0_i32_1 = arith.constant 0 : i32
    return %c0_i32, %c0_i32_0 : i32, i32
  }
  func.func @transform_3(%arg0: i32, %arg1: i32) -> (i32, i32) {
    %c0_i32 = arith.constant 0 : i32
    %c0_i32_0 = arith.constant 0 : i32
    return %arg0, %c0_i32 : i32, i32
  }
}

module attributes {stable_mosaic.version = 11 : i64} {
  func.func @_mm_bias_kernel(%arg0: i32, %arg1: i32, %arg2: memref<2x12544xbf16, #tpu.memory_space<vmem>>, %arg3: memref<32x12544xbf16, #tpu.memory_space<vmem>>, %arg4: memref<1x32xf32, #tpu.memory_space<vmem>>, %arg5: memref<2x32xf32, #tpu.memory_space<vmem>>, %arg6: memref<2x32xf32, #tpu.memory_space<vmem>>) attributes {dimension_semantics = [#tpu.dimension_semantics<parallel>, #tpu.dimension_semantics<arbitrary>], iteration_bounds = array<i64: 1, 2>, scalar_prefetch = 0 : i64, scratch_operands = 1 : i64, tpu.core_type = #tpu.core_type<tc>, window_params = [{transform_indices = @transform_0, window_bounds = array<i64: 2, 12544>}, {transform_indices = @transform_1, window_bounds = array<i64: 32, 12544>}, {pipeline_mode = #tpu.pipeline_mode<synchronous>, transform_indices = @transform_2, window_bounds = array<i64: 1, 32>}, {transform_indices = @transform_3, window_bounds = array<i64: 2, 32>}]} {
    %c0_i32 = arith.constant 0 : i32
    %0 = arith.cmpi eq, %arg1, %c0_i32 : i32
    %1 = arith.extui %0 : i1 to i32
    %c0_i32_0 = arith.constant 0 : i32
    %2 = arith.cmpi ne, %1, %c0_i32_0 : i32
    scf.if %2 {
      %cst_9 = arith.constant 0.000000e+00 : f32
      %12 = vector.broadcast %cst_9 : f32 to vector<2x32xf32>
      %c0_10 = arith.constant 0 : index
      %c0_11 = arith.constant 0 : index
      %13 = vector.load %arg6[%c0_10, %c0_11] : memref<2x32xf32, #tpu.memory_space<vmem>>, vector<2x32xf32>
      tpu.vector_store %arg6[%c0_10, %c0_11], %12 {strides = array<i32>} : memref<2x32xf32, #tpu.memory_space<vmem>>, vector<2x32xf32>,
    } else {
    }
    %c0 = arith.constant 0 : index
    %c0_1 = arith.constant 0 : index
    %3 = vector.load %arg6[%c0, %c0_1] : memref<2x32xf32, #tpu.memory_space<vmem>>, vector<2x32xf32>
    %c0_2 = arith.constant 0 : index
    %c0_3 = arith.constant 0 : index
    %4 = vector.load %arg2[%c0_2, %c0_3] : memref<2x12544xbf16, #tpu.memory_space<vmem>>, vector<2x12544xbf16>
    %c0_4 = arith.constant 0 : index
    %c0_5 = arith.constant 0 : index
    %5 = vector.load %arg3[%c0_4, %c0_5] : memref<32x12544xbf16, #tpu.memory_space<vmem>>, vector<32x12544xbf16>
    %cst = arith.constant dense<0.000000e+00> : vector<2x32xf32>
    %6 = tpu.matmul %4, %5, %cst {dimension_numbers = #tpu.dot_dimension_numbers<[1], [1], [0], [0], [0, 0, 1, 0], [], []>} : vector<2x12544xbf16>, vector<32x12544xbf16>, vector<2x32xf32> -> vector<2x32xf32>
    %7 = arith.addf %3, %6 : vector<2x32xf32>
    %c0_6 = arith.constant 0 : index
    %c0_7 = arith.constant 0 : index
    %8 = vector.load %arg6[%c0_6, %c0_7] : memref<2x32xf32, #tpu.memory_space<vmem>>, vector<2x32xf32>
    tpu.vector_store %arg6[%c0_6, %c0_7], %7 {strides = array<i32>} : memref<2x32xf32, #tpu.memory_space<vmem>>, vector<2x32xf32>,
    %c1_i32 = arith.constant 1 : i32
    %9 = arith.cmpi eq, %arg1, %c1_i32 : i32
    %10 = arith.extui %9 : i1 to i32
    %c0_i32_8 = arith.constant 0 : i32
    %11 = arith.cmpi ne, %10, %c0_i32_8 : i32
    scf.if %11 {
      %c0_9 = arith.constant 0 : index
      %c0_10 = arith.constant 0 : index
      %12 = vector.load %arg6[%c0_9, %c0_10] : memref<2x32xf32, #tpu.memory_space<vmem>>, vector<2x32xf32>
      %c0_11 = arith.constant 0 : index
      %c0_12 = arith.constant 0 : index
      %13 = vector.load %arg4[%c0_11, %c0_12] : memref<1x32xf32, #tpu.memory_space<vmem>>, vector<1x32xf32>
      %14 = vector.broadcast %13 : vector<1x32xf32> to vector<2x32xf32>
      %15 = arith.addf %12, %14 : vector<2x32xf32>
      %c0_13 = arith.constant 0 : index
      %c0_14 = arith.constant 0 : index
      %16 = vector.load %arg5[%c0_13, %c0_14] : memref<2x32xf32, #tpu.memory_space<vmem>>, vector<2x32xf32>
      tpu.vector_store %arg5[%c0_13, %c0_14], %15 {strides = array<i32>} : memref<2x32xf32, #tpu.memory_space<vmem>>, vector<2x32xf32>,
    } else {
    }
    return
  }
  func.func @transform_0(%arg0: i32, %arg1: i32) -> (i32, i32) {
    %c0_i32 = arith.constant 0 : i32
    return %arg0, %arg1 : i32, i32
  }
  func.func @transform_1(%arg0: i32, %arg1: i32) -> (i32, i32) {
    %c0_i32 = arith.constant 0 : i32
    %c0_i32_0 = arith.constant 0 : i32
    return %c0_i32, %arg1 : i32, i32
  }
  func.func @transform_2(%arg0: i32, %arg1: i32) -> (i32, i32) {
    %c0_i32 = arith.constant 0 : i32
    %c0_i32_0 = arith.constant 0 : i32
    %c0_i32_1 = arith.constant 0 : i32
    return %c0_i32, %c0_i32_0 : i32, i32
  }
  func.func @transform_3(%arg0: i32, %arg1: i32) -> (i32, i32) {
    %c0_i32 = arith.constant 0 : i32
    %c0_i32_0 = arith.constant 0 : i32
    return %arg0, %c0_i32 : i32, i32
  }
}

</mosaic_0001>

<bundles_post_ra>
// kernel: encoder_cnn_prune_forward.2
= control target key start
LH: loop header
LB: loop body
LE: loop exit
PB: predicated region body
PF: predicated region fallthrough
CT: control target
= control target key end

     0   :  { %vm412_vm0 = vcmask 130048   ;;  %s1947_s1 = inlined_call_operand.vmem [shape: bf16[144,512], index: 1, kind: input, shape index: {}]   ;;  %s1948_s0 = inlined_call_operand.vmem [shape: bf16[98,144], index: 0, kind: input, shape index: {}]   ;;  %s1949_s2 = inlined_call_operand.vmem [shape: f32[1,512], index: 2, kind: input, shape index: {}]   ;;  %s1950_s3 = inlined_call_operand.vmem [shape: bf16[98,512], index: 3, kind: output, shape index: {}]  }
   0x1   :  { %v1269_v0 = vld [vmem:[%s1947_s1 + $0xe0] sm:$0xf]  ;;  %v1369_v1 = vld [vmem:[%s1947_s1 + $0xec] sm:$0xf0]  ;;  %v1367_v2 = vld [vmem:[%s1947_s1 + $0xe4] sm:$0xf] }
   0x2   :  { %v1270_v3 = vor.u32 %v1369_v1, %v1269_v0  ;;  %v1271_v4 = vld [vmem:[%s1947_s1 + $0xf0] sm:$0xf0]  ;;  %v1253_v5 = vld [vmem:[%s1947_s1 + $0xc0] sm:$0xf]  ;;  %v1365_v6 = vld [vmem:[%s1947_s1 + $0xcc] sm:$0xf0] }
   0x3   :  { %v1274_v7 = vor.u32 %v1367_v2, %v1271_v4  ;;  %v1363_v8 = vld [vmem:[%s1947_s1 + $0xc4] sm:$0xf]  ;;  %v1255_v9 = vld [vmem:[%s1947_s1 + $0xd0] sm:$0xf0]  ;;  %v1254_v10 = vor.u32 %v1365_v6, %v1253_v5  ;;  %v1237_v12 = vld [vmem:[%s1947_s1 + $0xa0] sm:$0xf] }
   0x4   :  { %434 = vmatpush.bf16.msra.mxu0 %v1270_v3  ;;  %v1258_v11 = vor.u32 %v1363_v8, %v1255_v9  ;;  %v1361_v13 = vld [vmem:[%s1947_s1 + $0xac] sm:$0xf0]  ;;  %v1359_v14 = vld [vmem:[%s1947_s1 + $0xa4] sm:$0xf]  ;;  %v1239_v15 = vld [vmem:[%s1947_s1 + $0xb0] sm:$0xf0] }
   0x5   :  { %520 = vmatpush.bf16.msra.mxu2 %v1274_v7  ;;  %v1238_v16 = vor.u32 %v1361_v13, %v1237_v12  ;;  %v1221_v17 = vld [vmem:[%s1947_s1 + $0x80] sm:$0xf]  ;;  %v1357_v18 = vld [vmem:[%s1947_s1 + $0x8c] sm:$0xf0]  ;;  %v1242_v19 = vor.u32 %v1359_v14, %v1239_v15  ;;  %v1371_v20 = vld [vmem:[%s1947_s1 + $0x104] sm:$0xf] }
   0x6   :  { %v1287_v21 = vld [vmem:[%s1947_s1 + $0x110] sm:$0xf0]  ;;  %v1327_v22 = vld [vmem:[%s1948_s0 + $0x4] sm:$0xf]  ;;  %v1111_v26 = vld [vmem:[%s1948_s0 + $0x8] sm:$0xf0]  ;;  %v1222_v29 = vor.u32 %v1357_v18, %v1221_v17 }
   0x7   :  { %v1355_v23 = vld [vmem:[%s1947_s1 + $0x84] sm:$0xf]  ;;  %v1223_v24 = vld [vmem:[%s1947_s1 + $0x90] sm:$0xf0]  ;;  %v1290_v25 = vor.u32 %v1371_v20, %v1287_v21  ;;  %v1457_v27 = vor.u32 %v1327_v22, %v1111_v26  ;;  %v1285_v28 = vld [vmem:[%s1947_s1 + $0x100] sm:$0xf] }
   0x8   :  { %435 = vmatpush.bf16.msra.mxu0 %v1254_v10  ;;  %v1373_v30 = vld [vmem:[%s1947_s1 + $0x10c] sm:$0xf0]  ;;  %v1226_v31 = vor.u32 %v1355_v23, %v1223_v24  ;;  %v1205_v32 = vld [vmem:[%s1947_s1 + $0x60] sm:$0xf]  ;;  %v1351_v34 = vld [vmem:[%s1947_s1 + $0x64] sm:$0xf] }
   0x9   :  { %521 = vmatpush.bf16.msra.mxu2 %v1258_v11  ;;  %570 = vmatpush.bf16.msra.mxu3 %v1290_v25  ;;  %v1353_v33 = vld [vmem:[%s1947_s1 + $0x6c] sm:$0xf0]  ;;  %v1286_v35 = vor.u32 %v1373_v30, %v1285_v28  ;;  %v1207_v36 = vld [vmem:[%s1947_s1 + $0x70] sm:$0xf0]  ;;  %v1293_v37 = vld [vmem:[%s1947_s1 + $0x108] sm:$0xf] }
   0xa   :  { %v1374_v38 = vld [vmem:[%s1947_s1 + $0x114] sm:$0xf0]  ;;  %v1277_v40 = vld [vmem:[%s1947_s1 + $0xe8] sm:$0xf]  ;;  %v1206_v41 = vor.u32 %v1353_v33, %v1205_v32  ;;  %v1210_v43 = vor.u32 %v1351_v34, %v1207_v36  ;;  %v1189_v44 = vld [vmem:[%s1947_s1 + $0x40] sm:$0xf] }
   0xb   :  { %484 = vmatpush.bf16.msra.mxu1 %v1286_v35  ;;  %v1294_v39 = vor.u32 %v1374_v38, %v1293_v37  ;;  %v1370_v42 = vld [vmem:[%s1947_s1 + $0xf4] sm:$0xf0]  ;;  %v1349_v45 = vld [vmem:[%s1947_s1 + $0x4c] sm:$0xf0]  ;;  %v1347_v47 = vld [vmem:[%s1947_s1 + $0x44] sm:$0xf] }
   0xc   :  { %436 = vmatpush.bf16.msra.mxu0 %v1238_v16  ;;  %1306 = vmatmul.msk.bf16.vlgmr.msra.gmra.mxu3 %vm412_vm0, %v1457_v27  ;;  %v1278_v46 = vor.u32 %v1370_v42, %v1277_v40  ;;  %v1191_v48 = vld [vmem:[%s1947_s1 + $0x50] sm:$0xf0]  ;;  %v1190_v49 = vor.u32 %v1349_v45, %v1189_v44  ;;  %v1261_v50 = vld [vmem:[%s1947_s1 + $0xc8] sm:$0xf]  ;;  %v1366_v51 = vld [vmem:[%s1947_s1 + $0xd4] sm:$0xf0] }
   0xd   :  { %522 = vmatpush.bf16.msra.mxu2 %v1242_v19  ;;  %656 = vmatpush.bf16.msrb.mxu3 %v1294_v39  ;;  %v1194_v52 = vor.u32 %v1347_v47, %v1191_v48  ;;  %v1173_v53 = vld [vmem:[%s1947_s1 + $0x20] sm:$0xf]  ;;  %v1345_v54 = vld [vmem:[%s1947_s1 + $0x2c] sm:$0xf0]  ;;  %v1262_v55 = vor.u32 %v1366_v51, %v1261_v50  ;;  %v1343_v56 = vld [vmem:[%s1947_s1 + $0x24] sm:$0xf] }
   0xe   :  { %1299 = vmatmul.msk.bf16.vlgmr.msra.gmra.mxu1 %vm412_vm0, %v1457_v27  ;;  %v1175_v57 = vld [vmem:[%s1947_s1 + $0x30] sm:$0xf0]  ;;  %v1174_v58 = vor.u32 %v1345_v54, %v1173_v53  ;;  %v1119_v60 = vld [vmem:[%s1948_s0 + $0x18] sm:$0xf0]  ;;  %v1157_v62 = vld [vmem:[%s1947_s1] sm:$0xf] }
   0xf   :  { %606 = vmatpush.bf16.msrb.mxu1 %v1278_v46  ;;  %v1329_v59 = vld [vmem:[%s1948_s0 + $0x14] sm:$0xf]  ;;  %v1178_v61 = vor.u32 %v1343_v56, %v1175_v57  ;;  %v1341_v63 = vld [vmem:[%s1947_s1 + $0xc] sm:$0xf0]  ;;  %v1339_v0 = vld [vmem:[%s1947_s1 + $0x4] sm:$0xf] }
  0x10   :  { %437 = vmatpush.bf16.msra.mxu0 %v1222_v29  ;;  %v1159_v1 = vld [vmem:[%s1947_s1 + $0x10] sm:$0xf0]  ;;  %v1368_v2 = vld [vmem:[%s1947_s1 + $0xec] sm:$0xf]  ;;  %v1279_v3 = vld [vmem:[%s1947_s1 + $0xf8] sm:$0xf0]  ;;  %v1553_v6 = vor.u32 %v1329_v59, %v1119_v60  ;;  %v1158_v7 = vor.u32 %v1341_v63, %v1157_v62 }
  0x11   :  { %523 = vmatpush.bf16.msra.mxu2 %v1226_v31  ;;  %v1372_v4 = vld [vmem:[%s1947_s1 + $0x10c] sm:$0xf]  ;;  %v1295_v5 = vld [vmem:[%s1947_s1 + $0x118] sm:$0xf0]  ;;  %v1109_v8 = vld [vmem:[%s1948_s0] sm:$0xf]  ;;  %v1162_v10 = vor.u32 %v1339_v0, %v1159_v1  ;;  %v1282_v11 = vor.u32 %v1368_v2, %v1279_v3 }
  0x12   :  { %v1328_v9 = vld [vmem:[%s1948_s0 + $0x4] sm:$0xf0]  ;;  %v1298_v12 = vor.u32 %v1372_v4, %v1295_v5  ;;  %v1364_v13 = vld [vmem:[%s1947_s1 + $0xcc] sm:$0xf]  ;;  %v1263_v14 = vld [vmem:[%s1947_s1 + $0xd8] sm:$0xf0] }
  0x13   :  { %607 = vmatpush.bf16.msrb.mxu1 %v1262_v55  ;;  %v1567_v15 = vor.u32 %v1328_v9, %v1109_v8  ;;  %v1266_v16 = vor.u32 %v1364_v13, %v1263_v14  ;;  %v1245_v17 = vld [vmem:[%s1947_s1 + $0xa8] sm:$0xf]  ;;  %v1362_v18 = vld [vmem:[%s1947_s1 + $0xb4] sm:$0xf0]  ;;  %v1360_v19 = vld [vmem:[%s1947_s1 + $0xac] sm:$0xf] }
  0x14   :  { %438 = vmatpush.bf16.msra.mxu0 %v1206_v41  ;;  %v1246_v20 = vor.u32 %v1362_v18, %v1245_v17  ;;  %v1247_v21 = vld [vmem:[%s1947_s1 + $0xb8] sm:$0xf0]  ;;  %v1331_v23 = vld [vmem:[%s1948_s0 + $0x24] sm:$0xf]  ;;  %v1127_v24 = vld [vmem:[%s1948_s0 + $0x28] sm:$0xf0] }
  0x15   :  { %524 = vmatpush.bf16.msra.mxu2 %v1210_v43  ;;  %v1250_v22 = vor.u32 %v1360_v19, %v1247_v21  ;;  %v1593_v25 = vor.u32 %v1331_v23, %v1127_v24  ;;  %v1117_v26 = vld [vmem:[%s1948_s0 + $0x10] sm:$0xf]  ;;  %v1330_v28 = vld [vmem:[%s1948_s0 + $0x14] sm:$0xf0]  ;;  %v1229_v30 = vld [vmem:[%s1947_s1 + $0x88] sm:$0xf] }
  0x16   :  { %v1601_v29 = vor.u32 %v1330_v28, %v1117_v26  ;;  %v1358_v31 = vld [vmem:[%s1947_s1 + $0x94] sm:$0xf0]  ;;  %v1356_v32 = vld [vmem:[%s1947_s1 + $0x8c] sm:$0xf]  ;;  %v1231_v34 = vld [vmem:[%s1947_s1 + $0x98] sm:$0xf0] }
  0x17   :  { %608 = vmatpush.bf16.msrb.mxu1 %v1246_v20  ;;  %v1230_v33 = vor.u32 %v1358_v31, %v1229_v30  ;;  %v1234_v35 = vor.u32 %v1356_v32, %v1231_v34  ;;  %v1213_v36 = vld [vmem:[%s1947_s1 + $0x68] sm:$0xf]  ;;  %v1354_v37 = vld [vmem:[%s1947_s1 + $0x74] sm:$0xf0]  ;;  %v1352_v38 = vld [vmem:[%s1947_s1 + $0x6c] sm:$0xf] }
  0x18   :  { %439 = vmatpush.bf16.msra.mxu0 %v1190_v49  ;;  %v1214_v39 = vor.u32 %v1354_v37, %v1213_v36  ;;  %v1215_v40 = vld [vmem:[%s1947_s1 + $0x78] sm:$0xf0]  ;;  %v1333_v41 = vld [vmem:[%s1948_s0 + $0x34] sm:$0xf]  ;;  %v1125_v45 = vld [vmem:[%s1948_s0 + $0x20] sm:$0xf] }
  0x19   :  { %525 = vmatpush.bf16.msra.mxu2 %v1194_v52  ;;  %v1135_v42 = vld [vmem:[%s1948_s0 + $0x38] sm:$0xf0]  ;;  %v1218_v43 = vor.u32 %v1352_v38, %v1215_v40  ;;  %v1332_v46 = vld [vmem:[%s1948_s0 + $0x24] sm:$0xf0]  ;;  %v1350_v49 = vld [vmem:[%s1947_s1 + $0x54] sm:$0xf0] }
  0x1a   :  { %v1639_v44 = vor.u32 %v1333_v41, %v1135_v42  ;;  %v1647_v47 = vor.u32 %v1332_v46, %v1125_v45  ;;  %v1197_v48 = vld [vmem:[%s1947_s1 + $0x48] sm:$0xf]  ;;  %v1348_v50 = vld [vmem:[%s1947_s1 + $0x4c] sm:$0xf]  ;;  %v1199_v51 = vld [vmem:[%s1947_s1 + $0x58] sm:$0xf0] }
  0x1b   :  { %609 = vmatpush.bf16.msrb.mxu1 %v1230_v33  ;;  %v1198_v52 = vor.u32 %v1350_v49, %v1197_v48  ;;  %v1202_v53 = vor.u32 %v1348_v50, %v1199_v51  ;;  %v1335_v54 = vld [vmem:[%s1948_s0 + $0x44] sm:$0xf]  ;;  %v1143_v55 = vld [vmem:[%s1948_s0 + $0x48] sm:$0xf0]  ;;  %v1133_v57 = vld [vmem:[%s1948_s0 + $0x30] sm:$0xf] }
  0x1c   :  { %440 = vmatpush.bf16.msra.mxu0 %v1174_v58  ;;  %1307 = vmatmul.msk.bf16.gmra.mxu3 %vm412_vm0, %v1553_v6  ;;  %v1673_v56 = vor.u32 %v1335_v54, %v1143_v55  ;;  %v1334_v58 = vld [vmem:[%s1948_s0 + $0x34] sm:$0xf0]  ;;  %v1181_v60 = vld [vmem:[%s1947_s1 + $0x28] sm:$0xf]  ;;  %v1344_v63 = vld [vmem:[%s1947_s1 + $0x2c] sm:$0xf] }
  0x1d   :  { %526 = vmatpush.bf16.msra.mxu2 %v1178_v61  ;;  %v1681_v59 = vor.u32 %v1334_v58, %v1133_v57  ;;  %v1346_v61 = vld [vmem:[%s1947_s1 + $0x34] sm:$0xf0]  ;;  %v1183_v0 = vld [vmem:[%s1947_s1 + $0x38] sm:$0xf0]  ;;  %v1337_v2 = vld [vmem:[%s1948_s0 + $0x54] sm:$0xf] }
  0x1e   :  { %1300 = vmatmul.msk.bf16.gmra.mxu1 %vm412_vm0, %v1553_v6  ;;  %v1182_v62 = vor.u32 %v1346_v61, %v1181_v60  ;;  %v1186_v1 = vor.u32 %v1344_v63, %v1183_v0  ;;  %v1151_v3 = vld [vmem:[%s1948_s0 + $0x58] sm:$0xf0]  ;;  %v1141_v5 = vld [vmem:[%s1948_s0 + $0x40] sm:$0xf]  ;;  %v1149_v19 = vld [vmem:[%s1948_s0 + $0x50] sm:$0xf] }
  0x1f   :  { %610 = vmatpush.bf16.msrb.mxu1 %v1214_v39  ;;  %v1707_v4 = vor.u32 %v1337_v2, %v1151_v3  ;;  %v135_v9 = vld [vmem:[%s1948_s0 + $0x60] sm:$0x11]  ;;  %v1167_v14 = vld [vmem:[%s1947_s1 + $0x18] sm:$0xf0]  ;;  %v1338_v20 = vld [vmem:[%s1948_s0 + $0x54] sm:$0xf0] }
  0x20   :  { %441 = vmatpush.bf16.msra.mxu0 %v1158_v7  ;;  %v1336_v7 = vld [vmem:[%s1948_s0 + $0x44] sm:$0xf0]  ;;  %v210_v17 = vunpack.c.h.b16 %v135_v9  ;;  %v1746_v21 = vor.u32 %v1338_v20, %v1149_v19  ;;  %v209_v23 = vunpack.c.l.b16 %v135_v9 }
  0x21   :  { %527 = vmatpush.bf16.msra.mxu2 %v1162_v10  ;;  %v1715_v8 = vor.u32 %v1336_v7, %v1141_v5  ;;  %v1165_v10 = vld [vmem:[%s1947_s1 + $0x8] sm:$0xf] }
  0x22   :  { %v1738_v18 = vpack.c.b16 %v210_v17, %v210_v17  ;;  %v1754_v24 = vpack.c.b16 %v209_v23, %v209_v23 }
  0x23   :  { %442 = vmatmul.bf16.vlgmr.msra.gmra.mxu0 %v1567_v15  ;;  %611 = vmatpush.bf16.msrb.mxu1 %v1198_v52 }
  0x24   :  { %692 = vmatpush.bf16.msrb.mxu0 %v1282_v11  ;;  %528 = vmatmul.bf16.vlgmr.msra.gmra.mxu2 %v1567_v15  ;;  %v1342_v11 = vld [vmem:[%s1947_s1 + $0x14] sm:$0xf0] }
  0x25   :  { %742 = vmatpush.bf16.msrb.mxu2 %v1298_v12  ;;  %v1340_v12 = vld [vmem:[%s1947_s1 + $0xc] sm:$0xf]  ;;  %v1166_v13 = vor.u32 %v1342_v11, %v1165_v10 }
  0x27   :  { %612 = vmatpush.bf16.msrb.mxu1 %v1182_v62 }
  0x28   :  { %693 = vmatpush.bf16.msrb.mxu0 %v1266_v16  ;;  %v1170_v16 = vor.u32 %v1340_v12, %v1167_v14 }
  0x2b   :  { %613 = vmatpush.bf16.msrb.mxu1 %v1166_v13 }
  0x2c   :  { %694 = vmatpush.bf16.msrb.mxu0 %v1250_v22  ;;  %1308 = vmatmul.msk.bf16.gmra.mxu3 %vm412_vm0, %v1593_v25  ;;  %v1376_v22 = vmov 0.0  }
  0x2d   :  { %67 = vst [vmem:[#allocation2 + $0x98] sm:$0x3] %v1376_v22 }
  0x2e   :  { %1301 = vmatmul.msk.bf16.gmra.mxu1 %vm412_vm0, %v1593_v25  ;;  %68 = vst [vmem:[#allocation2 + $0x150] sm:$0x3] %v1376_v22 }
  0x2f   :  { %69 = vst [vmem:[#allocation2 + $0xe8] sm:$0x3] %v1376_v22 }
  0x30   :  { %695 = vmatpush.bf16.msrb.mxu0 %v1234_v35  ;;  %70 = vst [vmem:[#allocation2 + $0x70] sm:$0x3] %v1376_v22  ;;  %v1772_v35 = vld [vmem:[%s1949_s2] sm:$0xf] }
  0x31   :  { %v1783_v40 = vperm.slane %v1772_v35, 1 }
  0x33   :  { %447 = vmatmul.bf16.gmra.mxu0 %v1601_v29 }
  0x34   :  { %533 = vmatmul.bf16.gmra.mxu2 %v1601_v29  ;;  %696 = vmatpush.bf16.msrb.mxu0 %v1218_v43 }
  0x38   :  { %697 = vmatpush.bf16.msrb.mxu0 %v1202_v53 }
  0x3c   :  { %1309 = vmatmul.msk.bf16.gmra.mxu3 %vm412_vm0, %v1639_v44  ;;  %698 = vmatpush.bf16.msrb.mxu0 %v1186_v1 }
  0x3e   :  { %1302 = vmatmul.msk.bf16.gmra.mxu1 %vm412_vm0, %v1639_v44 }
  0x40   :  { %699 = vmatpush.bf16.msrb.mxu0 %v1170_v16 }
  0x43   :  { %452 = vmatmul.bf16.gmra.mxu0 %v1647_v47 }
  0x44   :  { %538 = vmatmul.bf16.gmra.mxu2 %v1647_v47 }
  0x4c   :  { %1310 = vmatmul.msk.bf16.gmra.mxu3 %vm412_vm0, %v1673_v56 }
  0x4e   :  { %1303 = vmatmul.msk.bf16.gmra.mxu1 %vm412_vm0, %v1673_v56 }
  0x53   :  { %457 = vmatmul.bf16.gmra.mxu0 %v1681_v59 }
  0x54   :  { %543 = vmatmul.bf16.gmra.mxu2 %v1681_v59 }
  0x5c   :  { %1311 = vmatmul.msk.bf16.gmra.mxu3 %vm412_vm0, %v1707_v4 }
  0x5e   :  { %1304 = vmatmul.msk.bf16.gmra.mxu1 %vm412_vm0, %v1707_v4 }
  0x63   :  { %462 = vmatmul.bf16.gmra.mxu0 %v1715_v8 }
  0x64   :  { %548 = vmatmul.bf16.gmra.mxu2 %v1715_v8 }
  0x6c   :  { %1312 = vmatmul.msk.bf16.gmra.mxu3 %vm412_vm0, %v1738_v18 }
  0x6e   :  { %1305 = vmatmul.msk.bf16.gmra.mxu1 %vm412_vm0, %v1738_v18 }
  0x73   :  { %467 = vmatmul.bf16.gmra.mxu0 %v1746_v21 }
  0x74   :  { %553 = vmatmul.bf16.gmra.mxu2 %v1746_v21 }
  0x7c   :  { %1313 = vmatmul.msk.bf16.vlgmr.msrb.gmra.mxu3 %vm412_vm0, %v1457_v27 }
  0x7e   :  { %614 = vmatmul.bf16.vlgmr.msrb.gmra.mxu1 %v1567_v15 }
  0x83   :  { %472 = vmatmul.bf16.gmra.mxu0 %v1754_v24 }
  0x84   :  { %558 = vmatmul.bf16.gmra.mxu2 %v1754_v24 }
  0x8b   :  { %v486_v26 = vpop.f32.mrf.mxu1 }
  0x8c   :  { %1314 = vmatmul.msk.bf16.gmra.mxu3 %vm412_vm0, %v1553_v6 }
  0x8e   :  { %619 = vmatmul.bf16.gmra.mxu1 %v1601_v29 }
  0x8f   :  { %v572_v28 = vpop.f32.mrf.mxu3 }
  0x93   :  { %700 = vmatmul.bf16.vlgmr.msrb.gmra.mxu0 %v1567_v15  ;;  %v488_v30 = vpop.f32.mrf.mxu1 }
  0x94   :  { %1320 = vmatmul.msk.bf16.vlgmr.msrb.gmra.mxu2 %vm412_vm0, %v1457_v27  ;;  %v1777_v27 = vperm.slane %v1772_v35, 0 }
  0x97   :  { %v574_v31 = vpop.f32.mrf.mxu3 }
  0x9b   :  { %v491_v32 = vpop.f32.mrf.mxu1 }
  0x9c   :  { %1315 = vmatmul.msk.bf16.gmra.mxu3 %vm412_vm0, %v1593_v25 }
  0x9e   :  { %624 = vmatmul.bf16.gmra.mxu1 %v1647_v47 }
  0x9f   :  { %v577_v36 = vpop.f32.mrf.mxu3 }
  0xa0   :  { %v443_v33 = vpop.f32.mrf.mxu0 }
  0xa1   :  { %v487_v34 = vadd.f32 %v486_v26, %v443_v33 }
  0xa3   :  { %705 = vmatmul.bf16.gmra.mxu0 %v1601_v29  ;;  %v493_v37 = vpop.f32.mrf.mxu1  ;;  %v947_v38 = vadd.f32 %v1777_v27, %v487_v34 }
  0xa4   :  { %1321 = vmatmul.msk.bf16.gmra.mxu2 %vm412_vm0, %v1553_v6 }
  0xa5   :  { %v999_v45 = vmax.f32 %v947_v38, 0.0 }
  0xa7   :  { %v529_v15 = vpop.f32.mrf.mxu2  ;;  %v579_v43 = vpop.f32.mrf.mxu3 }
  0xa8   :  { %v573_v39 = vadd.f32 %v572_v28, %v529_v15  ;;  %v445_v41 = vpop.f32.mrf.mxu0 }
  0xa9   :  { %v489_v42 = vadd.f32 %v488_v30, %v445_v41 }
  0xaa   :  { %v948_v29 = vadd.f32 %v1783_v40, %v573_v39 }
  0xab   :  { %v496_v6 = vpop.f32.mrf.mxu1  ;;  %v951_v53 = vadd.f32 %v1777_v27, %v489_v42 }
  0xac   :  { %v1000_v46 = vmax.f32 %v948_v29, 0.0  ;;  %1316 = vmatmul.msk.bf16.gmra.mxu3 %vm412_vm0, %v1639_v44 }
  0xad   :  { %v1003_v57 = vmax.f32 %v951_v53, 0.0 }
  0xae   :  { %v1051_v49 = vpack.c.bf16 %v1000_v46, %v999_v45  ;;  %629 = vmatmul.bf16.gmra.mxu1 %v1681_v59 }
  0xaf   :  { %v531_v48 = vpop.f32.mrf.mxu2  ;;  %v582_v54 = vpop.f32.mrf.mxu3 }
  0xb0   :  { %v575_v50 = vadd.f32 %v574_v31, %v531_v48  ;;  %v448_v51 = vpop.f32.mrf.mxu0  ;;  %1077 = vst [vmem:[%s1950_s3] sm:$0xff] %v1051_v49 }
  0xb1   :  { %v492_v52 = vadd.f32 %v491_v32, %v448_v51 }
  0xb2   :  { %v952_v55 = vadd.f32 %v1783_v40, %v575_v50 }
  0xb3   :  { %710 = vmatmul.bf16.gmra.mxu0 %v1647_v47  ;;  %v498_v61 = vpop.f32.mrf.mxu1  ;;  %v955_v63 = vadd.f32 %v1777_v27, %v492_v52 }
  0xb4   :  { %1322 = vmatmul.msk.bf16.gmra.mxu2 %vm412_vm0, %v1593_v25  ;;  %v1004_v58 = vmax.f32 %v952_v55, 0.0 }
  0xb5   :  { %v1007_v3 = vmax.f32 %v955_v63, 0.0 }
  0xb6   :  { %v1053_v62 = vpack.c.bf16 %v1004_v58, %v1003_v57 }
  0xb7   :  { %v534_v60 = vpop.f32.mrf.mxu2  ;;  %v584_v47 = vpop.f32.mrf.mxu3 }
  0xb8   :  { %v578_v0 = vadd.f32 %v577_v36, %v534_v60  ;;  %v450_v1 = vpop.f32.mrf.mxu0  ;;  %1079 = vst [vmem:[%s1950_s3 + $0x10] sm:$0xff] %v1053_v62 }
  0xb9   :  { %v494_v2 = vadd.f32 %v493_v37, %v450_v1 }
  0xba   :  { %v956_v5 = vadd.f32 %v1783_v40, %v578_v0 }
  0xbb   :  { %v501_v9 = vpop.f32.mrf.mxu1  ;;  %v959_v14 = vadd.f32 %v1777_v27, %v494_v2 }
  0xbc   :  { %v1008_v7 = vmax.f32 %v956_v5, 0.0  ;;  %1317 = vmatmul.msk.bf16.gmra.mxu3 %vm412_vm0, %v1673_v56 }
  0xbd   :  { %v1011_v19 = vmax.f32 %v959_v14, 0.0 }
  0xbe   :  { %v1055_v10 = vpack.c.bf16 %v1008_v7, %v1007_v3  ;;  %634 = vmatmul.bf16.gmra.mxu1 %v1715_v8 }
  0xbf   :  { %v536_v25 = vpop.f32.mrf.mxu2  ;;  %v587_v16 = vpop.f32.mrf.mxu3 }
  0xc0   :  { %v580_v11 = vadd.f32 %v579_v43, %v536_v25  ;;  %v453_v12 = vpop.f32.mrf.mxu0  ;;  %1081 = vst [vmem:[%s1950_s3 + $0x20] sm:$0xff] %v1055_v10 }
  0xc1   :  { %v497_v13 = vadd.f32 %v496_v6, %v453_v12 }
  0xc2   :  { %v960_v17 = vadd.f32 %v1783_v40, %v580_v11 }
  0xc3   :  { %715 = vmatmul.bf16.gmra.mxu0 %v1681_v59  ;;  %v503_v23 = vpop.f32.mrf.mxu1  ;;  %v963_v28 = vadd.f32 %v1777_v27, %v497_v13 }
  0xc4   :  { %1323 = vmatmul.msk.bf16.gmra.mxu2 %vm412_vm0, %v1639_v44  ;;  %v1012_v20 = vmax.f32 %v960_v17, 0.0 }
  0xc5   :  { %v1015_v33 = vmax.f32 %v963_v28, 0.0 }
  0xc6   :  { %v1057_v26 = vpack.c.bf16 %v1012_v20, %v1011_v19 }
  0xc7   :  { %v539_v22 = vpop.f32.mrf.mxu2  ;;  %v589_v59 = vpop.f32.mrf.mxu3 }
  0xc8   :  { %v583_v30 = vadd.f32 %v582_v54, %v539_v22  ;;  %v455_v31 = vpop.f32.mrf.mxu0  ;;  %1083 = vst [vmem:[%s1950_s3 + $0x30] sm:$0xff] %v1057_v26 }
  0xc9   :  { %v499_v32 = vadd.f32 %v498_v61, %v455_v31 }
  0xca   :  { %v964_v34 = vadd.f32 %v1783_v40, %v583_v30 }
  0xcb   :  { %v506_v15 = vpop.f32.mrf.mxu1  ;;  %v967_v42 = vadd.f32 %v1777_v27, %v499_v32 }
  0xcc   :  { %v1016_v36 = vmax.f32 %v964_v34, 0.0  ;;  %1318 = vmatmul.msk.bf16.gmra.mxu3 %vm412_vm0, %v1707_v4 }
  0xcd   :  { %v1019_v29 = vmax.f32 %v967_v42, 0.0 }
  0xce   :  { %v1059_v37 = vpack.c.bf16 %v1016_v36, %v1015_v33  ;;  %639 = vmatmul.bf16.gmra.mxu1 %v1746_v21 }
  0xcf   :  { %v541_v44 = vpop.f32.mrf.mxu2  ;;  %v592_v43 = vpop.f32.mrf.mxu3 }
  0xd0   :  { %v585_v38 = vadd.f32 %v584_v47, %v541_v44  ;;  %v458_v39 = vpop.f32.mrf.mxu0  ;;  %1085 = vst [vmem:[%s1950_s3 + $0x40] sm:$0xff] %v1059_v37 }
  0xd1   :  { %v502_v41 = vadd.f32 %v501_v9, %v458_v39 }
  0xd2   :  { %v968_v45 = vadd.f32 %v1783_v40, %v585_v38 }
  0xd3   :  { %720 = vmatmul.bf16.gmra.mxu0 %v1715_v8  ;;  %v508_v6 = vpop.f32.mrf.mxu1  ;;  %v971_v50 = vadd.f32 %v1777_v27, %v502_v41 }
  0xd4   :  { %1324 = vmatmul.msk.bf16.gmra.mxu2 %vm412_vm0, %v1673_v56  ;;  %v1020_v46 = vmax.f32 %v968_v45, 0.0 }
  0xd5   :  { %v1023_v54 = vmax.f32 %v971_v50, 0.0 }
  0xd6   :  { %v1061_v49 = vpack.c.bf16 %v1020_v46, %v1019_v29  ;;  %v119_v29 = vld [vmem:[#allocation2 + $0x98] sm:$0x3] }
  0xd7   :  { %v544_v48 = vpop.f32.mrf.mxu2  ;;  %v594_v8 = vpop.f32.mrf.mxu3 }
  0xd8   :  { %v588_v51 = vadd.f32 %v587_v16, %v544_v48  ;;  %v460_v52 = vpop.f32.mrf.mxu0  ;;  %1087 = vst [vmem:[%s1950_s3 + $0x50] sm:$0xff] %v1061_v49 }
  0xd9   :  { %v504_v53 = vadd.f32 %v503_v23, %v460_v52 }
  0xda   :  { %v972_v55 = vadd.f32 %v1783_v40, %v588_v51 }
  0xdb   :  { %v511_v58 = vpop.f32.mrf.mxu1  ;;  %v975_v0 = vadd.f32 %v1777_v27, %v504_v53 }
  0xdc   :  { %v1024_v57 = vmax.f32 %v972_v55, 0.0  ;;  %1319 = vmatmul.msk.bf16.gmra.mxu3 %vm412_vm0, %v1738_v18 }
  0xdd   :  { %v1027_v47 = vmax.f32 %v975_v0, 0.0 }
  0xde   :  { %v1063_v60 = vpack.c.bf16 %v1024_v57, %v1023_v54  ;;  %644 = vmatmul.bf16.gmra.mxu1 %v1754_v24  ;;  %v120_v54 = vld [vmem:[#allocation2 + $0x150] sm:$0x3] }
  0xdf   :  { %v546_v56 = vpop.f32.mrf.mxu2  ;;  %v597_v1 = vpop.f32.mrf.mxu3 }
  0xe0   :  { %v590_v61 = vadd.f32 %v589_v59, %v546_v56  ;;  %v463_v62 = vpop.f32.mrf.mxu0  ;;  %1089 = vst [vmem:[%s1950_s3 + $0x60] sm:$0xff] %v1063_v60 }
  0xe1   :  { %v507_v63 = vadd.f32 %v506_v15, %v463_v62 }
  0xe2   :  { %v976_v2 = vadd.f32 %v1783_v40, %v590_v61 }
  0xe3   :  { %725 = vmatmul.bf16.gmra.mxu0 %v1746_v21  ;;  %v513_v7 = vpop.f32.mrf.mxu1  ;;  %v979_v9 = vadd.f32 %v1777_v27, %v507_v63 }
  0xe4   :  { %1325 = vmatmul.msk.bf16.gmra.mxu2 %vm412_vm0, %v1707_v4  ;;  %v1028_v3 = vmax.f32 %v976_v2, 0.0 }
  0xe5   :  { %v1031_v13 = vmax.f32 %v979_v9, 0.0 }
  0xe6   :  { %v1065_v25 = vpack.c.bf16 %v1028_v3, %v1027_v47 }
  0xe7   :  { %v549_v5 = vpop.f32.mrf.mxu2  ;;  %v599_v21 = vpop.f32.mrf.mxu3 }
  0xe8   :  { %v593_v10 = vadd.f32 %v592_v43, %v549_v5  ;;  %v465_v11 = vpop.f32.mrf.mxu0  ;;  %1091 = vst [vmem:[%s1950_s3 + $0x70] sm:$0xff] %v1065_v25 }
  0xe9   :  { %v509_v12 = vadd.f32 %v508_v6, %v465_v11  ;;  %v1874_v11 = vperm.slane %v1772_v35, 2 }
  0xea   :  { %v980_v14 = vadd.f32 %v1783_v40, %v593_v10 }
  0xeb   :  { %v516_v17 = vpop.f32.mrf.mxu1  ;;  %v983_v26 = vadd.f32 %v1777_v27, %v509_v12 }
  0xec   :  { %v1032_v16 = vmax.f32 %v980_v14, 0.0 }
  0xed   :  { %v1035_v31 = vmax.f32 %v983_v26, 0.0 }
  0xee   :  { %v1067_v19 = vpack.c.bf16 %v1032_v16, %v1031_v13 }
  0xef   :  { %v551_v4 = vpop.f32.mrf.mxu2  ;;  %v602_v28 = vpop.f32.mrf.mxu3 }
  0xf0   :  { %v595_v20 = vadd.f32 %v594_v8, %v551_v4  ;;  %v468_v22 = vpop.f32.mrf.mxu0  ;;  %1093 = vst [vmem:[%s1950_s3 + $0x80] sm:$0xff] %v1067_v19 }
  0xf1   :  { %v512_v23 = vadd.f32 %v511_v58, %v468_v22 }
  0xf2   :  { %v984_v30 = vadd.f32 %v1783_v40, %v595_v20 }
  0xf3   :  { %730 = vmatmul.bf16.gmra.mxu0 %v1754_v24  ;;  %v518_v33 = vpop.f32.mrf.mxu1  ;;  %v987_v36 = vadd.f32 %v1777_v27, %v512_v23 }
  0xf4   :  { %1326 = vmatmul.msk.bf16.gmra.mxu2 %vm412_vm0, %v1738_v18  ;;  %v1036_v32 = vmax.f32 %v984_v30, 0.0 }
  0xf5   :  { %v1039_v38 = vmax.f32 %v987_v36, 0.0 }
  0xf6   :  { %v1069_v34 = vpack.c.bf16 %v1036_v32, %v1035_v31 }
  0xf7   :  { %v554_v59 = vpop.f32.mrf.mxu2  ;;  %v604_v24 = vpop.f32.mrf.mxu3 }
  0xf8   :  { %v598_v44 = vadd.f32 %v597_v1, %v554_v59  ;;  %v470_v15 = vpop.f32.mrf.mxu0  ;;  %1095 = vst [vmem:[%s1950_s3 + $0x90] sm:$0xff] %v1069_v34 }
  0xf9   :  { %v514_v37 = vadd.f32 %v513_v7, %v470_v15 }
  0xfa   :  { %v988_v39 = vadd.f32 %v1783_v40, %v598_v44 }
  0xfb   :  { %v615_v42 = vpop.f32.mrf.mxu1  ;;  %v991_v6 = vadd.f32 %v1777_v27, %v514_v37 }
  0xfc   :  { %v1040_v41 = vmax.f32 %v988_v39, 0.0 }
  0xfd   :  { %v1043_v53 = vmax.f32 %v991_v6, 0.0 }
  0xfe   :  { %v1071_v43 = vpack.c.bf16 %v1040_v41, %v1039_v38 }
  0xff   :  { %v556_v18 = vpop.f32.mrf.mxu2  ;;  %v658_v49 = vpop.f32.mrf.mxu3 }
 0x100   :  { %v600_v45 = vadd.f32 %v599_v21, %v556_v18  ;;  %v473_v46 = vpop.f32.mrf.mxu0  ;;  %1097 = vst [vmem:[%s1950_s3 + $0xa0] sm:$0xff] %v1071_v43  ;;  %v659_v51 = vadd.f32 %v658_v49, %v615_v42 }
 0x101   :  { %v517_v48 = vadd.f32 %v516_v17, %v473_v46  ;;  %v1878_v17 = vperm.slane %v1772_v35, 3 }
 0x102   :  { %v992_v52 = vadd.f32 %v1783_v40, %v600_v45  ;;  %v949_v16 = vadd.f32 %v1874_v11, %v659_v51 }
 0x103   :  { %v826_v50 = vadd.f32 %v517_v48, %v119_v29  ;;  %v617_v57 = vpop.f32.mrf.mxu1 }
 0x104   :  { %v1044_v8 = vmax.f32 %v992_v52, 0.0  ;;  %v1001_v20 = vmax.f32 %v949_v16, 0.0 }
 0x105   :  { %878 = vst [vmem:[#allocation2 + $0x98] sm:$0x3] %v826_v50 }
 0x106   :  { %v1073_v56 = vpack.c.bf16 %v1044_v8, %v1043_v53 }
 0x107   :  { %v559_v55 = vpop.f32.mrf.mxu2  ;;  %v660_v62 = vpop.f32.mrf.mxu3 }
 0x108   :  { %v603_v58 = vadd.f32 %v602_v28, %v559_v55  ;;  %v475_v60 = vpop.f32.mrf.mxu0  ;;  %1099 = vst [vmem:[%s1950_s3 + $0xb0] sm:$0xff] %v1073_v56  ;;  %v661_v63 = vadd.f32 %v660_v62, %v617_v57 }
 0x10a   :  { %v827_v61 = vadd.f32 %v603_v58, %v120_v54  ;;  %v953_v59 = vadd.f32 %v1874_v11, %v661_v63 }
 0x10b   :  { %v620_v2 = vpop.f32.mrf.mxu1 }
 0x10c   :  { %879 = vst [vmem:[#allocation2 + $0x150] sm:$0x3] %v827_v61  ;;  %v933_v0 = vld [vmem:[#allocation2 + $0x98] sm:$0x3]  ;;  %v1005_v36 = vmax.f32 %v953_v59, 0.0 }
 0x10d   :  { %v995_v47 = vadd.f32 %v1777_v27, %v933_v0 }
 0x10f   :  { %v561_v1 = vpop.f32.mrf.mxu2  ;;  %v663_v5 = vpop.f32.mrf.mxu3  ;;  %v1047_v9 = vmax.f32 %v995_v47, 0.0 }
 0x110   :  { %v701_v3 = vpop.f32.mrf.mxu0  ;;  %v664_v25 = vadd.f32 %v663_v5, %v620_v2 }
 0x112   :  { %v957_v24 = vadd.f32 %v1874_v11, %v664_v25 }
 0x113   :  { %v934_v7 = vld [vmem:[#allocation2 + $0x150] sm:$0x3]  ;;  %v622_v13 = vpop.f32.mrf.mxu1 }
 0x114   :  { %v996_v10 = vadd.f32 %v1783_v40, %v934_v7  ;;  %v1009_v43 = vmax.f32 %v957_v24, 0.0 }
 0x116   :  { %v1048_v12 = vmax.f32 %v996_v10, 0.0 }
 0x117   :  { %v744_v21 = vpop.f32.mrf.mxu2  ;;  %v665_v19 = vpop.f32.mrf.mxu3 }
 0x118   :  { %v1075_v14 = vpack.c.bf16 %v1048_v12, %v1047_v9  ;;  %v745_v4 = vadd.f32 %v744_v21, %v701_v3  ;;  %v703_v27 = vpop.f32.mrf.mxu0  ;;  %v666_v40 = vadd.f32 %v665_v19, %v622_v13 }
 0x11a   :  { %1101 = vst [vmem:[%s1950_s3 + $0xc0] sm:$0x11] %v1075_v14  ;;  %v950_v22 = vadd.f32 %v1878_v17, %v745_v4  ;;  %v961_v51 = vadd.f32 %v1874_v11, %v666_v40 }
 0x11b   :  { %v625_v28 = vpop.f32.mrf.mxu1 }
 0x11c   :  { %v1002_v23 = vmax.f32 %v950_v22, 0.0  ;;  %v1013_v54 = vmax.f32 %v961_v51, 0.0 }
 0x11e   :  { %v1052_v30 = vpack.c.bf16 %v1002_v23, %v1001_v20 }
 0x11f   :  { %v746_v26 = vpop.f32.mrf.mxu2  ;;  %v668_v35 = vpop.f32.mrf.mxu3 }
 0x120   :  { %v747_v31 = vadd.f32 %v746_v26, %v703_v27  ;;  %v706_v32 = vpop.f32.mrf.mxu0  ;;  %1078 = vst [vmem:[%s1950_s3 + $0x8] sm:$0xff] %v1052_v30  ;;  %v669_v33 = vadd.f32 %v668_v35, %v625_v28 }
 0x122   :  { %v954_v34 = vadd.f32 %v1878_v17, %v747_v31  ;;  %v965_v58 = vadd.f32 %v1874_v11, %v669_v33 }
 0x123   :  { %v627_v37 = vpop.f32.mrf.mxu1 }
 0x124   :  { %v1006_v44 = vmax.f32 %v954_v34, 0.0  ;;  %v1017_v1 = vmax.f32 %v965_v58, 0.0 }
 0x126   :  { %v1054_v38 = vpack.c.bf16 %v1006_v44, %v1005_v36 }
 0x127   :  { %v749_v15 = vpop.f32.mrf.mxu2  ;;  %v670_v18 = vpop.f32.mrf.mxu3 }
 0x128   :  { %v750_v39 = vadd.f32 %v749_v15, %v706_v32  ;;  %v708_v41 = vpop.f32.mrf.mxu0  ;;  %1080 = vst [vmem:[%s1950_s3 + $0x18] sm:$0xff] %v1054_v38  ;;  %v671_v42 = vadd.f32 %v670_v18, %v627_v37 }
 0x12a   :  { %v958_v45 = vadd.f32 %v1878_v17, %v750_v39  ;;  %v969_v10 = vadd.f32 %v1874_v11, %v671_v42 }
 0x12b   :  { %v630_v48 = vpop.f32.mrf.mxu1 }
 0x12c   :  { %v1010_v29 = vmax.f32 %v958_v45, 0.0  ;;  %v1021_v14 = vmax.f32 %v969_v10, 0.0 }
 0x12e   :  { %v1056_v6 = vpack.c.bf16 %v1010_v29, %v1009_v43 }
 0x12f   :  { %v751_v46 = vpop.f32.mrf.mxu2  ;;  %v673_v52 = vpop.f32.mrf.mxu3 }
 0x130   :  { %v752_v49 = vadd.f32 %v751_v46, %v708_v41  ;;  %v711_v50 = vpop.f32.mrf.mxu0  ;;  %1082 = vst [vmem:[%s1950_s3 + $0x28] sm:$0xff] %v1056_v6  ;;  %v674_v53 = vadd.f32 %v673_v52, %v630_v48 }
 0x132   :  { %v962_v8 = vadd.f32 %v1878_v17, %v752_v49  ;;  %v973_v19 = vadd.f32 %v1874_v11, %v674_v53 }
 0x133   :  { %v632_v56 = vpop.f32.mrf.mxu1 }
 0x134   :  { %v1014_v55 = vmax.f32 %v962_v8, 0.0  ;;  %v1025_v28 = vmax.f32 %v973_v19, 0.0  ;;  %v122_v19 = vld [vmem:[#allocation2 + $0x70] sm:$0x3] }
 0x136   :  { %v1058_v60 = vpack.c.bf16 %v1014_v55, %v1013_v54  ;;  %v121_v55 = vld [vmem:[#allocation2 + $0xe8] sm:$0x3] }
 0x137   :  { %v754_v57 = vpop.f32.mrf.mxu2  ;;  %v675_v63 = vpop.f32.mrf.mxu3 }
 0x138   :  { %v755_v61 = vadd.f32 %v754_v57, %v711_v50  ;;  %v713_v62 = vpop.f32.mrf.mxu0  ;;  %1084 = vst [vmem:[%s1950_s3 + $0x38] sm:$0xff] %v1058_v60  ;;  %v676_v0 = vadd.f32 %v675_v63, %v632_v56 }
 0x13a   :  { %v966_v2 = vadd.f32 %v1878_v17, %v755_v61  ;;  %v977_v36 = vadd.f32 %v1874_v11, %v676_v0 }
 0x13b   :  { %v635_v5 = vpop.f32.mrf.mxu1 }
 0x13c   :  { %v1018_v47 = vmax.f32 %v966_v2, 0.0  ;;  %v1029_v24 = vmax.f32 %v977_v36, 0.0 }
 0x13e   :  { %v1060_v7 = vpack.c.bf16 %v1018_v47, %v1017_v1 }
 0x13f   :  { %v756_v3 = vpop.f32.mrf.mxu2  ;;  %v678_v12 = vpop.f32.mrf.mxu3 }
 0x140   :  { %v757_v25 = vadd.f32 %v756_v3, %v713_v62  ;;  %v716_v9 = vpop.f32.mrf.mxu0  ;;  %1086 = vst [vmem:[%s1950_s3 + $0x48] sm:$0xff] %v1060_v7  ;;  %v679_v21 = vadd.f32 %v678_v12, %v635_v5 }
 0x142   :  { %v970_v13 = vadd.f32 %v1878_v17, %v757_v25  ;;  %v981_v18 = vadd.f32 %v1874_v11, %v679_v21 }
 0x143   :  { %v637_v27 = vpop.f32.mrf.mxu1 }
 0x144   :  { %v1022_v16 = vmax.f32 %v970_v13, 0.0  ;;  %v1033_v48 = vmax.f32 %v981_v18, 0.0 }
 0x146   :  { %v1062_v40 = vpack.c.bf16 %v1022_v16, %v1021_v14 }
 0x147   :  { %v759_v4 = vpop.f32.mrf.mxu2  ;;  %v680_v23 = vpop.f32.mrf.mxu3 }
 0x148   :  { %v760_v20 = vadd.f32 %v759_v4, %v716_v9  ;;  %v718_v22 = vpop.f32.mrf.mxu0  ;;  %1088 = vst [vmem:[%s1950_s3 + $0x58] sm:$0xff] %v1062_v40  ;;  %v681_v26 = vadd.f32 %v680_v23, %v637_v27 }
 0x14a   :  { %v974_v30 = vadd.f32 %v1878_v17, %v760_v20  ;;  %v985_v54 = vadd.f32 %v1874_v11, %v681_v26 }
 0x14b   :  { %v640_v59 = vpop.f32.mrf.mxu1 }
 0x14c   :  { %v1026_v31 = vmax.f32 %v974_v30, 0.0  ;;  %v1037_v61 = vmax.f32 %v985_v54, 0.0 }
 0x14e   :  { %v1064_v35 = vpack.c.bf16 %v1026_v31, %v1025_v28 }
 0x14f   :  { %v761_v32 = vpop.f32.mrf.mxu2  ;;  %v683_v44 = vpop.f32.mrf.mxu3 }
 0x150   :  { %v762_v33 = vadd.f32 %v761_v32, %v718_v22  ;;  %v721_v34 = vpop.f32.mrf.mxu0  ;;  %1090 = vst [vmem:[%s1950_s3 + $0x68] sm:$0xff] %v1064_v35  ;;  %v684_v15 = vadd.f32 %v683_v44, %v640_v59 }
 0x152   :  { %v978_v37 = vadd.f32 %v1878_v17, %v762_v33  ;;  %v989_v1 = vadd.f32 %v1874_v11, %v684_v15 }
 0x153   :  { %v642_v41 = vpop.f32.mrf.mxu1 }
 0x154   :  { %v1030_v38 = vmax.f32 %v978_v37, 0.0  ;;  %v1041_v7 = vmax.f32 %v989_v1, 0.0 }
 0x156   :  { %v1066_v42 = vpack.c.bf16 %v1030_v38, %v1029_v24 }
 0x157   :  { %v764_v39 = vpop.f32.mrf.mxu2  ;;  %v685_v29 = vpop.f32.mrf.mxu3 }
 0x158   :  { %v765_v43 = vadd.f32 %v764_v39, %v721_v34  ;;  %v723_v45 = vpop.f32.mrf.mxu0  ;;  %1092 = vst [vmem:[%s1950_s3 + $0x78] sm:$0xff] %v1066_v42  ;;  %v686_v46 = vadd.f32 %v685_v29, %v642_v41 }
 0x15a   :  { %v982_v6 = vadd.f32 %v1878_v17, %v765_v43  ;;  %v993_v14 = vadd.f32 %v1874_v11, %v686_v46 }
 0x15b   :  { %v645_v51 = vpop.f32.mrf.mxu1 }
 0x15c   :  { %v1034_v49 = vmax.f32 %v982_v6, 0.0  ;;  %v1045_v4 = vmax.f32 %v993_v14, 0.0 }
 0x15e   :  { %v1068_v52 = vpack.c.bf16 %v1034_v49, %v1033_v48 }
 0x15f   :  { %v766_v50 = vpop.f32.mrf.mxu2  ;;  %v688_v57 = vpop.f32.mrf.mxu3 }
 0x160   :  { %v767_v53 = vadd.f32 %v766_v50, %v723_v45  ;;  %v726_v8 = vpop.f32.mrf.mxu0  ;;  %1094 = vst [vmem:[%s1950_s3 + $0x88] sm:$0xff] %v1068_v52  ;;  %v689_v56 = vadd.f32 %v688_v57, %v645_v51 }
 0x162   :  { %v986_v58 = vadd.f32 %v1878_v17, %v767_v53  ;;  %v828_v60 = vadd.f32 %v689_v56, %v121_v55 }
 0x163   :  { %v647_v0 = vpop.f32.mrf.mxu1 }
 0x164   :  { %v1038_v62 = vmax.f32 %v986_v58, 0.0  ;;  %880 = vst [vmem:[#allocation2 + $0xe8] sm:$0x3] %v828_v60 }
 0x166   :  { %v1070_v2 = vpack.c.bf16 %v1038_v62, %v1037_v61 }
 0x167   :  { %v769_v63 = vpop.f32.mrf.mxu2  ;;  %v690_v5 = vpop.f32.mrf.mxu3 }
 0x168   :  { %v770_v47 = vadd.f32 %v769_v63, %v726_v8  ;;  %v728_v3 = vpop.f32.mrf.mxu0  ;;  %1096 = vst [vmem:[%s1950_s3 + $0x98] sm:$0xff] %v1070_v2 }
 0x16a   :  { %v990_v25 = vadd.f32 %v1878_v17, %v770_v47 }
 0x16b   :  { %v935_v28 = vld [vmem:[#allocation2 + $0xe8] sm:$0x3] }
 0x16c   :  { %v1042_v9 = vmax.f32 %v990_v25, 0.0  ;;  %v997_v31 = vadd.f32 %v1874_v11, %v935_v28 }
 0x16e   :  { %v1072_v12 = vpack.c.bf16 %v1042_v9, %v1041_v7  ;;  %v1049_v59 = vmax.f32 %v997_v31, 0.0 }
 0x16f   :  { %v771_v10 = vpop.f32.mrf.mxu2 }
 0x170   :  { %v772_v21 = vadd.f32 %v771_v10, %v728_v3  ;;  %v731_v13 = vpop.f32.mrf.mxu0  ;;  %1098 = vst [vmem:[%s1950_s3 + $0xa8] sm:$0xff] %v1072_v12 }
 0x172   :  { %v994_v16 = vadd.f32 %v1878_v17, %v772_v21 }
 0x174   :  { %v1046_v27 = vmax.f32 %v994_v16, 0.0 }
 0x176   :  { %v1074_v20 = vpack.c.bf16 %v1046_v27, %v1045_v4 }
 0x177   :  { %v774_v40 = vpop.f32.mrf.mxu2 }
 0x178   :  { %v775_v22 = vadd.f32 %v774_v40, %v731_v13  ;;  %v733_v23 = vpop.f32.mrf.mxu0  ;;  %1100 = vst [vmem:[%s1950_s3 + $0xb8] sm:$0xff] %v1074_v20 }
 0x17a   :  { %v829_v26 = vadd.f32 %v775_v22, %v122_v19 }
 0x17c   :  { %881 = vst [vmem:[#allocation2 + $0x70] sm:$0x3] %v829_v26 }
 0x17f   :  { %v776_v30 = vpop.f32.mrf.mxu2 }
 0x183   :  { %v936_v32 = vld [vmem:[#allocation2 + $0x70] sm:$0x3] }
 0x184   :  { %v998_v35 = vadd.f32 %v1878_v17, %v936_v32 }
 0x186   :  { %v1050_v33 = vmax.f32 %v998_v35, 0.0 }
 0x188   :  { %v1076_v34 = vpack.c.bf16 %v1050_v33, %v1049_v59 }
 0x18a   :  { %1102 = vst [vmem:[%s1950_s3 + $0xc8] sm:$0x11] %v1076_v34 }

// kernel: encoder_cnn_prune_forward.3
= control target key start
LH: loop header
LB: loop body
LE: loop exit
PB: predicated region body
PF: predicated region fallthrough
CT: control target
= control target key end

     0   :  { %8 = vsyncpa [#allocation5], 0  ;;  %s4544_s12 = smov 0   ;;  %s4546_s13 = smov 0   ;;  %s5509_s0 = inlined_call_operand.vmem [shape: bf16[2,25088], index: 0, kind: input, shape index: {}]   ;;  %s5510_s1 = inlined_call_operand.vmem [shape: bf16[32,25088], index: 1, kind: input, shape index: {}]   ;;  %s5511_s2 = inlined_call_operand.vmem [shape: f32[1,32], index: 2, kind: input, shape index: {}]   ;;  %s5512_s3 = inlined_call_operand.hbm [shape: f32[2,32], index: 3, kind: output, shape index: {}]  }
   0x1   :  { %s4548_s14 = smov 0   ;;  %s4550_s15 = smov 0  }
   0x2   :  { %s4552_s16 = smov 0  }
   0x3 LB: > { %s3407_s17 = sadd.s32 4294967295, %s4520_s16   ;;  %s23_s18 = sadd.s32 1, %s4516_s15  ;;  %s4520_s16 = sphi %s4552_s16, %s14_s16   ;;  %s4516_s15 = sphi %s4550_s15, %s5516_s15   ;;  %s4512_s14 = sphi %s4548_s14, %s5515_s14   ;;  %s4508_s13 = sphi %s4546_s13, %s5514_s13   ;;  %s4504_s12 = sphi %s4544_s12, %s5513_s12  }
   0x4   : > { %p24_p0 = scmp.ge.s32.totalorder %s23_s18, 2  ;;  %p68_p1 = scmp.ne.s32.totalorder %s4508_s13, %s4504_s12 }
   0x5   : > { %p69_p2 = scmp.eq.s32.totalorder %s4520_s16, 0  ;;  %s61_s20 = sadd.s32 1, %s4508_s13 }
   0x6   : > { %s5518_s18 = smov (%p24_p0, %s23_s18), 0  ;;  %p3409_p5 = scmp.ge.s32.totalorder %s4520_s16, 2 }
   0x7   : > { %p70_p3 = por %p69_p2, %p68_p1  ;;  %s58_s19 = ssub.s32 %s4516_s15, %s5518_s18 }
   0x8   : > { %p59_p4 = scmp.eq.s32.totalorder %s58_s19, 0  ;;  %144 = sbr.rel (%p3409_p5) target bundleno = 214 (0xd6), region = 20 }
   0xa   : > { %s4580_s21 = scalar_select %p59_p4, %s4508_s13, %s61_s20  }
   0xd   : > { %159 = sbr.rel (!%p70_p3) target bundleno = 214 (0xd6), region = 28  ;;  %s161_s22 = sand.u32 (%p70_p3), 1, %s4508_s13  }
   0xe   : > { %s4202_s23 = smul.u32 (%p70_p3), 392, %s4516_s15 }
   0xf   : > { %s4399_s24 = smul.u32 (%p70_p3), 1568, %s161_s22 }
  0x10   : > { %s4588_s27 = scalar_lea.vmem (%p70_p3), %s5510_s1, %s4202_s23 }
  0x11   : > { %v179_v0 = vld [vmem:[%s4588_s27] sm:$0xff] (%p70_p3)  ;;  %v181_v1 = vld [vmem:[%s4588_s27 + $0x8] sm:$0xff] (%p70_p3)  ;;  %v183_v2 = vld [vmem:[%s4588_s27 + $0x10] sm:$0xff] (%p70_p3)  ;;  %s4593_s28 = scalar_lea.vmem (%p70_p3), [#allocation3], %s4399_s24 }
  0x12   : > { %180 = vst [vmem:[%s4593_s28] sm:$0xff] %v179_v0  ;;  %v185_v3 = vld [vmem:[%s4588_s27 + $0x18] sm:$0xff]  ;;  %v187_v4 = vld [vmem:[%s4588_s27 + $0x20] sm:$0xff]  ;;  %v189_v5 = vld [vmem:[%s4588_s27 + $0x28] sm:$0xff] }
  0x13   : > { %182 = vst [vmem:[%s4593_s28 + $0x8] sm:$0xff] %v181_v1  ;;  %v191_v6 = vld [vmem:[%s4588_s27 + $0x30] sm:$0xff]  ;;  %v193_v7 = vld [vmem:[%s4588_s27 + $0x38] sm:$0xff]  ;;  %v195_v8 = vld [vmem:[%s4588_s27 + $0x40] sm:$0xff] }
  0x14   : > { %184 = vst [vmem:[%s4593_s28 + $0x10] sm:$0xff] %v183_v2  ;;  %v197_v9 = vld [vmem:[%s4588_s27 + $0x48] sm:$0xff]  ;;  %v199_v10 = vld [vmem:[%s4588_s27 + $0x50] sm:$0xff]  ;;  %v201_v11 = vld [vmem:[%s4588_s27 + $0x58] sm:$0xff] }
  0x15   : > { %186 = vst [vmem:[%s4593_s28 + $0x18] sm:$0xff] %v185_v3  ;;  %v203_v12 = vld [vmem:[%s4588_s27 + $0x60] sm:$0xff]  ;;  %v205_v13 = vld [vmem:[%s4588_s27 + $0x68] sm:$0xff]  ;;  %v207_v14 = vld [vmem:[%s4588_s27 + $0x70] sm:$0xff] }
  0x16   : > { %188 = vst [vmem:[%s4593_s28 + $0x20] sm:$0xff] %v187_v4  ;;  %v209_v15 = vld [vmem:[%s4588_s27 + $0x78] sm:$0xff]  ;;  %v211_v16 = vld [vmem:[%s4588_s27 + $0x80] sm:$0xff]  ;;  %v213_v17 = vld [vmem:[%s4588_s27 + $0x88] sm:$0xff] }
  0x17   : > { %190 = vst [vmem:[%s4593_s28 + $0x28] sm:$0xff] %v189_v5  ;;  %v215_v18 = vld [vmem:[%s4588_s27 + $0x90] sm:$0xff]  ;;  %v217_v19 = vld [vmem:[%s4588_s27 + $0x98] sm:$0xff]  ;;  %v219_v20 = vld [vmem:[%s4588_s27 + $0xa0] sm:$0xff] }
  0x18   : > { %192 = vst [vmem:[%s4593_s28 + $0x30] sm:$0xff] %v191_v6  ;;  %v221_v21 = vld [vmem:[%s4588_s27 + $0xa8] sm:$0xff]  ;;  %v223_v22 = vld [vmem:[%s4588_s27 + $0xb0] sm:$0xff]  ;;  %v225_v23 = vld [vmem:[%s4588_s27 + $0xb8] sm:$0xff] }
  0x19   : > { %194 = vst [vmem:[%s4593_s28 + $0x38] sm:$0xff] %v193_v7  ;;  %v227_v24 = vld [vmem:[%s4588_s27 + $0xc0] sm:$0xff]  ;;  %v229_v25 = vld [vmem:[%s4588_s27 + $0xc8] sm:$0xff]  ;;  %v231_v26 = vld [vmem:[%s4588_s27 + $0xd0] sm:$0xff] }
  0x1a   : > { %196 = vst [vmem:[%s4593_s28 + $0x40] sm:$0xff] %v195_v8  ;;  %v233_v27 = vld [vmem:[%s4588_s27 + $0xd8] sm:$0xff]  ;;  %v235_v28 = vld [vmem:[%s4588_s27 + $0xe0] sm:$0xff]  ;;  %v237_v29 = vld [vmem:[%s4588_s27 + $0xe8] sm:$0xff] }
  0x1b   : > { %198 = vst [vmem:[%s4593_s28 + $0x48] sm:$0xff] %v197_v9  ;;  %v239_v30 = vld [vmem:[%s4588_s27 + $0xf0] sm:$0xff]  ;;  %v241_v31 = vld [vmem:[%s4588_s27 + $0xf8] sm:$0xff]  ;;  %v243_v32 = vld [vmem:[%s4588_s27 + $0x100] sm:$0xff] }
  0x1c   : > { %200 = vst [vmem:[%s4593_s28 + $0x50] sm:$0xff] %v199_v10  ;;  %v245_v33 = vld [vmem:[%s4588_s27 + $0x108] sm:$0xff]  ;;  %v247_v34 = vld [vmem:[%s4588_s27 + $0x110] sm:$0xff]  ;;  %v249_v35 = vld [vmem:[%s4588_s27 + $0x118] sm:$0xff] }
  0x1d   : > { %202 = vst [vmem:[%s4593_s28 + $0x58] sm:$0xff] %v201_v11  ;;  %v251_v36 = vld [vmem:[%s4588_s27 + $0x120] sm:$0xff]  ;;  %v253_v37 = vld [vmem:[%s4588_s27 + $0x128] sm:$0xff]  ;;  %v255_v38 = vld [vmem:[%s4588_s27 + $0x130] sm:$0xff] }
  0x1e   : > { %204 = vst [vmem:[%s4593_s28 + $0x60] sm:$0xff] %v203_v12  ;;  %v257_v39 = vld [vmem:[%s4588_s27 + $0x138] sm:$0xff]  ;;  %v259_v40 = vld [vmem:[%s4588_s27 + $0x140] sm:$0xff]  ;;  %v261_v41 = vld [vmem:[%s4588_s27 + $0x148] sm:$0xff] }
  0x1f   : > { %206 = vst [vmem:[%s4593_s28 + $0x68] sm:$0xff] %v205_v13  ;;  %v263_v42 = vld [vmem:[%s4588_s27 + $0x150] sm:$0xff]  ;;  %v265_v43 = vld [vmem:[%s4588_s27 + $0x158] sm:$0xff]  ;;  %v267_v44 = vld [vmem:[%s4588_s27 + $0x160] sm:$0xff] }
  0x20   : > { %208 = vst [vmem:[%s4593_s28 + $0x70] sm:$0xff] %v207_v14  ;;  %v269_v45 = vld [vmem:[%s4588_s27 + $0x168] sm:$0xff]  ;;  %v271_v46 = vld [vmem:[%s4588_s27 + $0x170] sm:$0xff]  ;;  %v273_v47 = vld [vmem:[%s4588_s27 + $0x178] sm:$0xff] }
  0x21   : > { %210 = vst [vmem:[%s4593_s28 + $0x78] sm:$0xff] %v209_v15  ;;  %v275_v48 = vld [vmem:[%s4588_s27 + $0x180] sm:$0xff]  ;;  %v277_v49 = vld [vmem:[%s4588_s27 + $0x310] sm:$0xff]  ;;  %v279_v50 = vld [vmem:[%s4588_s27 + $0x318] sm:$0xff] }
  0x22   : > { %212 = vst [vmem:[%s4593_s28 + $0x80] sm:$0xff] %v211_v16  ;;  %v281_v51 = vld [vmem:[%s4588_s27 + $0x320] sm:$0xff]  ;;  %v283_v52 = vld [vmem:[%s4588_s27 + $0x328] sm:$0xff]  ;;  %v285_v53 = vld [vmem:[%s4588_s27 + $0x330] sm:$0xff] }
  0x23   : > { %214 = vst [vmem:[%s4593_s28 + $0x88] sm:$0xff] %v213_v17  ;;  %v287_v54 = vld [vmem:[%s4588_s27 + $0x338] sm:$0xff]  ;;  %v289_v55 = vld [vmem:[%s4588_s27 + $0x340] sm:$0xff]  ;;  %v291_v56 = vld [vmem:[%s4588_s27 + $0x348] sm:$0xff] }
  0x24   : > { %216 = vst [vmem:[%s4593_s28 + $0x90] sm:$0xff] %v215_v18  ;;  %v293_v57 = vld [vmem:[%s4588_s27 + $0x350] sm:$0xff]  ;;  %v295_v58 = vld [vmem:[%s4588_s27 + $0x358] sm:$0xff]  ;;  %v297_v59 = vld [vmem:[%s4588_s27 + $0x360] sm:$0xff] }
  0x25   : > { %218 = vst [vmem:[%s4593_s28 + $0x98] sm:$0xff] %v217_v19  ;;  %v299_v60 = vld [vmem:[%s4588_s27 + $0x368] sm:$0xff]  ;;  %v301_v61 = vld [vmem:[%s4588_s27 + $0x370] sm:$0xff]  ;;  %v303_v62 = vld [vmem:[%s4588_s27 + $0x378] sm:$0xff] }
  0x26   : > { %220 = vst [vmem:[%s4593_s28 + $0xa0] sm:$0xff] %v219_v20  ;;  %v305_v63 = vld [vmem:[%s4588_s27 + $0x380] sm:$0xff]  ;;  %v307_v0 = vld [vmem:[%s4588_s27 + $0x388] sm:$0xff]  ;;  %v309_v1 = vld [vmem:[%s4588_s27 + $0x390] sm:$0xff] }
  0x27   : > { %222 = vst [vmem:[%s4593_s28 + $0xa8] sm:$0xff] %v221_v21  ;;  %v311_v2 = vld [vmem:[%s4588_s27 + $0x398] sm:$0xff]  ;;  %v313_v3 = vld [vmem:[%s4588_s27 + $0x3a0] sm:$0xff]  ;;  %v315_v4 = vld [vmem:[%s4588_s27 + $0x3a8] sm:$0xff] }
  0x28   : > { %224 = vst [vmem:[%s4593_s28 + $0xb0] sm:$0xff] %v223_v22  ;;  %v317_v5 = vld [vmem:[%s4588_s27 + $0x3b0] sm:$0xff]  ;;  %v319_v6 = vld [vmem:[%s4588_s27 + $0x3b8] sm:$0xff]  ;;  %v321_v7 = vld [vmem:[%s4588_s27 + $0x3c0] sm:$0xff] }
  0x29   : > { %226 = vst [vmem:[%s4593_s28 + $0xb8] sm:$0xff] %v225_v23  ;;  %v323_v8 = vld [vmem:[%s4588_s27 + $0x3c8] sm:$0xff]  ;;  %v325_v9 = vld [vmem:[%s4588_s27 + $0x3d0] sm:$0xff]  ;;  %v327_v10 = vld [vmem:[%s4588_s27 + $0x3d8] sm:$0xff] }
  0x2a   : > { %228 = vst [vmem:[%s4593_s28 + $0xc0] sm:$0xff] %v227_v24  ;;  %v329_v11 = vld [vmem:[%s4588_s27 + $0x3e0] sm:$0xff]  ;;  %v331_v12 = vld [vmem:[%s4588_s27 + $0x3e8] sm:$0xff]  ;;  %v333_v13 = vld [vmem:[%s4588_s27 + $0x3f0] sm:$0xff] }
  0x2b   : > { %230 = vst [vmem:[%s4593_s28 + $0xc8] sm:$0xff] %v229_v25  ;;  %v335_v14 = vld [vmem:[%s4588_s27 + $0x3f8] sm:$0xff]  ;;  %v337_v15 = vld [vmem:[%s4588_s27 + $0x400] sm:$0xff]  ;;  %v339_v16 = vld [vmem:[%s4588_s27 + $0x408] sm:$0xff] }
  0x2c   : > { %232 = vst [vmem:[%s4593_s28 + $0xd0] sm:$0xff] %v231_v26  ;;  %v341_v17 = vld [vmem:[%s4588_s27 + $0x410] sm:$0xff]  ;;  %v343_v18 = vld [vmem:[%s4588_s27 + $0x418] sm:$0xff]  ;;  %v345_v19 = vld [vmem:[%s4588_s27 + $0x420] sm:$0xff] }
  0x2d   : > { %234 = vst [vmem:[%s4593_s28 + $0xd8] sm:$0xff] %v233_v27  ;;  %v347_v20 = vld [vmem:[%s4588_s27 + $0x428] sm:$0xff]  ;;  %v349_v21 = vld [vmem:[%s4588_s27 + $0x430] sm:$0xff]  ;;  %v351_v22 = vld [vmem:[%s4588_s27 + $0x438] sm:$0xff] }
  0x2e   : > { %236 = vst [vmem:[%s4593_s28 + $0xe0] sm:$0xff] %v235_v28  ;;  %v353_v23 = vld [vmem:[%s4588_s27 + $0x440] sm:$0xff]  ;;  %v355_v24 = vld [vmem:[%s4588_s27 + $0x448] sm:$0xff]  ;;  %v357_v25 = vld [vmem:[%s4588_s27 + $0x450] sm:$0xff] }
  0x2f   : > { %238 = vst [vmem:[%s4593_s28 + $0xe8] sm:$0xff] %v237_v29  ;;  %v359_v26 = vld [vmem:[%s4588_s27 + $0x458] sm:$0xff]  ;;  %v361_v27 = vld [vmem:[%s4588_s27 + $0x460] sm:$0xff]  ;;  %v363_v28 = vld [vmem:[%s4588_s27 + $0x468] sm:$0xff] }
  0x30   : > { %240 = vst [vmem:[%s4593_s28 + $0xf0] sm:$0xff] %v239_v30  ;;  %v365_v29 = vld [vmem:[%s4588_s27 + $0x470] sm:$0xff]  ;;  %v367_v30 = vld [vmem:[%s4588_s27 + $0x478] sm:$0xff] }
  0x31   : > { %242 = vst [vmem:[%s4593_s28 + $0xf8] sm:$0xff] %v241_v31  ;;  %v369_v31 = vld [vmem:[%s4588_s27 + $0x480] sm:$0xff] }
  0x32   : > { %244 = vst [vmem:[%s4593_s28 + $0x100] sm:$0xff] %v243_v32  ;;  %v371_v32 = vld [vmem:[%s4588_s27 + $0x488] sm:$0xff] }
  0x33   : > { %246 = vst [vmem:[%s4593_s28 + $0x108] sm:$0xff] %v245_v33  ;;  %v373_v33 = vld [vmem:[%s4588_s27 + $0x490] sm:$0xff] }
  0x34   : > { %248 = vst [vmem:[%s4593_s28 + $0x110] sm:$0xff] %v247_v34  ;;  %v375_v34 = vld [vmem:[%s4588_s27 + $0x620] sm:$0xff] }
  0x35   : > { %250 = vst [vmem:[%s4593_s28 + $0x118] sm:$0xff] %v249_v35  ;;  %v377_v35 = vld [vmem:[%s4588_s27 + $0x628] sm:$0xff] }
  0x36   : > { %252 = vst [vmem:[%s4593_s28 + $0x120] sm:$0xff] %v251_v36  ;;  %v379_v36 = vld [vmem:[%s4588_s27 + $0x630] sm:$0xff] }
  0x37   : > { %254 = vst [vmem:[%s4593_s28 + $0x128] sm:$0xff] %v253_v37  ;;  %v381_v37 = vld [vmem:[%s4588_s27 + $0x638] sm:$0xff] }
  0x38   : > { %256 = vst [vmem:[%s4593_s28 + $0x130] sm:$0xff] %v255_v38  ;;  %v383_v38 = vld [vmem:[%s4588_s27 + $0x640] sm:$0xff] }
  0x39   : > { %258 = vst [vmem:[%s4593_s28 + $0x138] sm:$0xff] %v257_v39  ;;  %v385_v39 = vld [vmem:[%s4588_s27 + $0x648] sm:$0xff] }
  0x3a   : > { %260 = vst [vmem:[%s4593_s28 + $0x140] sm:$0xff] %v259_v40  ;;  %v387_v40 = vld [vmem:[%s4588_s27 + $0x650] sm:$0xff] }
  0x3b   : > { %262 = vst [vmem:[%s4593_s28 + $0x148] sm:$0xff] %v261_v41  ;;  %v389_v41 = vld [vmem:[%s4588_s27 + $0x658] sm:$0xff] }
  0x3c   : > { %264 = vst [vmem:[%s4593_s28 + $0x150] sm:$0xff] %v263_v42  ;;  %v391_v42 = vld [vmem:[%s4588_s27 + $0x660] sm:$0xff] }
  0x3d   : > { %266 = vst [vmem:[%s4593_s28 + $0x158] sm:$0xff] %v265_v43  ;;  %v393_v43 = vld [vmem:[%s4588_s27 + $0x668] sm:$0xff] }
  0x3e   : > { %268 = vst [vmem:[%s4593_s28 + $0x160] sm:$0xff] %v267_v44  ;;  %v395_v44 = vld [vmem:[%s4588_s27 + $0x670] sm:$0xff] }
  0x3f   : > { %270 = vst [vmem:[%s4593_s28 + $0x168] sm:$0xff] %v269_v45  ;;  %v397_v45 = vld [vmem:[%s4588_s27 + $0x678] sm:$0xff] }
  0x40   : > { %272 = vst [vmem:[%s4593_s28 + $0x170] sm:$0xff] %v271_v46  ;;  %v399_v46 = vld [vmem:[%s4588_s27 + $0x680] sm:$0xff] }
  0x41   : > { %274 = vst [vmem:[%s4593_s28 + $0x178] sm:$0xff] %v273_v47  ;;  %v401_v47 = vld [vmem:[%s4588_s27 + $0x688] sm:$0xff] }
  0x42   : > { %276 = vst [vmem:[%s4593_s28 + $0x180] sm:$0xff] %v275_v48  ;;  %v403_v48 = vld [vmem:[%s4588_s27 + $0x690] sm:$0xff] }
  0x43   : > { %278 = vst [vmem:[%s4593_s28 + $0x188] sm:$0xff] %v277_v49  ;;  %v405_v49 = vld [vmem:[%s4588_s27 + $0x698] sm:$0xff] }
  0x44   : > { %280 = vst [vmem:[%s4593_s28 + $0x190] sm:$0xff] %v279_v50  ;;  %v407_v50 = vld [vmem:[%s4588_s27 + $0x6a0] sm:$0xff] }
  0x45   : > { %282 = vst [vmem:[%s4593_s28 + $0x198] sm:$0xff] %v281_v51  ;;  %v409_v51 = vld [vmem:[%s4588_s27 + $0x6a8] sm:$0xff] }
  0x46   : > { %284 = vst [vmem:[%s4593_s28 + $0x1a0] sm:$0xff] %v283_v52  ;;  %v411_v52 = vld [vmem:[%s4588_s27 + $0x6b0] sm:$0xff] }
  0x47   : > { %286 = vst [vmem:[%s4593_s28 + $0x1a8] sm:$0xff] %v285_v53  ;;  %v413_v53 = vld [vmem:[%s4588_s27 + $0x6b8] sm:$0xff] }
  0x48   : > { %288 = vst [vmem:[%s4593_s28 + $0x1b0] sm:$0xff] %v287_v54  ;;  %v415_v54 = vld [vmem:[%s4588_s27 + $0x6c0] sm:$0xff] }
  0x49   : > { %290 = vst [vmem:[%s4593_s28 + $0x1b8] sm:$0xff] %v289_v55  ;;  %v417_v55 = vld [vmem:[%s4588_s27 + $0x6c8] sm:$0xff] }
  0x4a   : > { %292 = vst [vmem:[%s4593_s28 + $0x1c0] sm:$0xff] %v291_v56  ;;  %v419_v56 = vld [vmem:[%s4588_s27 + $0x6d0] sm:$0xff] }
  0x4b   : > { %294 = vst [vmem:[%s4593_s28 + $0x1c8] sm:$0xff] %v293_v57  ;;  %v421_v57 = vld [vmem:[%s4588_s27 + $0x6d8] sm:$0xff] }
  0x4c   : > { %296 = vst [vmem:[%s4593_s28 + $0x1d0] sm:$0xff] %v295_v58  ;;  %v423_v58 = vld [vmem:[%s4588_s27 + $0x6e0] sm:$0xff] }
  0x4d   : > { %298 = vst [vmem:[%s4593_s28 + $0x1d8] sm:$0xff] %v297_v59  ;;  %v425_v59 = vld [vmem:[%s4588_s27 + $0x6e8] sm:$0xff] }
  0x4e   : > { %300 = vst [vmem:[%s4593_s28 + $0x1e0] sm:$0xff] %v299_v60  ;;  %v427_v60 = vld [vmem:[%s4588_s27 + $0x6f0] sm:$0xff] }
  0x4f   : > { %302 = vst [vmem:[%s4593_s28 + $0x1e8] sm:$0xff] %v301_v61  ;;  %v429_v61 = vld [vmem:[%s4588_s27 + $0x6f8] sm:$0xff] }
  0x50   : > { %304 = vst [vmem:[%s4593_s28 + $0x1f0] sm:$0xff] %v303_v62  ;;  %v431_v62 = vld [vmem:[%s4588_s27 + $0x700] sm:$0xff] }
  0x51   : > { %306 = vst [vmem:[%s4593_s28 + $0x1f8] sm:$0xff] %v305_v63  ;;  %v433_v63 = vld [vmem:[%s4588_s27 + $0x708] sm:$0xff] }
  0x52   : > { %308 = vst [vmem:[%s4593_s28 + $0x200] sm:$0xff] %v307_v0  ;;  %v435_v0 = vld [vmem:[%s4588_s27 + $0x710] sm:$0xff] }
  0x53   : > { %310 = vst [vmem:[%s4593_s28 + $0x208] sm:$0xff] %v309_v1  ;;  %v437_v1 = vld [vmem:[%s4588_s27 + $0x718] sm:$0xff] }
  0x54   : > { %312 = vst [vmem:[%s4593_s28 + $0x210] sm:$0xff] %v311_v2  ;;  %v439_v2 = vld [vmem:[%s4588_s27 + $0x720] sm:$0xff] }
  0x55   : > { %314 = vst [vmem:[%s4593_s28 + $0x218] sm:$0xff] %v313_v3  ;;  %v441_v3 = vld [vmem:[%s4588_s27 + $0x728] sm:$0xff] }
  0x56   : > { %316 = vst [vmem:[%s4593_s28 + $0x220] sm:$0xff] %v315_v4  ;;  %v443_v4 = vld [vmem:[%s4588_s27 + $0x730] sm:$0xff] }
  0x57   : > { %318 = vst [vmem:[%s4593_s28 + $0x228] sm:$0xff] %v317_v5  ;;  %v445_v5 = vld [vmem:[%s4588_s27 + $0x738] sm:$0xff] }
  0x58   : > { %320 = vst [vmem:[%s4593_s28 + $0x230] sm:$0xff] %v319_v6  ;;  %v447_v6 = vld [vmem:[%s4588_s27 + $0x740] sm:$0xff] }
  0x59   : > { %322 = vst [vmem:[%s4593_s28 + $0x238] sm:$0xff] %v321_v7  ;;  %v449_v7 = vld [vmem:[%s4588_s27 + $0x748] sm:$0xff] }
  0x5a   : > { %324 = vst [vmem:[%s4593_s28 + $0x240] sm:$0xff] %v323_v8  ;;  %v451_v8 = vld [vmem:[%s4588_s27 + $0x750] sm:$0xff] }
  0x5b   : > { %326 = vst [vmem:[%s4593_s28 + $0x248] sm:$0xff] %v325_v9  ;;  %v453_v9 = vld [vmem:[%s4588_s27 + $0x758] sm:$0xff] }
  0x5c   : > { %328 = vst [vmem:[%s4593_s28 + $0x250] sm:$0xff] %v327_v10  ;;  %v455_v10 = vld [vmem:[%s4588_s27 + $0x760] sm:$0xff] }
  0x5d   : > { %330 = vst [vmem:[%s4593_s28 + $0x258] sm:$0xff] %v329_v11  ;;  %v457_v11 = vld [vmem:[%s4588_s27 + $0x768] sm:$0xff] }
  0x5e   : > { %332 = vst [vmem:[%s4593_s28 + $0x260] sm:$0xff] %v331_v12  ;;  %v459_v12 = vld [vmem:[%s4588_s27 + $0x770] sm:$0xff] }
  0x5f   : > { %334 = vst [vmem:[%s4593_s28 + $0x268] sm:$0xff] %v333_v13  ;;  %v461_v13 = vld [vmem:[%s4588_s27 + $0x778] sm:$0xff] }
  0x60   : > { %336 = vst [vmem:[%s4593_s28 + $0x270] sm:$0xff] %v335_v14  ;;  %v463_v14 = vld [vmem:[%s4588_s27 + $0x780] sm:$0xff] }
  0x61   : > { %338 = vst [vmem:[%s4593_s28 + $0x278] sm:$0xff] %v337_v15  ;;  %v465_v15 = vld [vmem:[%s4588_s27 + $0x788] sm:$0xff] }
  0x62   : > { %340 = vst [vmem:[%s4593_s28 + $0x280] sm:$0xff] %v339_v16  ;;  %v467_v16 = vld [vmem:[%s4588_s27 + $0x790] sm:$0xff] }
  0x63   : > { %342 = vst [vmem:[%s4593_s28 + $0x288] sm:$0xff] %v341_v17  ;;  %v469_v17 = vld [vmem:[%s4588_s27 + $0x798] sm:$0xff] }
  0x64   : > { %344 = vst [vmem:[%s4593_s28 + $0x290] sm:$0xff] %v343_v18  ;;  %v471_v18 = vld [vmem:[%s4588_s27 + $0x7a0] sm:$0xff] }
  0x65   : > { %346 = vst [vmem:[%s4593_s28 + $0x298] sm:$0xff] %v345_v19  ;;  %v473_v19 = vld [vmem:[%s4588_s27 + $0x930] sm:$0xff] }
  0x66   : > { %348 = vst [vmem:[%s4593_s28 + $0x2a0] sm:$0xff] %v347_v20  ;;  %v475_v20 = vld [vmem:[%s4588_s27 + $0x938] sm:$0xff] }
  0x67   : > { %350 = vst [vmem:[%s4593_s28 + $0x2a8] sm:$0xff] %v349_v21  ;;  %v477_v21 = vld [vmem:[%s4588_s27 + $0x940] sm:$0xff] }
  0x68   : > { %352 = vst [vmem:[%s4593_s28 + $0x2b0] sm:$0xff] %v351_v22  ;;  %v479_v22 = vld [vmem:[%s4588_s27 + $0x948] sm:$0xff] }
  0x69   : > { %354 = vst [vmem:[%s4593_s28 + $0x2b8] sm:$0xff] %v353_v23  ;;  %v481_v23 = vld [vmem:[%s4588_s27 + $0x950] sm:$0xff] }
  0x6a   : > { %356 = vst [vmem:[%s4593_s28 + $0x2c0] sm:$0xff] %v355_v24  ;;  %v483_v24 = vld [vmem:[%s4588_s27 + $0x958] sm:$0xff] }
  0x6b   : > { %358 = vst [vmem:[%s4593_s28 + $0x2c8] sm:$0xff] %v357_v25  ;;  %v485_v25 = vld [vmem:[%s4588_s27 + $0x960] sm:$0xff] }
  0x6c   : > { %360 = vst [vmem:[%s4593_s28 + $0x2d0] sm:$0xff] %v359_v26  ;;  %v487_v26 = vld [vmem:[%s4588_s27 + $0x968] sm:$0xff] }
  0x6d   : > { %362 = vst [vmem:[%s4593_s28 + $0x2d8] sm:$0xff] %v361_v27  ;;  %v489_v27 = vld [vmem:[%s4588_s27 + $0x970] sm:$0xff] }
  0x6e   : > { %364 = vst [vmem:[%s4593_s28 + $0x2e0] sm:$0xff] %v363_v28  ;;  %v491_v28 = vld [vmem:[%s4588_s27 + $0x978] sm:$0xff] }
  0x6f   : > { %366 = vst [vmem:[%s4593_s28 + $0x2e8] sm:$0xff] %v365_v29  ;;  %v493_v29 = vld [vmem:[%s4588_s27 + $0x980] sm:$0xff] }
  0x70   : > { %368 = vst [vmem:[%s4593_s28 + $0x2f0] sm:$0xff] %v367_v30  ;;  %v495_v30 = vld [vmem:[%s4588_s27 + $0x988] sm:$0xff] }
  0x71   : > { %370 = vst [vmem:[%s4593_s28 + $0x2f8] sm:$0xff] %v369_v31  ;;  %v497_v31 = vld [vmem:[%s4588_s27 + $0x990] sm:$0xff] }
  0x72   : > { %372 = vst [vmem:[%s4593_s28 + $0x300] sm:$0xff] %v371_v32  ;;  %v499_v32 = vld [vmem:[%s4588_s27 + $0x998] sm:$0xff] }
  0x73   : > { %374 = vst [vmem:[%s4593_s28 + $0x308] sm:$0xff] %v373_v33  ;;  %v501_v33 = vld [vmem:[%s4588_s27 + $0x9a0] sm:$0xff] }
  0x74   : > { %376 = vst [vmem:[%s4593_s28 + $0x310] sm:$0xff] %v375_v34  ;;  %v503_v34 = vld [vmem:[%s4588_s27 + $0x9a8] sm:$0xff] }
  0x75   : > { %378 = vst [vmem:[%s4593_s28 + $0x318] sm:$0xff] %v377_v35  ;;  %v505_v35 = vld [vmem:[%s4588_s27 + $0x9b0] sm:$0xff] }
  0x76   : > { %380 = vst [vmem:[%s4593_s28 + $0x320] sm:$0xff] %v379_v36  ;;  %v507_v36 = vld [vmem:[%s4588_s27 + $0x9b8] sm:$0xff] }
  0x77   : > { %382 = vst [vmem:[%s4593_s28 + $0x328] sm:$0xff] %v381_v37  ;;  %v509_v37 = vld [vmem:[%s4588_s27 + $0x9c0] sm:$0xff] }
  0x78   : > { %384 = vst [vmem:[%s4593_s28 + $0x330] sm:$0xff] %v383_v38  ;;  %v511_v38 = vld [vmem:[%s4588_s27 + $0x9c8] sm:$0xff] }
  0x79   : > { %386 = vst [vmem:[%s4593_s28 + $0x338] sm:$0xff] %v385_v39  ;;  %v513_v39 = vld [vmem:[%s4588_s27 + $0x9d0] sm:$0xff] }
  0x7a   : > { %388 = vst [vmem:[%s4593_s28 + $0x340] sm:$0xff] %v387_v40  ;;  %v515_v40 = vld [vmem:[%s4588_s27 + $0x9d8] sm:$0xff] }
  0x7b   : > { %390 = vst [vmem:[%s4593_s28 + $0x348] sm:$0xff] %v389_v41  ;;  %v517_v41 = vld [vmem:[%s4588_s27 + $0x9e0] sm:$0xff] }
  0x7c   : > { %392 = vst [vmem:[%s4593_s28 + $0x350] sm:$0xff] %v391_v42  ;;  %v519_v42 = vld [vmem:[%s4588_s27 + $0x9e8] sm:$0xff] }
  0x7d   : > { %394 = vst [vmem:[%s4593_s28 + $0x358] sm:$0xff] %v393_v43  ;;  %v521_v43 = vld [vmem:[%s4588_s27 + $0x9f0] sm:$0xff] }
  0x7e   : > { %396 = vst [vmem:[%s4593_s28 + $0x360] sm:$0xff] %v395_v44  ;;  %v523_v44 = vld [vmem:[%s4588_s27 + $0x9f8] sm:$0xff] }
  0x7f   : > { %398 = vst [vmem:[%s4593_s28 + $0x368] sm:$0xff] %v397_v45  ;;  %v525_v45 = vld [vmem:[%s4588_s27 + $0xa00] sm:$0xff] }
  0x80   : > { %400 = vst [vmem:[%s4593_s28 + $0x370] sm:$0xff] %v399_v46  ;;  %v527_v46 = vld [vmem:[%s4588_s27 + $0xa08] sm:$0xff] }
  0x81   : > { %402 = vst [vmem:[%s4593_s28 + $0x378] sm:$0xff] %v401_v47  ;;  %v529_v47 = vld [vmem:[%s4588_s27 + $0xa10] sm:$0xff] }
  0x82   : > { %404 = vst [vmem:[%s4593_s28 + $0x380] sm:$0xff] %v403_v48  ;;  %v531_v48 = vld [vmem:[%s4588_s27 + $0xa18] sm:$0xff] }
  0x83   : > { %406 = vst [vmem:[%s4593_s28 + $0x388] sm:$0xff] %v405_v49  ;;  %v533_v49 = vld [vmem:[%s4588_s27 + $0xa20] sm:$0xff] }
  0x84   : > { %408 = vst [vmem:[%s4593_s28 + $0x390] sm:$0xff] %v407_v50  ;;  %v535_v50 = vld [vmem:[%s4588_s27 + $0xa28] sm:$0xff] }
  0x85   : > { %410 = vst [vmem:[%s4593_s28 + $0x398] sm:$0xff] %v409_v51  ;;  %v537_v51 = vld [vmem:[%s4588_s27 + $0xa30] sm:$0xff] }
  0x86   : > { %412 = vst [vmem:[%s4593_s28 + $0x3a0] sm:$0xff] %v411_v52  ;;  %v539_v52 = vld [vmem:[%s4588_s27 + $0xa38] sm:$0xff] }
  0x87   : > { %414 = vst [vmem:[%s4593_s28 + $0x3a8] sm:$0xff] %v413_v53  ;;  %v541_v53 = vld [vmem:[%s4588_s27 + $0xa40] sm:$0xff] }
  0x88   : > { %416 = vst [vmem:[%s4593_s28 + $0x3b0] sm:$0xff] %v415_v54  ;;  %v543_v54 = vld [vmem:[%s4588_s27 + $0xa48] sm:$0xff] }
  0x89   : > { %418 = vst [vmem:[%s4593_s28 + $0x3b8] sm:$0xff] %v417_v55  ;;  %v545_v55 = vld [vmem:[%s4588_s27 + $0xa50] sm:$0xff] }
  0x8a   : > { %420 = vst [vmem:[%s4593_s28 + $0x3c0] sm:$0xff] %v419_v56  ;;  %v547_v56 = vld [vmem:[%s4588_s27 + $0xa58] sm:$0xff] }
  0x8b   : > { %422 = vst [vmem:[%s4593_s28 + $0x3c8] sm:$0xff] %v421_v57  ;;  %v549_v57 = vld [vmem:[%s4588_s27 + $0xa60] sm:$0xff] }
  0x8c   : > { %424 = vst [vmem:[%s4593_s28 + $0x3d0] sm:$0xff] %v423_v58  ;;  %v551_v58 = vld [vmem:[%s4588_s27 + $0xa68] sm:$0xff] }
  0x8d   : > { %426 = vst [vmem:[%s4593_s28 + $0x3d8] sm:$0xff] %v425_v59  ;;  %v553_v59 = vld [vmem:[%s4588_s27 + $0xa70] sm:$0xff] }
  0x8e   : > { %428 = vst [vmem:[%s4593_s28 + $0x3e0] sm:$0xff] %v427_v60  ;;  %v555_v60 = vld [vmem:[%s4588_s27 + $0xa78] sm:$0xff] }
  0x8f   : > { %430 = vst [vmem:[%s4593_s28 + $0x3e8] sm:$0xff] %v429_v61  ;;  %v557_v61 = vld [vmem:[%s4588_s27 + $0xa80] sm:$0xff] }
  0x90   : > { %432 = vst [vmem:[%s4593_s28 + $0x3f0] sm:$0xff] %v431_v62  ;;  %v559_v62 = vld [vmem:[%s4588_s27 + $0xa88] sm:$0xff] }
  0x91   : > { %434 = vst [vmem:[%s4593_s28 + $0x3f8] sm:$0xff] %v433_v63  ;;  %v561_v63 = vld [vmem:[%s4588_s27 + $0xa90] sm:$0xff] }
  0x92   : > { %436 = vst [vmem:[%s4593_s28 + $0x400] sm:$0xff] %v435_v0  ;;  %v563_v0 = vld [vmem:[%s4588_s27 + $0xa98] sm:$0xff] }
  0x93   : > { %438 = vst [vmem:[%s4593_s28 + $0x408] sm:$0xff] %v437_v1  ;;  %v565_v1 = vld [vmem:[%s4588_s27 + $0xaa0] sm:$0xff] }
  0x94   : > { %440 = vst [vmem:[%s4593_s28 + $0x410] sm:$0xff] %v439_v2  ;;  %v567_v2 = vld [vmem:[%s4588_s27 + $0xaa8] sm:$0xff] }
  0x95   : > { %442 = vst [vmem:[%s4593_s28 + $0x418] sm:$0xff] %v441_v3  ;;  %v569_v3 = vld [vmem:[%s4588_s27 + $0xab0] sm:$0xff] }
  0x96   : > { %444 = vst [vmem:[%s4593_s28 + $0x420] sm:$0xff] %v443_v4 }
  0x97   : > { %446 = vst [vmem:[%s4593_s28 + $0x428] sm:$0xff] %v445_v5 }
  0x98   : > { %448 = vst [vmem:[%s4593_s28 + $0x430] sm:$0xff] %v447_v6 }
  0x99   : > { %450 = vst [vmem:[%s4593_s28 + $0x438] sm:$0xff] %v449_v7 }
  0x9a   : > { %452 = vst [vmem:[%s4593_s28 + $0x440] sm:$0xff] %v451_v8 }
  0x9b   : > { %454 = vst [vmem:[%s4593_s28 + $0x448] sm:$0xff] %v453_v9 }
  0x9c   : > { %456 = vst [vmem:[%s4593_s28 + $0x450] sm:$0xff] %v455_v10 }
  0x9d   : > { %458 = vst [vmem:[%s4593_s28 + $0x458] sm:$0xff] %v457_v11 }
  0x9e   : > { %460 = vst [vmem:[%s4593_s28 + $0x460] sm:$0xff] %v459_v12 }
  0x9f   : > { %462 = vst [vmem:[%s4593_s28 + $0x468] sm:$0xff] %v461_v13 }
  0xa0   : > { %464 = vst [vmem:[%s4593_s28 + $0x470] sm:$0xff] %v463_v14 }
  0xa1   : > { %466 = vst [vmem:[%s4593_s28 + $0x478] sm:$0xff] %v465_v15 }
  0xa2   : > { %468 = vst [vmem:[%s4593_s28 + $0x480] sm:$0xff] %v467_v16 }
  0xa3   : > { %470 = vst [vmem:[%s4593_s28 + $0x488] sm:$0xff] %v469_v17 }
  0xa4   : > { %472 = vst [vmem:[%s4593_s28 + $0x490] sm:$0xff] %v471_v18 }
  0xa5   : > { %474 = vst [vmem:[%s4593_s28 + $0x498] sm:$0xff] %v473_v19 }
  0xa6   : > { %476 = vst [vmem:[%s4593_s28 + $0x4a0] sm:$0xff] %v475_v20 }
  0xa7   : > { %478 = vst [vmem:[%s4593_s28 + $0x4a8] sm:$0xff] %v477_v21 }
  0xa8   : > { %480 = vst [vmem:[%s4593_s28 + $0x4b0] sm:$0xff] %v479_v22 }
  0xa9   : > { %482 = vst [vmem:[%s4593_s28 + $0x4b8] sm:$0xff] %v481_v23 }
  0xaa   : > { %484 = vst [vmem:[%s4593_s28 + $0x4c0] sm:$0xff] %v483_v24 }
  0xab   : > { %486 = vst [vmem:[%s4593_s28 + $0x4c8] sm:$0xff] %v485_v25 }
  0xac   : > { %488 = vst [vmem:[%s4593_s28 + $0x4d0] sm:$0xff] %v487_v26 }
  0xad   : > { %490 = vst [vmem:[%s4593_s28 + $0x4d8] sm:$0xff] %v489_v27 }
  0xae   : > { %492 = vst [vmem:[%s4593_s28 + $0x4e0] sm:$0xff] %v491_v28 }
  0xaf   : > { %494 = vst [vmem:[%s4593_s28 + $0x4e8] sm:$0xff] %v493_v29 }
  0xb0   : > { %496 = vst [vmem:[%s4593_s28 + $0x4f0] sm:$0xff] %v495_v30 }
  0xb1   : > { %498 = vst [vmem:[%s4593_s28 + $0x4f8] sm:$0xff] %v497_v31 }
  0xb2   : > { %500 = vst [vmem:[%s4593_s28 + $0x500] sm:$0xff] %v499_v32 }
  0xb3   : > { %502 = vst [vmem:[%s4593_s28 + $0x508] sm:$0xff] %v501_v33 }
  0xb4   : > { %504 = vst [vmem:[%s4593_s28 + $0x510] sm:$0xff] %v503_v34 }
  0xb5   : > { %506 = vst [vmem:[%s4593_s28 + $0x518] sm:$0xff] %v505_v35 }
  0xb6   : > { %508 = vst [vmem:[%s4593_s28 + $0x520] sm:$0xff] %v507_v36 }
  0xb7   : > { %510 = vst [vmem:[%s4593_s28 + $0x528] sm:$0xff] %v509_v37 }
  0xb8   : > { %512 = vst [vmem:[%s4593_s28 + $0x530] sm:$0xff] %v511_v38 }
  0xb9   : > { %514 = vst [vmem:[%s4593_s28 + $0x538] sm:$0xff] %v513_v39 }
  0xba   : > { %516 = vst [vmem:[%s4593_s28 + $0x540] sm:$0xff] %v515_v40 }
  0xbb   : > { %518 = vst [vmem:[%s4593_s28 + $0x548] sm:$0xff] %v517_v41 }
  0xbc   : > { %520 = vst [vmem:[%s4593_s28 + $0x550] sm:$0xff] %v519_v42 }
  0xbd   : > { %522 = vst [vmem:[%s4593_s28 + $0x558] sm:$0xff] %v521_v43 }
  0xbe   : > { %524 = vst [vmem:[%s4593_s28 + $0x560] sm:$0xff] %v523_v44 }
  0xbf   : > { %526 = vst [vmem:[%s4593_s28 + $0x568] sm:$0xff] %v525_v45 }
  0xc0   : > { %528 = vst [vmem:[%s4593_s28 + $0x570] sm:$0xff] %v527_v46 }
  0xc1   : > { %530 = vst [vmem:[%s4593_s28 + $0x578] sm:$0xff] %v529_v47 }
  0xc2   : > { %532 = vst [vmem:[%s4593_s28 + $0x580] sm:$0xff] %v531_v48 }
  0xc3   : > { %534 = vst [vmem:[%s4593_s28 + $0x588] sm:$0xff] %v533_v49 }
  0xc4   : > { %536 = vst [vmem:[%s4593_s28 + $0x590] sm:$0xff] %v535_v50 }
  0xc5   : > { %538 = vst [vmem:[%s4593_s28 + $0x598] sm:$0xff] %v537_v51 }
  0xc6   : > { %540 = vst [vmem:[%s4593_s28 + $0x5a0] sm:$0xff] %v539_v52 }
  0xc7   : > { %542 = vst [vmem:[%s4593_s28 + $0x5a8] sm:$0xff] %v541_v53 }
  0xc8   : > { %544 = vst [vmem:[%s4593_s28 + $0x5b0] sm:$0xff] %v543_v54 }
  0xc9   : > { %546 = vst [vmem:[%s4593_s28 + $0x5b8] sm:$0xff] %v545_v55 }
  0xca   : > { %548 = vst [vmem:[%s4593_s28 + $0x5c0] sm:$0xff] %v547_v56 }
  0xcb   : > { %550 = vst [vmem:[%s4593_s28 + $0x5c8] sm:$0xff] %v549_v57 }
  0xcc   : > { %552 = vst [vmem:[%s4593_s28 + $0x5d0] sm:$0xff] %v551_v58 }
  0xcd   : > { %554 = vst [vmem:[%s4593_s28 + $0x5d8] sm:$0xff] %v553_v59 }
  0xce   : > { %556 = vst [vmem:[%s4593_s28 + $0x5e0] sm:$0xff] %v555_v60 }
  0xcf   : > { %558 = vst [vmem:[%s4593_s28 + $0x5e8] sm:$0xff] %v557_v61 }
  0xd0   : > { %560 = vst [vmem:[%s4593_s28 + $0x5f0] sm:$0xff] %v559_v62 }
  0xd1   : > { %562 = vst [vmem:[%s4593_s28 + $0x5f8] sm:$0xff] %v561_v63 }
  0xd2   : > { %564 = vst [vmem:[%s4593_s28 + $0x600] sm:$0xff] %v563_v0 }
  0xd3   : > { %566 = vst [vmem:[%s4593_s28 + $0x608] sm:$0xff] %v565_v1 }
  0xd4   : > { %568 = vst [vmem:[%s4593_s28 + $0x610] sm:$0xff] %v567_v2 }
  0xd5   : > { %570 = vst [vmem:[%s4593_s28 + $0x618] sm:$0xff] %v569_v3 }
  0xd6 PF: > { %p3411_p6 = scmp.ge.s32.totalorder %s4520_s16, 1  ;;  %p575_p7 = scmp.lt.s32.totalorder %s4520_s16, 3 }
  0xd8   : > { %p576_p8 = pnand %p3411_p6, %p575_p7 }
  0xd9   : > { %s582_s29 = sand.u32 (!%p576_p8), 1, %s4504_s12   ;;  %s608_s30 = smul.u32 (!%p576_p8), 98, %s4512_s14 }
  0xda   : > { %579 = sbr.rel (%p576_p8) target bundleno = 781 (0x30d), region = 51  ;;  %p3412_p10 = scmp.ne.s32.totalorder (!%p576_p8), %s4512_s14, 0 }
  0xdb   : > { %s4400_s4 = smul.u32 (!%p576_p8), 1568, %s582_s29  ;;  %p611_p9 = scmp.lt.s32.totalorder (!%p576_p8), %s608_s30, 195 }
  0xdd   : > { %s4993_s8 = scalar_lea.vmem (!%p576_p8), [#allocation3], %s4400_s4 }
  0xdf   : > { %s5520_s30 = smov (!%p611_p9, %s608_s30), 195  ;;  %622 = sbr.rel (%p3412_p10) target bundleno = 230 (0xe6), region = 59 }
  0xe0   : > { %s4991_s7 = scalar_lea.vmem %s5509_s0, %s5520_s30 }
  0xe4   : > { %vm623_vm0 = vcmask 254976   ;;  %v4522_v4 = vmov 0.0  }
  0xe5   : > { %624 = vst.msk [vmem:[#allocation2] sm:$0x3] %vm623_vm0, %v4522_v4 }
  0xe6 PF: > { %v3807_v5 = vld [vmem:[%s4993_s8 + $0x310] sm:$0xf]  ;;  %v4350_v6 = vld [vmem:[%s4993_s8 + $0x494] sm:$0xf0]  ;;  %v4301_v7 = vld [vmem:[%s4993_s8 + $0x314] sm:$0xf] }
  0xe7   : > { %v3808_v8 = vor.u32 %v4350_v6, %v3807_v5  ;;  %v3809_v9 = vld [vmem:[%s4993_s8 + $0x498] sm:$0xf0]  ;;  %v3815_v10 = vld [vmem:[%s4993_s8 + $0x318] sm:$0xf]  ;;  %v4351_v11 = vld [vmem:[%s4993_s8 + $0x49c] sm:$0xf0] }
  0xe8   : > { %v3812_v12 = vor.u32 %v4301_v7, %v3809_v9  ;;  %v3816_v13 = vor.u32 %v4351_v11, %v3815_v10  ;;  %v4302_v14 = vld [vmem:[%s4993_s8 + $0x31c] sm:$0xf]  ;;  %v3817_v15 = vld [vmem:[%s4993_s8 + $0x4a0] sm:$0xf0]  ;;  %v3415_v16 = vld [vmem:[%s4993_s8] sm:$0xf] }
  0xe9   : > { %2043 = vmatpush.bf16.xpose.msra.mxu0 %v3808_v8  ;;  %v3820_v17 = vor.u32 %v4302_v14, %v3817_v15  ;;  %v4252_v18 = vld [vmem:[%s4993_s8 + $0x184] sm:$0xf0]  ;;  %v4203_v19 = vld [vmem:[%s4993_s8 + $0x4] sm:$0xf]  ;;  %v3417_v20 = vld [vmem:[%s4993_s8 + $0x188] sm:$0xf0] }
  0xea   : > { %2056 = vmatpush.bf16.xpose.msra.mxu1 %v3812_v12  ;;  %2069 = vmatpush.bf16.xpose.msra.mxu2 %v3816_v13  ;;  %v3423_v21 = vld [vmem:[%s4993_s8 + $0x8] sm:$0xf]  ;;  %v4253_v22 = vld [vmem:[%s4993_s8 + $0x18c] sm:$0xf0]  ;;  %v4204_v23 = vld [vmem:[%s4993_s8 + $0xc] sm:$0xf]  ;;  %v3416_v29 = vor.u32 %v4252_v18, %v3415_v16  ;;  %v3420_v33 = vor.u32 %v4203_v19, %v3417_v20 }
  0xeb   : > { %2082 = vmatpush.bf16.xpose.msra.mxu3 %v3820_v17  ;;  %v3425_v24 = vld [vmem:[%s4993_s8 + $0x190] sm:$0xf0]  ;;  %v3823_v26 = vld [vmem:[%s4993_s8 + $0x320] sm:$0xf]  ;;  %v4352_v27 = vld [vmem:[%s4993_s8 + $0x4a4] sm:$0xf0]  ;;  %v3424_v34 = vor.u32 %v4253_v22, %v3423_v21 }
  0xec   : > { %v626_v25 = vld [vmem:[%s4991_s7] sm:$0xff]  ;;  %v4303_v28 = vld [vmem:[%s4993_s8 + $0x324] sm:$0xf]  ;;  %v3825_v30 = vld [vmem:[%s4993_s8 + $0x4a8] sm:$0xf0]  ;;  %v3428_v37 = vor.u32 %v4204_v23, %v3425_v24  ;;  %v3824_v38 = vor.u32 %v4352_v27, %v3823_v26  ;;  %vm3312_vm1 = vcmask 254976  }
  0xed   : > { %836 = vst [vmem:[#allocation1] ss:$9 sm:$0xff] %v626_v25  ;;  %v3831_v31 = vld [vmem:[%s4993_s8 + $0x328] sm:$0xf]  ;;  %v4353_v32 = vld [vmem:[%s4993_s8 + $0x4ac] sm:$0xf0]  ;;  %v3828_v39 = vor.u32 %v4303_v28, %v3825_v30 }
  0xee   : > { %v4304_v35 = vld [vmem:[%s4993_s8 + $0x32c] sm:$0xf]  ;;  %v3833_v36 = vld [vmem:[%s4993_s8 + $0x4b0] sm:$0xf0]  ;;  %v3832_v40 = vor.u32 %v4353_v32, %v3831_v31  ;;  %v3431_v42 = vld [vmem:[%s4993_s8 + $0x10] sm:$0xf] }
  0xef   : > { %v3836_v41 = vor.u32 %v4304_v35, %v3833_v36  ;;  %v4254_v43 = vld [vmem:[%s4993_s8 + $0x194] sm:$0xf0]  ;;  %v4205_v44 = vld [vmem:[%s4993_s8 + $0x14] sm:$0xf]  ;;  %v3433_v45 = vld [vmem:[%s4993_s8 + $0x198] sm:$0xf0] }
  0xf0   : > { %v3439_v46 = vld [vmem:[%s4993_s8 + $0x18] sm:$0xf]  ;;  %v4255_v47 = vld [vmem:[%s4993_s8 + $0x19c] sm:$0xf0]  ;;  %v4206_v48 = vld [vmem:[%s4993_s8 + $0x1c] sm:$0xf]  ;;  %v3432_v59 = vor.u32 %v4254_v43, %v3431_v42  ;;  %v3436_v62 = vor.u32 %v4205_v44, %v3433_v45 }
  0xf1   : > { %2044 = vmatpush.bf16.xpose.msra.mxu0 %v3416_v29  ;;  %v3441_v49 = vld [vmem:[%s4993_s8 + $0x1a0] sm:$0xf0]  ;;  %v3839_v50 = vld [vmem:[%s4993_s8 + $0x330] sm:$0xf]  ;;  %v4354_v51 = vld [vmem:[%s4993_s8 + $0x4b4] sm:$0xf0]  ;;  %v3440_v63 = vor.u32 %v4255_v47, %v3439_v46 }
  0xf2   : > { %2057 = vmatpush.bf16.xpose.msra.mxu1 %v3420_v33  ;;  %2070 = vmatpush.bf16.xpose.msra.mxu2 %v3424_v34  ;;  %v4305_v53 = vld [vmem:[%s4993_s8 + $0x334] sm:$0xf]  ;;  %v3841_v54 = vld [vmem:[%s4993_s8 + $0x4b8] sm:$0xf0]  ;;  %v3847_v57 = vld [vmem:[%s4993_s8 + $0x338] sm:$0xf]  ;;  %v3444_v3 = vor.u32 %v4206_v48, %v3441_v49  ;;  %v3840_v5 = vor.u32 %v4354_v51, %v3839_v50 }
  0xf3   : > { %2083 = vmatpush.bf16.xpose.msra.mxu3 %v3428_v37  ;;  %v4355_v61 = vld [vmem:[%s4993_s8 + $0x4bc] sm:$0xf0]  ;;  %v4306_v1 = vld [vmem:[%s4993_s8 + $0x33c] sm:$0xf]  ;;  %v3849_v2 = vld [vmem:[%s4993_s8 + $0x4c0] sm:$0xf0]  ;;  %v3844_v8 = vor.u32 %v4305_v53, %v3841_v54 }
  0xf4   : > { %v837_v52 = vld [vmem:[#allocation1] sm:$0xff]  ;;  %v838_v55 = vld [vmem:[#allocation1 + $0x9] sm:$0xff]  ;;  %v839_v56 = vld [vmem:[#allocation1 + $0x12] sm:$0xff]  ;;  %v3848_v9 = vor.u32 %v4355_v61, %v3847_v57  ;;  %v3852_v10 = vor.u32 %v4306_v1, %v3849_v2  ;;  %p4197_p11 = scmp.ne.s32.totalorder %s4512_s14, 1 }
  0xf5   : > { %v840_v58 = vld [vmem:[#allocation1 + $0x1b] sm:$0xff]  ;;  %v841_v60 = vld [vmem:[#allocation1 + $0x24] sm:$0xff]  ;;  %v842_v0 = vld [vmem:[#allocation1 + $0x2d] sm:$0xff] }
  0xf6   : > { %v843_v4 = vld [vmem:[#allocation1 + $0x36] sm:$0xff]  ;;  %v844_v6 = vld [vmem:[#allocation1 + $0x3f] sm:$0xff]  ;;  %v627_v7 = vld [vmem:[%s4991_s7 + $0x8] sm:$0xff] }
  0xf7   : > { %846 = vst [vmem:[#allocation1] ss:$9 sm:$0xff] %v627_v7  ;;  %v3447_v11 = vld [vmem:[%s4993_s8 + $0x20] sm:$0xf]  ;;  %v4256_v12 = vld [vmem:[%s4993_s8 + $0x1a4] sm:$0xf0] }
  0xf8   : > { %2045 = vmatmul.bf16.vlgmr.msra.gmra.mxu0 %v837_v52  ;;  %v4207_v13 = vld [vmem:[%s4993_s8 + $0x24] sm:$0xf]  ;;  %v3449_v14 = vld [vmem:[%s4993_s8 + $0x1a8] sm:$0xf0]  ;;  %v3455_v15 = vld [vmem:[%s4993_s8 + $0x28] sm:$0xf]  ;;  %v3448_v19 = vor.u32 %v4256_v12, %v3447_v11 }
  0xf9   : > { %2095 = vmatpush.bf16.xpose.msrb.mxu0 %v3824_v38  ;;  %2058 = vmatmul.bf16.vlgmr.msra.gmra.mxu1 %v838_v55  ;;  %v4257_v16 = vld [vmem:[%s4993_s8 + $0x1ac] sm:$0xf0]  ;;  %v4208_v17 = vld [vmem:[%s4993_s8 + $0x2c] sm:$0xf]  ;;  %v3457_v18 = vld [vmem:[%s4993_s8 + $0x1b0] sm:$0xf0]  ;;  %v3452_v20 = vor.u32 %v4207_v13, %v3449_v14 }
  0xfa   : > { %2108 = vmatpush.bf16.xpose.msrb.mxu1 %v3828_v39  ;;  %2121 = vmatpush.bf16.xpose.msrb.mxu2 %v3832_v40  ;;  %v3456_v21 = vor.u32 %v4257_v16, %v3455_v15  ;;  %v3460_v22 = vor.u32 %v4208_v17, %v3457_v18  ;;  %v3855_v23 = vld [vmem:[%s4993_s8 + $0x340] sm:$0xf]  ;;  %v4356_v24 = vld [vmem:[%s4993_s8 + $0x4c4] sm:$0xf0]  ;;  %v4307_v25 = vld [vmem:[%s4993_s8 + $0x344] sm:$0xf] }
  0xfb   : > { %2134 = vmatpush.bf16.xpose.msrb.mxu3 %v3836_v41  ;;  %2071 = vmatmul.bf16.vlgmr.msra.gmra.mxu2 %v839_v56  ;;  %v3857_v26 = vld [vmem:[%s4993_s8 + $0x4c8] sm:$0xf0]  ;;  %v3863_v27 = vld [vmem:[%s4993_s8 + $0x348] sm:$0xf]  ;;  %v4357_v28 = vld [vmem:[%s4993_s8 + $0x4cc] sm:$0xf0]  ;;  %v3856_v31 = vor.u32 %v4356_v24, %v3855_v23 }
  0xfc   : > { %2084 = vmatmul.bf16.vlgmr.msra.gmra.mxu3 %v840_v58  ;;  %v4308_v29 = vld [vmem:[%s4993_s8 + $0x34c] sm:$0xf]  ;;  %v3865_v30 = vld [vmem:[%s4993_s8 + $0x4d0] sm:$0xf0]  ;;  %v3860_v32 = vor.u32 %v4307_v25, %v3857_v26  ;;  %v3864_v33 = vor.u32 %v4357_v28, %v3863_v27  ;;  %v3463_v35 = vld [vmem:[%s4993_s8 + $0x30] sm:$0xf] }
  0xfd   : > { %v3868_v34 = vor.u32 %v4308_v29, %v3865_v30  ;;  %v4258_v36 = vld [vmem:[%s4993_s8 + $0x1b4] sm:$0xf0]  ;;  %v4209_v37 = vld [vmem:[%s4993_s8 + $0x34] sm:$0xf]  ;;  %v3465_v38 = vld [vmem:[%s4993_s8 + $0x1b8] sm:$0xf0] }
  0xfe   : > { %v3471_v39 = vld [vmem:[%s4993_s8 + $0x38] sm:$0xf]  ;;  %v4259_v40 = vld [vmem:[%s4993_s8 + $0x1bc] sm:$0xf0]  ;;  %v849_v43 = vld [vmem:[#allocation1 + $0x12] sm:$0xff]  ;;  %v3464_v52 = vor.u32 %v4258_v36, %v3463_v35  ;;  %v3468_v53 = vor.u32 %v4209_v37, %v3465_v38 }
  0xff   : > { %v847_v41 = vld [vmem:[#allocation1] sm:$0xff]  ;;  %v848_v42 = vld [vmem:[#allocation1 + $0x9] sm:$0xff]  ;;  %v853_v49 = vld [vmem:[#allocation1 + $0x36] sm:$0xff]  ;;  %v3472_v54 = vor.u32 %v4259_v40, %v3471_v39 }
 0x100   : > { %v4210_v44 = vld [vmem:[%s4993_s8 + $0x3c] sm:$0xf]  ;;  %v3473_v45 = vld [vmem:[%s4993_s8 + $0x1c0] sm:$0xf0]  ;;  %v850_v46 = vld [vmem:[#allocation1 + $0x1b] sm:$0xff] }
 0x101   : > { %2096 = vmatpush.bf16.xpose.msrb.mxu0 %v3432_v59  ;;  %v851_v47 = vld [vmem:[#allocation1 + $0x24] sm:$0xff]  ;;  %v852_v48 = vld [vmem:[#allocation1 + $0x2d] sm:$0xff]  ;;  %v3476_v55 = vor.u32 %v4210_v44, %v3473_v45  ;;  %v3871_v56 = vld [vmem:[%s4993_s8 + $0x350] sm:$0xf] }
 0x102   : > { %2109 = vmatpush.bf16.xpose.msrb.mxu1 %v3436_v62  ;;  %2122 = vmatpush.bf16.xpose.msrb.mxu2 %v3440_v63  ;;  %v854_v50 = vld [vmem:[#allocation1 + $0x3f] sm:$0xff]  ;;  %v628_v51 = vld [vmem:[%s4991_s7 + $0x10] sm:$0xff]  ;;  %v4359_v61 = vld [vmem:[%s4993_s8 + $0x4dc] sm:$0xf0] }
 0x103   : > { %2135 = vmatpush.bf16.xpose.msrb.mxu3 %v3444_v3  ;;  %856 = vst [vmem:[#allocation1] ss:$9 sm:$0xff] %v628_v51  ;;  %v4358_v57 = vld [vmem:[%s4993_s8 + $0x4d4] sm:$0xf0]  ;;  %v4309_v58 = vld [vmem:[%s4993_s8 + $0x354] sm:$0xf] }
 0x104   : > { %v3873_v59 = vld [vmem:[%s4993_s8 + $0x4d8] sm:$0xf0]  ;;  %v3881_v63 = vld [vmem:[%s4993_s8 + $0x4e0] sm:$0xf0]  ;;  %v3481_v7 = vld [vmem:[%s4993_s8 + $0x1c8] sm:$0xf0] }
 0x105   : > { %v4310_v62 = vld [vmem:[%s4993_s8 + $0x35c] sm:$0xf]  ;;  %v3876_v1 = vor.u32 %v4309_v58, %v3873_v59  ;;  %v3489_v11 = vld [vmem:[%s4993_s8 + $0x1d0] sm:$0xf0]  ;;  %v3887_v16 = vld [vmem:[%s4993_s8 + $0x360] sm:$0xf] }
 0x106   : > { %v3884_v3 = vor.u32 %v4310_v62, %v3881_v63  ;;  %v4360_v17 = vld [vmem:[%s4993_s8 + $0x4e4] sm:$0xf0]  ;;  %v4311_v18 = vld [vmem:[%s4993_s8 + $0x364] sm:$0xf]  ;;  %v3897_v23 = vld [vmem:[%s4993_s8 + $0x4f0] sm:$0xf0] }
 0x107   : > { %v3888_v24 = vor.u32 %v4360_v17, %v3887_v16  ;;  %v3495_v28 = vld [vmem:[%s4993_s8 + $0x50] sm:$0xf]  ;;  %v4262_v29 = vld [vmem:[%s4993_s8 + $0x1d4] sm:$0xf0]  ;;  %v4213_v30 = vld [vmem:[%s4993_s8 + $0x54] sm:$0xf] }
 0x108   : > { %2097 = vmatmul.bf16.vlgmr.msrb.gmra.mxu0 %v841_v60  ;;  %v3879_v60 = vld [vmem:[%s4993_s8 + $0x358] sm:$0xf]  ;;  %v4263_v37 = vld [vmem:[%s4993_s8 + $0x1dc] sm:$0xf0]  ;;  %v4214_v38 = vld [vmem:[%s4993_s8 + $0x5c] sm:$0xf]  ;;  %v3496_v45 = vor.u32 %v4262_v29, %v3495_v28 }
 0x109   : > { %2147 = vmatpush.bf16.xpose.msra.mxu0 %v3840_v5  ;;  %2110 = vmatmul.bf16.vlgmr.msrb.gmra.mxu1 %v842_v0  ;;  %v3872_v0 = vor.u32 %v4358_v57, %v3871_v56  ;;  %v3880_v2 = vor.u32 %v4359_v61, %v3879_v60  ;;  %v4260_v5 = vld [vmem:[%s4993_s8 + $0x1c4] sm:$0xf0]  ;;  %v3503_v36 = vld [vmem:[%s4993_s8 + $0x58] sm:$0xf]  ;;  %v3505_v39 = vld [vmem:[%s4993_s8 + $0x1e0] sm:$0xf0] }
 0x10a   : > { %2160 = vmatpush.bf16.xpose.msra.mxu1 %v3844_v8  ;;  %2173 = vmatpush.bf16.xpose.msra.mxu2 %v3848_v9  ;;  %v3487_v8 = vld [vmem:[%s4993_s8 + $0x48] sm:$0xf]  ;;  %v4261_v9 = vld [vmem:[%s4993_s8 + $0x1cc] sm:$0xf0]  ;;  %v861_v40 = vld [vmem:[#allocation1 + $0x24] sm:$0xff] }
 0x10b   : > { %2186 = vmatpush.bf16.xpose.msra.mxu3 %v3852_v10  ;;  %2123 = vmatmul.bf16.vlgmr.msrb.gmra.mxu2 %v843_v4  ;;  %v3479_v4 = vld [vmem:[%s4993_s8 + $0x40] sm:$0xf]  ;;  %v4212_v10 = vld [vmem:[%s4993_s8 + $0x4c] sm:$0xf]  ;;  %v3488_v14 = vor.u32 %v4261_v9, %v3487_v8  ;;  %v860_v35 = vld [vmem:[#allocation1 + $0x1b] sm:$0xff] }
 0x10c   : > { %2136 = vmatmul.bf16.vlgmr.msrb.gmra.mxu3 %v844_v6  ;;  %v4211_v6 = vld [vmem:[%s4993_s8 + $0x44] sm:$0xf]  ;;  %v3480_v12 = vor.u32 %v4260_v5, %v3479_v4  ;;  %v3492_v15 = vor.u32 %v4212_v10, %v3489_v11  ;;  %v629_v44 = vld [vmem:[%s4991_s7 + $0x18] sm:$0xff]  ;;  %v3511_v61 = vld [vmem:[%s4993_s8 + $0x60] sm:$0xf] }
 0x10d   : > { %v3484_v13 = vor.u32 %v4211_v6, %v3481_v7  ;;  %v4313_v51 = vld [vmem:[%s4993_s8 + $0x374] sm:$0xf]  ;;  %v3913_v56 = vld [vmem:[%s4993_s8 + $0x500] sm:$0xf0]  ;;  %v4264_v62 = vld [vmem:[%s4993_s8 + $0x1e4] sm:$0xf0] }
 0x10e   : > { %v4215_v63 = vld [vmem:[%s4993_s8 + $0x64] sm:$0xf]  ;;  %v3521_v4 = vld [vmem:[%s4993_s8 + $0x1f0] sm:$0xf0]  ;;  %v3512_v5 = vor.u32 %v4264_v62, %v3511_v61  ;;  %v3919_v9 = vld [vmem:[%s4993_s8 + $0x380] sm:$0xf] }
 0x10f   : > { %v4364_v10 = vld [vmem:[%s4993_s8 + $0x504] sm:$0xf0]  ;;  %v4315_v11 = vld [vmem:[%s4993_s8 + $0x384] sm:$0xf]  ;;  %v3929_v16 = vld [vmem:[%s4993_s8 + $0x510] sm:$0xf0] }
 0x110   : > { %v3920_v17 = vor.u32 %v4364_v10, %v3919_v9  ;;  %v3537_v28 = vld [vmem:[%s4993_s8 + $0x200] sm:$0xf0]  ;;  %v3553_v61 = vld [vmem:[%s4993_s8 + $0x210] sm:$0xf0] }
 0x111   : > { %2148 = vmatpush.bf16.xpose.msra.mxu0 %v3448_v19  ;;  %v3889_v19 = vld [vmem:[%s4993_s8 + $0x4e8] sm:$0xf0]  ;;  %v3961_v9 = vld [vmem:[%s4993_s8 + $0x530] sm:$0xf0] }
 0x112   : > { %2161 = vmatpush.bf16.xpose.msra.mxu1 %v3452_v20  ;;  %2174 = vmatpush.bf16.xpose.msra.mxu2 %v3456_v21  ;;  %v3895_v20 = vld [vmem:[%s4993_s8 + $0x368] sm:$0xf]  ;;  %v4361_v21 = vld [vmem:[%s4993_s8 + $0x4ec] sm:$0xf0]  ;;  %v3892_v25 = vor.u32 %v4311_v18, %v3889_v19 }
 0x113   : > { %2187 = vmatpush.bf16.xpose.msra.mxu3 %v3460_v22  ;;  %v4312_v22 = vld [vmem:[%s4993_s8 + $0x36c] sm:$0xf]  ;;  %v3896_v26 = vor.u32 %v4361_v21, %v3895_v20  ;;  %v3527_v21 = vld [vmem:[%s4993_s8 + $0x70] sm:$0xf] }
 0x114   : > { %v3900_v27 = vor.u32 %v4312_v22, %v3897_v23  ;;  %v4266_v22 = vld [vmem:[%s4993_s8 + $0x1f4] sm:$0xf0]  ;;  %v4217_v23 = vld [vmem:[%s4993_s8 + $0x74] sm:$0xf] }
 0x118   : > { %2149 = vmatmul.bf16.vlgmr.msra.gmra.mxu0 %v847_v41  ;;  %v862_v41 = vld [vmem:[#allocation1 + $0x2d] sm:$0xff] }
 0x119   : > { %2199 = vmatpush.bf16.xpose.msrb.mxu0 %v3856_v31  ;;  %2162 = vmatmul.bf16.vlgmr.msra.gmra.mxu1 %v848_v42  ;;  %v3497_v31 = vld [vmem:[%s4993_s8 + $0x1d8] sm:$0xf0]  ;;  %v863_v42 = vld [vmem:[#allocation1 + $0x36] sm:$0xff] }
 0x11a   : > { %2212 = vmatpush.bf16.xpose.msrb.mxu1 %v3860_v32  ;;  %2225 = vmatpush.bf16.xpose.msrb.mxu2 %v3864_v33  ;;  %v857_v32 = vld [vmem:[#allocation1] sm:$0xff]  ;;  %v858_v33 = vld [vmem:[#allocation1 + $0x9] sm:$0xff] }
 0x11b   : > { %2238 = vmatpush.bf16.xpose.msrb.mxu3 %v3868_v34  ;;  %2175 = vmatmul.bf16.vlgmr.msra.gmra.mxu2 %v849_v43  ;;  %v859_v34 = vld [vmem:[#allocation1 + $0x12] sm:$0xff]  ;;  %v864_v43 = vld [vmem:[#allocation1 + $0x3f] sm:$0xff] }
 0x11c   : > { %2188 = vmatmul.bf16.vlgmr.msra.gmra.mxu3 %v850_v46  ;;  %866 = vst [vmem:[#allocation1] ss:$9 sm:$0xff] %v629_v44  ;;  %v3500_v46 = vor.u32 %v4213_v30, %v3497_v31  ;;  %v4317_v44 = vld [vmem:[%s4993_s8 + $0x394] sm:$0xf] }
 0x121   : > { %2200 = vmatpush.bf16.xpose.msrb.mxu0 %v3464_v52  ;;  %v3905_v52 = vld [vmem:[%s4993_s8 + $0x4f8] sm:$0xf0] }
 0x122   : > { %2213 = vmatpush.bf16.xpose.msrb.mxu1 %v3468_v53  ;;  %2226 = vmatpush.bf16.xpose.msrb.mxu2 %v3472_v54  ;;  %v3911_v53 = vld [vmem:[%s4993_s8 + $0x378] sm:$0xf]  ;;  %v4363_v54 = vld [vmem:[%s4993_s8 + $0x4fc] sm:$0xf0]  ;;  %v3908_v58 = vor.u32 %v4313_v51, %v3905_v52 }
 0x123   : > { %2239 = vmatpush.bf16.xpose.msrb.mxu3 %v3476_v55  ;;  %v4314_v55 = vld [vmem:[%s4993_s8 + $0x37c] sm:$0xf]  ;;  %v3912_v59 = vor.u32 %v4363_v54, %v3911_v53  ;;  %v869_v31 = vld [vmem:[#allocation1 + $0x12] sm:$0xff]  ;;  %v3543_v54 = vld [vmem:[%s4993_s8 + $0x80] sm:$0xf] }
 0x124   : > { %v3916_v60 = vor.u32 %v4314_v55, %v3913_v56  ;;  %v867_v29 = vld [vmem:[#allocation1] sm:$0xff]  ;;  %v868_v30 = vld [vmem:[#allocation1 + $0x9] sm:$0xff]  ;;  %v4268_v55 = vld [vmem:[%s4993_s8 + $0x204] sm:$0xf0] }
 0x125   : > { %v4219_v56 = vld [vmem:[%s4993_s8 + $0x84] sm:$0xf]  ;;  %v3544_v62 = vor.u32 %v4268_v55, %v3543_v54  ;;  %v3577_v54 = vld [vmem:[%s4993_s8 + $0x228] sm:$0xf0]  ;;  %v3583_v55 = vld [vmem:[%s4993_s8 + $0xa8] sm:$0xf] }
 0x128   : > { %2201 = vmatmul.bf16.vlgmr.msrb.gmra.mxu0 %v851_v47  ;;  %v3504_v47 = vor.u32 %v4263_v37, %v3503_v36  ;;  %v871_v36 = vld [vmem:[#allocation1 + $0x24] sm:$0xff]  ;;  %v872_v37 = vld [vmem:[#allocation1 + $0x2d] sm:$0xff] }
 0x129   : > { %2251 = vmatpush.bf16.xpose.msra.mxu0 %v3872_v0  ;;  %2214 = vmatmul.bf16.vlgmr.msrb.gmra.mxu1 %v852_v48  ;;  %v3508_v48 = vor.u32 %v4214_v38, %v3505_v39  ;;  %v3513_v0 = vld [vmem:[%s4993_s8 + $0x1e8] sm:$0xf0] }
 0x12a   : > { %2264 = vmatpush.bf16.xpose.msra.mxu1 %v3876_v1  ;;  %2277 = vmatpush.bf16.xpose.msra.mxu2 %v3880_v2  ;;  %v3519_v1 = vld [vmem:[%s4993_s8 + $0x68] sm:$0xf]  ;;  %v4265_v2 = vld [vmem:[%s4993_s8 + $0x1ec] sm:$0xf0]  ;;  %v3516_v6 = vor.u32 %v4215_v63, %v3513_v0 }
 0x12b   : > { %2290 = vmatpush.bf16.xpose.msra.mxu3 %v3884_v3  ;;  %2227 = vmatmul.bf16.vlgmr.msrb.gmra.mxu2 %v853_v49  ;;  %v3903_v49 = vld [vmem:[%s4993_s8 + $0x370] sm:$0xf]  ;;  %v4216_v3 = vld [vmem:[%s4993_s8 + $0x6c] sm:$0xf]  ;;  %v3520_v7 = vor.u32 %v4265_v2, %v3519_v1  ;;  %v3951_v2 = vld [vmem:[%s4993_s8 + $0x3a0] sm:$0xf] }
 0x12c   : > { %2240 = vmatmul.bf16.vlgmr.msrb.gmra.mxu3 %v854_v50  ;;  %v4362_v50 = vld [vmem:[%s4993_s8 + $0x4f4] sm:$0xf0]  ;;  %v3524_v8 = vor.u32 %v4216_v3, %v3521_v4  ;;  %v873_v39 = vld [vmem:[#allocation1 + $0x36] sm:$0xff]  ;;  %v4368_v3 = vld [vmem:[%s4993_s8 + $0x524] sm:$0xf0] }
 0x12d   : > { %v3904_v57 = vor.u32 %v4362_v50, %v3903_v49  ;;  %v3945_v49 = vld [vmem:[%s4993_s8 + $0x520] sm:$0xf0]  ;;  %v3952_v10 = vor.u32 %v4368_v3, %v3951_v2 }
 0x12e   : > { %v4319_v4 = vld [vmem:[%s4993_s8 + $0x3a4] sm:$0xf] }
 0x131   : > { %2252 = vmatpush.bf16.xpose.msra.mxu0 %v3480_v12  ;;  %v3921_v12 = vld [vmem:[%s4993_s8 + $0x508] sm:$0xf0] }
 0x132   : > { %2265 = vmatpush.bf16.xpose.msra.mxu1 %v3484_v13  ;;  %2278 = vmatpush.bf16.xpose.msra.mxu2 %v3488_v14  ;;  %v3927_v13 = vld [vmem:[%s4993_s8 + $0x388] sm:$0xf]  ;;  %v4365_v14 = vld [vmem:[%s4993_s8 + $0x50c] sm:$0xf0]  ;;  %v3924_v18 = vor.u32 %v4315_v11, %v3921_v12 }
 0x133   : > { %2291 = vmatpush.bf16.xpose.msra.mxu3 %v3492_v15  ;;  %v4316_v15 = vld [vmem:[%s4993_s8 + $0x38c] sm:$0xf]  ;;  %v3928_v19 = vor.u32 %v4365_v14, %v3927_v13  ;;  %v3559_v14 = vld [vmem:[%s4993_s8 + $0x90] sm:$0xf] }
 0x134   : > { %v3932_v20 = vor.u32 %v4316_v15, %v3929_v16  ;;  %v4270_v15 = vld [vmem:[%s4993_s8 + $0x214] sm:$0xf0]  ;;  %v4221_v16 = vld [vmem:[%s4993_s8 + $0x94] sm:$0xf] }
 0x138   : > { %2253 = vmatmul.bf16.vlgmr.msra.gmra.mxu0 %v857_v32  ;;  %v3528_v32 = vor.u32 %v4266_v22, %v3527_v21  ;;  %v3569_v21 = vld [vmem:[%s4993_s8 + $0x220] sm:$0xf0]  ;;  %v3560_v22 = vor.u32 %v4270_v15, %v3559_v14  ;;  %v3993_v14 = vld [vmem:[%s4993_s8 + $0x550] sm:$0xf0] }
 0x139   : > { %2303 = vmatpush.bf16.xpose.msrb.mxu0 %v3888_v24  ;;  %2266 = vmatmul.bf16.vlgmr.msra.gmra.mxu1 %v858_v33  ;;  %v3529_v24 = vld [vmem:[%s4993_s8 + $0x1f8] sm:$0xf0]  ;;  %v870_v33 = vld [vmem:[#allocation1 + $0x1b] sm:$0xff] }
 0x13a   : > { %2316 = vmatpush.bf16.xpose.msrb.mxu1 %v3892_v25  ;;  %2329 = vmatpush.bf16.xpose.msrb.mxu2 %v3896_v26  ;;  %v3535_v25 = vld [vmem:[%s4993_s8 + $0x78] sm:$0xf]  ;;  %v4267_v26 = vld [vmem:[%s4993_s8 + $0x1fc] sm:$0xf0] }
 0x13b   : > { %2342 = vmatpush.bf16.xpose.msrb.mxu3 %v3900_v27  ;;  %2279 = vmatmul.bf16.vlgmr.msra.gmra.mxu2 %v859_v34  ;;  %v4218_v27 = vld [vmem:[%s4993_s8 + $0x7c] sm:$0xf]  ;;  %v3532_v34 = vor.u32 %v4217_v23, %v3529_v24 }
 0x13c   : > { %2292 = vmatmul.bf16.vlgmr.msra.gmra.mxu3 %v860_v35  ;;  %v3536_v35 = vor.u32 %v4267_v26, %v3535_v25  ;;  %v3540_v38 = vor.u32 %v4218_v27, %v3537_v28 }
 0x141   : > { %2304 = vmatpush.bf16.xpose.msrb.mxu0 %v3496_v45  ;;  %v3937_v45 = vld [vmem:[%s4993_s8 + $0x518] sm:$0xf0] }
 0x142   : > { %2317 = vmatpush.bf16.xpose.msrb.mxu1 %v3500_v46  ;;  %2330 = vmatpush.bf16.xpose.msrb.mxu2 %v3504_v47  ;;  %v3943_v46 = vld [vmem:[%s4993_s8 + $0x398] sm:$0xf]  ;;  %v4367_v47 = vld [vmem:[%s4993_s8 + $0x51c] sm:$0xf0]  ;;  %v3940_v51 = vor.u32 %v4317_v44, %v3937_v45 }
 0x143   : > { %2343 = vmatpush.bf16.xpose.msrb.mxu3 %v3508_v48  ;;  %v4318_v48 = vld [vmem:[%s4993_s8 + $0x39c] sm:$0xf]  ;;  %v3944_v52 = vor.u32 %v4367_v47, %v3943_v46 }
 0x144   : > { %v3948_v53 = vor.u32 %v4318_v48, %v3945_v49 }
 0x148   : > { %2305 = vmatmul.bf16.vlgmr.msrb.gmra.mxu0 %v861_v40  ;;  %v874_v40 = vld [vmem:[#allocation1 + $0x3f] sm:$0xff] }
 0x149   : > { %2355 = vmatpush.bf16.xpose.msra.mxu0 %v3904_v57  ;;  %2318 = vmatmul.bf16.vlgmr.msrb.gmra.mxu1 %v862_v41  ;;  %v630_v41 = vld [vmem:[%s4991_s7 + $0x20] sm:$0xff]  ;;  %v3545_v57 = vld [vmem:[%s4993_s8 + $0x208] sm:$0xf0] }
 0x14a   : > { %2368 = vmatpush.bf16.xpose.msra.mxu1 %v3908_v58  ;;  %2381 = vmatpush.bf16.xpose.msra.mxu2 %v3912_v59  ;;  %876 = vst [vmem:[#allocation1] ss:$9 sm:$0xff] %v630_v41  ;;  %v3551_v58 = vld [vmem:[%s4993_s8 + $0x88] sm:$0xf]  ;;  %v4269_v59 = vld [vmem:[%s4993_s8 + $0x20c] sm:$0xf0]  ;;  %v3548_v63 = vor.u32 %v4219_v56, %v3545_v57 }
 0x14b   : > { %2394 = vmatpush.bf16.xpose.msra.mxu3 %v3916_v60  ;;  %2331 = vmatmul.bf16.vlgmr.msrb.gmra.mxu2 %v863_v42  ;;  %v3935_v42 = vld [vmem:[%s4993_s8 + $0x390] sm:$0xf]  ;;  %v4220_v60 = vld [vmem:[%s4993_s8 + $0x8c] sm:$0xf]  ;;  %v3552_v0 = vor.u32 %v4269_v59, %v3551_v58 }
 0x14c   : > { %2344 = vmatmul.bf16.vlgmr.msrb.gmra.mxu3 %v864_v43  ;;  %v4366_v43 = vld [vmem:[%s4993_s8 + $0x514] sm:$0xf0]  ;;  %v3556_v1 = vor.u32 %v4220_v60, %v3553_v61  ;;  %v4273_v56 = vld [vmem:[%s4993_s8 + $0x22c] sm:$0xf0]  ;;  %v4224_v60 = vld [vmem:[%s4993_s8 + $0xac] sm:$0xf] }
 0x14d   : > { %v3936_v50 = vor.u32 %v4366_v43, %v3935_v42  ;;  %v4322_v42 = vld [vmem:[%s4993_s8 + $0x3bc] sm:$0xf]  ;;  %v3977_v43 = vld [vmem:[%s4993_s8 + $0x540] sm:$0xf0]  ;;  %v3585_v61 = vld [vmem:[%s4993_s8 + $0x230] sm:$0xf0]  ;;  %v3584_v2 = vor.u32 %v4273_v56, %v3583_v55 }
 0x14e   : > { %v3980_v49 = vor.u32 %v4322_v42, %v3977_v43  ;;  %v3588_v3 = vor.u32 %v4224_v60, %v3585_v61  ;;  %v4375_v55 = vld [vmem:[%s4993_s8 + $0x55c] sm:$0xf0] }
 0x151   : > { %2356 = vmatpush.bf16.xpose.msra.mxu0 %v3512_v5  ;;  %v3953_v5 = vld [vmem:[%s4993_s8 + $0x528] sm:$0xf0]  ;;  %v877_v23 = vld [vmem:[#allocation1] sm:$0xff]  ;;  %v878_v24 = vld [vmem:[#allocation1 + $0x9] sm:$0xff] }
 0x152   : > { %2369 = vmatpush.bf16.xpose.msra.mxu1 %v3516_v6  ;;  %2382 = vmatpush.bf16.xpose.msra.mxu2 %v3520_v7  ;;  %v3959_v6 = vld [vmem:[%s4993_s8 + $0x3a8] sm:$0xf]  ;;  %v4369_v7 = vld [vmem:[%s4993_s8 + $0x52c] sm:$0xf0]  ;;  %v3956_v11 = vor.u32 %v4319_v4, %v3953_v5  ;;  %v3983_v4 = vld [vmem:[%s4993_s8 + $0x3c0] sm:$0xf] }
 0x153   : > { %2395 = vmatpush.bf16.xpose.msra.mxu3 %v3524_v8  ;;  %v4320_v8 = vld [vmem:[%s4993_s8 + $0x3ac] sm:$0xf]  ;;  %v3960_v12 = vor.u32 %v4369_v7, %v3959_v6  ;;  %v880_v28 = vld [vmem:[#allocation1 + $0x1b] sm:$0xff]  ;;  %v4372_v5 = vld [vmem:[%s4993_s8 + $0x544] sm:$0xf0] }
 0x154   : > { %v3964_v13 = vor.u32 %v4320_v8, %v3961_v9  ;;  %v879_v25 = vld [vmem:[#allocation1 + $0x12] sm:$0xff]  ;;  %v4323_v6 = vld [vmem:[%s4993_s8 + $0x3c4] sm:$0xf] }
 0x155   : > { %v3985_v8 = vld [vmem:[%s4993_s8 + $0x548] sm:$0xf0]  ;;  %v3991_v9 = vld [vmem:[%s4993_s8 + $0x3c8] sm:$0xf] }
 0x158   : > { %2357 = vmatmul.bf16.vlgmr.msra.gmra.mxu0 %v867_v29 }
 0x159   : > { %2407 = vmatpush.bf16.xpose.msrb.mxu0 %v3920_v17  ;;  %2370 = vmatmul.bf16.vlgmr.msra.gmra.mxu1 %v868_v30  ;;  %v3561_v17 = vld [vmem:[%s4993_s8 + $0x218] sm:$0xf0] }
 0x15a   : > { %2420 = vmatpush.bf16.xpose.msrb.mxu1 %v3924_v18  ;;  %2433 = vmatpush.bf16.xpose.msrb.mxu2 %v3928_v19  ;;  %v3567_v18 = vld [vmem:[%s4993_s8 + $0x98] sm:$0xf]  ;;  %v4271_v19 = vld [vmem:[%s4993_s8 + $0x21c] sm:$0xf0]  ;;  %v3564_v26 = vor.u32 %v4221_v16, %v3561_v17  ;;  %v3984_v17 = vor.u32 %v4372_v5, %v3983_v4  ;;  %v4276_v4 = vld [vmem:[%s4993_s8 + $0x244] sm:$0xf0] }
 0x15b   : > { %2446 = vmatpush.bf16.xpose.msrb.mxu3 %v3932_v20  ;;  %2383 = vmatmul.bf16.vlgmr.msra.gmra.mxu2 %v869_v31  ;;  %v4222_v20 = vld [vmem:[%s4993_s8 + $0x9c] sm:$0xf]  ;;  %v3568_v27 = vor.u32 %v4271_v19, %v3567_v18  ;;  %v5163_v31 = vld [vmem:[#allocation1 + $0x2d] sm:$0xff]  ;;  %v3988_v18 = vor.u32 %v4323_v6, %v3985_v8 }
 0x15c   : > { %2396 = vmatmul.bf16.vlgmr.msra.gmra.mxu3 %v870_v33  ;;  %v3572_v29 = vor.u32 %v4222_v20, %v3569_v21  ;;  %v5161_v30 = vld [vmem:[#allocation1 + $0x24] sm:$0xff]  ;;  %v4227_v5 = vld [vmem:[%s4993_s8 + $0xc4] sm:$0xf]  ;;  %v3615_v8 = vld [vmem:[%s4993_s8 + $0xc8] sm:$0xf] }
 0x15d   : > { %v5167_v33 = vld [vmem:[#allocation1 + $0x3f] sm:$0xff] }
 0x161   : > { %2408 = vmatpush.bf16.xpose.msrb.mxu0 %v3528_v32  ;;  %v5165_v32 = vld [vmem:[#allocation1 + $0x36] sm:$0xff] }
 0x162   : > { %2421 = vmatpush.bf16.xpose.msrb.mxu1 %v3532_v34  ;;  %2434 = vmatpush.bf16.xpose.msrb.mxu2 %v3536_v35  ;;  %v631_v34 = vld [vmem:[%s4991_s7 + $0x28] sm:$0xff]  ;;  %v3967_v35 = vld [vmem:[%s4993_s8 + $0x3b0] sm:$0xf] }
 0x163   : > { %2447 = vmatpush.bf16.xpose.msrb.mxu3 %v3540_v38  ;;  %886 = vst [vmem:[#allocation1] ss:$9 sm:$0xff] %v631_v34  ;;  %v3969_v38 = vld [vmem:[%s4993_s8 + $0x538] sm:$0xf0] }
 0x164   : > { %v4226_v34 = vld [vmem:[%s4993_s8 + $0xbc] sm:$0xf] }
 0x168   : > { %2409 = vmatmul.bf16.vlgmr.msrb.gmra.mxu0 %v871_v36  ;;  %v4370_v36 = vld [vmem:[%s4993_s8 + $0x534] sm:$0xf0] }
 0x169   : > { %2459 = vmatpush.bf16.xpose.msra.mxu0 %v3936_v50  ;;  %2422 = vmatmul.bf16.vlgmr.msrb.gmra.mxu1 %v872_v37  ;;  %v4321_v37 = vld [vmem:[%s4993_s8 + $0x3b4] sm:$0xf]  ;;  %v3968_v45 = vor.u32 %v4370_v36, %v3967_v35  ;;  %v3575_v50 = vld [vmem:[%s4993_s8 + $0xa0] sm:$0xf] }
 0x16a   : > { %2472 = vmatpush.bf16.xpose.msra.mxu1 %v3940_v51  ;;  %2485 = vmatpush.bf16.xpose.msra.mxu2 %v3944_v52  ;;  %v3972_v47 = vor.u32 %v4321_v37, %v3969_v38  ;;  %v4272_v51 = vld [vmem:[%s4993_s8 + $0x224] sm:$0xf0]  ;;  %v4223_v52 = vld [vmem:[%s4993_s8 + $0xa4] sm:$0xf]  ;;  %v887_v37 = vld [vmem:[#allocation1] sm:$0xff] }
 0x16b   : > { %2498 = vmatpush.bf16.xpose.msra.mxu3 %v3948_v53  ;;  %2435 = vmatmul.bf16.vlgmr.msrb.gmra.mxu2 %v873_v39  ;;  %v3975_v39 = vld [vmem:[%s4993_s8 + $0x3b8] sm:$0xf]  ;;  %v888_v38 = vld [vmem:[#allocation1 + $0x9] sm:$0xff] }
 0x16c   : > { %2448 = vmatmul.bf16.vlgmr.msrb.gmra.mxu3 %v874_v40  ;;  %v4371_v40 = vld [vmem:[%s4993_s8 + $0x53c] sm:$0xf0]  ;;  %v890_v42 = vld [vmem:[#allocation1 + $0x1b] sm:$0xff] }
 0x16d   : > { %v3976_v48 = vor.u32 %v4371_v40, %v3975_v39  ;;  %v889_v39 = vld [vmem:[#allocation1 + $0x12] sm:$0xff] }
 0x171   : > { %2460 = vmatpush.bf16.xpose.msra.mxu0 %v3544_v62 }
 0x172   : > { %2473 = vmatpush.bf16.xpose.msra.mxu1 %v3548_v63  ;;  %2486 = vmatpush.bf16.xpose.msra.mxu2 %v3552_v0  ;;  %v3576_v63 = vor.u32 %v4272_v51, %v3575_v50  ;;  %v4374_v50 = vld [vmem:[%s4993_s8 + $0x554] sm:$0xf0]  ;;  %v4325_v51 = vld [vmem:[%s4993_s8 + $0x3d4] sm:$0xf] }
 0x173   : > { %2499 = vmatpush.bf16.xpose.msra.mxu3 %v3556_v1  ;;  %v3580_v1 = vor.u32 %v4223_v52, %v3577_v54  ;;  %v4007_v54 = vld [vmem:[%s4993_s8 + $0x3d8] sm:$0xf] }
 0x175   : > { %v2046_v41 = vpop.f32.mrf.mxu0 }
 0x176   : > { %v2059_v44 = vpop.f32.mrf.mxu1 }
 0x177   : > { %v2060_v46 = vadd.f32 %v2059_v44, %v2046_v41  ;;  %v5206_v44 = vld [vmem:[#allocation1 + $0x24] sm:$0xff] }
 0x178   : > { %2461 = vmatmul.bf16.vlgmr.msra.gmra.mxu0 %v877_v23  ;;  %v4274_v23 = vld [vmem:[%s4993_s8 + $0x234] sm:$0xf0] }
 0x179   : > { %2511 = vmatpush.bf16.xpose.msrb.mxu0 %v3952_v10  ;;  %2474 = vmatmul.bf16.vlgmr.msra.gmra.mxu1 %v878_v24  ;;  %v4373_v10 = vld [vmem:[%s4993_s8 + $0x54c] sm:$0xf0]  ;;  %v4225_v24 = vld [vmem:[%s4993_s8 + $0xb4] sm:$0xf] }
 0x17a   : > { %2524 = vmatpush.bf16.xpose.msrb.mxu1 %v3956_v11  ;;  %2537 = vmatpush.bf16.xpose.msrb.mxu2 %v3960_v12  ;;  %v3992_v19 = vor.u32 %v4373_v10, %v3991_v9  ;;  %v4277_v9 = vld [vmem:[%s4993_s8 + $0x24c] sm:$0xf0] }
 0x17b   : > { %2550 = vmatpush.bf16.xpose.msrb.mxu3 %v3964_v13  ;;  %2487 = vmatmul.bf16.vlgmr.msra.gmra.mxu2 %v879_v25  ;;  %v4324_v13 = vld [vmem:[%s4993_s8 + $0x3cc] sm:$0xf] }
 0x17c   : > { %2500 = vmatmul.bf16.vlgmr.msra.gmra.mxu3 %v880_v28  ;;  %v3996_v21 = vor.u32 %v4324_v13, %v3993_v14  ;;  %v4275_v28 = vld [vmem:[%s4993_s8 + $0x23c] sm:$0xf0]  ;;  %v4228_v13 = vld [vmem:[%s4993_s8 + $0xcc] sm:$0xf]  ;;  %v3617_v14 = vld [vmem:[%s4993_s8 + $0x250] sm:$0xf0] }
 0x17d   : > { %v2048_v59 = vpop.f32.mrf.mxu0 }
 0x17e   : > { %v2072_v53 = vpop.f32.mrf.mxu2  ;;  %v2061_v62 = vpop.f32.mrf.mxu1  ;;  %v4009_v59 = vld [vmem:[%s4993_s8 + $0x560] sm:$0xf0] }
 0x17f   : > { %v2073_v57 = vadd.f32 %v2072_v53, %v2060_v46  ;;  %v2085_v58 = vpop.f32.mrf.mxu3  ;;  %v5210_v46 = vld [vmem:[#allocation1 + $0x36] sm:$0xff]  ;;  %v4001_v53 = vld [vmem:[%s4993_s8 + $0x558] sm:$0xf0] }
 0x181   : > { %2512 = vmatpush.bf16.xpose.msrb.mxu0 %v3560_v22  ;;  %v2086_v0 = vadd.f32 %v2085_v58, %v2073_v57  ;;  %v3591_v22 = vld [vmem:[%s4993_s8 + $0xb0] sm:$0xf]  ;;  %v4326_v58 = vld [vmem:[%s4993_s8 + $0x3dc] sm:$0xf] }
 0x182   : > { %2525 = vmatpush.bf16.xpose.msrb.mxu1 %v3564_v26  ;;  %2538 = vmatpush.bf16.xpose.msrb.mxu2 %v3568_v27  ;;  %v3593_v26 = vld [vmem:[%s4993_s8 + $0x238] sm:$0xf0]  ;;  %v3599_v27 = vld [vmem:[%s4993_s8 + $0xb8] sm:$0xf] }
 0x183   : > { %2551 = vmatpush.bf16.xpose.msrb.mxu3 %v3572_v29  ;;  %v3596_v40 = vor.u32 %v4225_v24, %v3593_v26  ;;  %v3600_v41 = vor.u32 %v4275_v28, %v3599_v27  ;;  %v4023_v26 = vld [vmem:[%s4993_s8 + $0x3e8] sm:$0xf]  ;;  %v4377_v27 = vld [vmem:[%s4993_s8 + $0x56c] sm:$0xf0] }
 0x185   : > { %v2098_v12 = vpop.f32.mrf.mxu0 }
 0x186   : > { %v2074_v7 = vpop.f32.mrf.mxu2  ;;  %v2099_v15 = vadd.f32 %v2098_v12, %v2086_v0  ;;  %v2111_v16 = vpop.f32.mrf.mxu1  ;;  %v4008_v0 = vor.u32 %v4375_v55, %v4007_v54 }
 0x187   : > { %v2087_v11 = vpop.f32.mrf.mxu3  ;;  %v3609_v7 = vld [vmem:[%s4993_s8 + $0x248] sm:$0xf0] }
 0x188   : > { %v2112_v20 = vadd.f32 %v2111_v16, %v2099_v15  ;;  %2513 = vmatmul.bf16.vlgmr.msrb.gmra.mxu0 %v5161_v30 }
 0x189   : > { %2563 = vmatpush.bf16.xpose.msra.mxu0 %v3968_v45  ;;  %2526 = vmatmul.bf16.vlgmr.msrb.gmra.mxu1 %v5163_v31  ;;  %v5208_v45 = vld [vmem:[#allocation1 + $0x2d] sm:$0xff] }
 0x18a   : > { %2576 = vmatpush.bf16.xpose.msra.mxu1 %v3972_v47  ;;  %2589 = vmatpush.bf16.xpose.msra.mxu2 %v3976_v48  ;;  %v5212_v47 = vld [vmem:[#allocation1 + $0x3f] sm:$0xff]  ;;  %v632_v48 = vld [vmem:[%s4991_s7 + $0x30] sm:$0xff] }
 0x18b   : > { %2602 = vmatpush.bf16.xpose.msra.mxu3 %v3980_v49  ;;  %2539 = vmatmul.bf16.vlgmr.msrb.gmra.mxu2 %v5165_v32  ;;  %v3601_v32 = vld [vmem:[%s4993_s8 + $0x240] sm:$0xf0]  ;;  %896 = vst [vmem:[#allocation1] ss:$9 sm:$0xff] %v632_v48  ;;  %v3999_v49 = vld [vmem:[%s4993_s8 + $0x3d0] sm:$0xf] }
 0x18c   : > { %2552 = vmatmul.bf16.vlgmr.msrb.gmra.mxu3 %v5167_v33  ;;  %v3592_v33 = vor.u32 %v4274_v23, %v3591_v22  ;;  %v3604_v43 = vor.u32 %v4226_v34, %v3601_v32  ;;  %v4000_v62 = vor.u32 %v4374_v50, %v3999_v49  ;;  %v4376_v22 = vld [vmem:[%s4993_s8 + $0x564] sm:$0xf0]  ;;  %v4327_v23 = vld [vmem:[%s4993_s8 + $0x3e4] sm:$0xf]  ;;  %v3631_v48 = vld [vmem:[%s4993_s8 + $0xd8] sm:$0xf] }
 0x18d   : > { %v2100_v31 = vpop.f32.mrf.mxu0 }
 0x18e   : > { %v2124_v25 = vpop.f32.mrf.mxu2  ;;  %v2113_v35 = vpop.f32.mrf.mxu1  ;;  %v4025_v31 = vld [vmem:[%s4993_s8 + $0x570] sm:$0xf0] }
 0x18f   : > { %v2125_v29 = vadd.f32 %v2124_v25, %v2112_v20  ;;  %v2137_v30 = vpop.f32.mrf.mxu3  ;;  %v3620_v20 = vor.u32 %v4228_v13, %v3617_v14  ;;  %v4017_v25 = vld [vmem:[%s4993_s8 + $0x568] sm:$0xf0] }
 0x191   : > { %2564 = vmatpush.bf16.xpose.msra.mxu0 %v3576_v63  ;;  %v2138_v36 = vadd.f32 %v2137_v30, %v2125_v29  ;;  %v4004_v63 = vor.u32 %v4325_v51, %v4001_v53  ;;  %v4328_v30 = vld [vmem:[%s4993_s8 + $0x3ec] sm:$0xf]  ;;  %v4230_v51 = vld [vmem:[%s4993_s8 + $0xdc] sm:$0xf] }
 0x192   : > { %2577 = vmatpush.bf16.xpose.msra.mxu1 %v3580_v1  ;;  %2590 = vmatpush.bf16.xpose.msra.mxu2 %v3584_v2  ;;  %v4012_v2 = vor.u32 %v4326_v58, %v4009_v59  ;;  %v897_v54 = vld [vmem:[#allocation1] sm:$0xff]  ;;  %v898_v55 = vld [vmem:[#allocation1 + $0x9] sm:$0xff] }
 0x193   : > { %2603 = vmatpush.bf16.xpose.msra.mxu3 %v3588_v3  ;;  %v3607_v3 = vld [vmem:[%s4993_s8 + $0xc0] sm:$0xf]  ;;  %v900_v59 = vld [vmem:[#allocation1 + $0x1b] sm:$0xff] }
 0x194   : > { %v3608_v16 = vor.u32 %v4276_v4, %v3607_v3  ;;  %v4378_v3 = vld [vmem:[%s4993_s8 + $0x574] sm:$0xf0]  ;;  %v4329_v4 = vld [vmem:[%s4993_s8 + $0x3f4] sm:$0xf] }
 0x195   : > { %v2150_v57 = vpop.f32.mrf.mxu0 }
 0x196   : > { %v2126_v52 = vpop.f32.mrf.mxu2  ;;  %v2151_v60 = vadd.f32 %v2150_v57, %v2138_v36  ;;  %v2163_v61 = vpop.f32.mrf.mxu1  ;;  %v4024_v36 = vor.u32 %v4377_v27, %v4023_v26  ;;  %v4281_v26 = vld [vmem:[%s4993_s8 + $0x26c] sm:$0xf0] }
 0x197   : > { %v2139_v56 = vpop.f32.mrf.mxu3 }
 0x198   : > { %v2164_v1 = vadd.f32 %v2163_v61, %v2151_v60  ;;  %2565 = vmatmul.bf16.vlgmr.msra.gmra.mxu0 %v887_v37  ;;  %v899_v56 = vld [vmem:[#allocation1 + $0x12] sm:$0xff]  ;;  %v5251_v61 = vld [vmem:[#allocation1 + $0x24] sm:$0xff] }
 0x199   : > { %2615 = vmatpush.bf16.xpose.msrb.mxu0 %v3984_v17  ;;  %2578 = vmatmul.bf16.vlgmr.msra.gmra.mxu1 %v888_v38  ;;  %v4028_v38 = vor.u32 %v4328_v30, %v4025_v31  ;;  %v4232_v30 = vld [vmem:[%s4993_s8 + $0xec] sm:$0xf]  ;;  %v3649_v31 = vld [vmem:[%s4993_s8 + $0x270] sm:$0xf0] }
 0x19a   : > { %2628 = vmatpush.bf16.xpose.msrb.mxu1 %v3988_v18  ;;  %2641 = vmatpush.bf16.xpose.msrb.mxu2 %v3992_v19  ;;  %v3612_v18 = vor.u32 %v4227_v5, %v3609_v7  ;;  %v3616_v19 = vor.u32 %v4277_v9, %v3615_v8  ;;  %v4039_v7 = vld [vmem:[%s4993_s8 + $0x3f8] sm:$0xf]  ;;  %v4379_v8 = vld [vmem:[%s4993_s8 + $0x57c] sm:$0xf0] }
 0x19b   : > { %2654 = vmatpush.bf16.xpose.msrb.mxu3 %v3996_v21  ;;  %2591 = vmatmul.bf16.vlgmr.msra.gmra.mxu2 %v889_v39  ;;  %v4015_v21 = vld [vmem:[%s4993_s8 + $0x3e0] sm:$0xf]  ;;  %v3623_v39 = vld [vmem:[%s4993_s8 + $0xd0] sm:$0xf] }
 0x19c   : > { %2604 = vmatmul.bf16.vlgmr.msra.gmra.mxu3 %v890_v42  ;;  %v4016_v35 = vor.u32 %v4376_v22, %v4015_v21  ;;  %v4280_v21 = vld [vmem:[%s4993_s8 + $0x264] sm:$0xf0]  ;;  %v4231_v22 = vld [vmem:[%s4993_s8 + $0xe4] sm:$0xf] }
 0x19d   : > { %v2152_v12 = vpop.f32.mrf.mxu0 }
 0x19e   : > { %v2176_v6 = vpop.f32.mrf.mxu2  ;;  %v2165_v15 = vpop.f32.mrf.mxu1  ;;  %v4041_v12 = vld [vmem:[%s4993_s8 + $0x580] sm:$0xf0] }
 0x19f   : > { %v2177_v10 = vadd.f32 %v2176_v6, %v2164_v1  ;;  %v2189_v11 = vpop.f32.mrf.mxu3  ;;  %v633_v1 = vld [vmem:[%s4991_s7 + $0x38] sm:$0xff]  ;;  %v4033_v6 = vld [vmem:[%s4993_s8 + $0x578] sm:$0xf0] }
 0x1a1   : > { %2616 = vmatpush.bf16.xpose.msrb.mxu0 %v3592_v33  ;;  %v2190_v17 = vadd.f32 %v2189_v11, %v2177_v10  ;;  %v4020_v33 = vor.u32 %v4327_v23, %v4017_v25  ;;  %v4330_v11 = vld [vmem:[%s4993_s8 + $0x3fc] sm:$0xf]  ;;  %v3647_v25 = vld [vmem:[%s4993_s8 + $0xe8] sm:$0xf] }
 0x1a2   : > { %2629 = vmatpush.bf16.xpose.msrb.mxu1 %v3596_v40  ;;  %2642 = vmatpush.bf16.xpose.msrb.mxu2 %v3600_v41  ;;  %v4278_v40 = vld [vmem:[%s4993_s8 + $0x254] sm:$0xf0]  ;;  %v4229_v41 = vld [vmem:[%s4993_s8 + $0xd4] sm:$0xf] }
 0x1a3   : > { %2655 = vmatpush.bf16.xpose.msrb.mxu3 %v3604_v43  ;;  %v3625_v43 = vld [vmem:[%s4993_s8 + $0x258] sm:$0xf0] }
 0x1a4   : > { %v3628_v57 = vor.u32 %v4229_v41, %v3625_v43  ;;  %v4055_v43 = vld [vmem:[%s4993_s8 + $0x408] sm:$0xf] }
 0x1a5   : > { %v2202_v29 = vpop.f32.mrf.mxu0 }
 0x1a6   : > { %v2178_v24 = vpop.f32.mrf.mxu2  ;;  %v2203_v34 = vadd.f32 %v2202_v29, %v2190_v17  ;;  %v2215_v32 = vpop.f32.mrf.mxu1  ;;  %v4040_v17 = vor.u32 %v4379_v8, %v4039_v7 }
 0x1a7   : > { %v2191_v28 = vpop.f32.mrf.mxu3  ;;  %v3641_v24 = vld [vmem:[%s4993_s8 + $0x268] sm:$0xf0] }
 0x1a8   : > { %v2216_v37 = vadd.f32 %v2215_v32, %v2203_v34  ;;  %2617 = vmatmul.bf16.vlgmr.msrb.gmra.mxu0 %v5206_v44  ;;  %v4279_v44 = vld [vmem:[%s4993_s8 + $0x25c] sm:$0xf0] }
 0x1a9   : > { %2667 = vmatpush.bf16.xpose.msra.mxu0 %v4000_v62  ;;  %2630 = vmatmul.bf16.vlgmr.msrb.gmra.mxu1 %v5208_v45  ;;  %v3632_v58 = vor.u32 %v4279_v44, %v3631_v48  ;;  %v5253_v62 = vld [vmem:[#allocation1 + $0x2d] sm:$0xff]  ;;  %v4381_v48 = vld [vmem:[%s4993_s8 + $0x58c] sm:$0xf0] }
 0x1aa   : > { %2680 = vmatpush.bf16.xpose.msra.mxu1 %v4004_v63  ;;  %2693 = vmatpush.bf16.xpose.msra.mxu2 %v4008_v0  ;;  %v5255_v63 = vld [vmem:[#allocation1 + $0x36] sm:$0xff]  ;;  %v5257_v0 = vld [vmem:[#allocation1 + $0x3f] sm:$0xff] }
 0x1ab   : > { %2706 = vmatpush.bf16.xpose.msra.mxu3 %v4012_v2  ;;  %2643 = vmatmul.bf16.vlgmr.msrb.gmra.mxu2 %v5210_v46  ;;  %v3633_v46 = vld [vmem:[%s4993_s8 + $0x260] sm:$0xf0]  ;;  %906 = vst [vmem:[#allocation1] ss:$9 sm:$0xff] %v633_v1  ;;  %v4031_v2 = vld [vmem:[%s4993_s8 + $0x3f0] sm:$0xf] }
 0x1ac   : > { %2656 = vmatmul.bf16.vlgmr.msrb.gmra.mxu3 %v5212_v47  ;;  %v3624_v47 = vor.u32 %v4278_v40, %v3623_v39  ;;  %v3636_v60 = vor.u32 %v4230_v51, %v3633_v46  ;;  %v4032_v15 = vor.u32 %v4378_v3, %v4031_v2  ;;  %v4380_v39 = vld [vmem:[%s4993_s8 + $0x584] sm:$0xf0]  ;;  %v4331_v40 = vld [vmem:[%s4993_s8 + $0x404] sm:$0xf]  ;;  %v3663_v1 = vld [vmem:[%s4993_s8 + $0xf8] sm:$0xf] }
 0x1ad   : > { %v2204_v45 = vpop.f32.mrf.mxu0 }
 0x1ae   : > { %v2228_v42 = vpop.f32.mrf.mxu2  ;;  %v2217_v52 = vpop.f32.mrf.mxu1  ;;  %v4057_v45 = vld [vmem:[%s4993_s8 + $0x590] sm:$0xf0] }
 0x1af   : > { %v2229_v49 = vadd.f32 %v2228_v42, %v2216_v37  ;;  %v2241_v50 = vpop.f32.mrf.mxu3  ;;  %v3652_v37 = vor.u32 %v4232_v30, %v3649_v31  ;;  %v4049_v42 = vld [vmem:[%s4993_s8 + $0x588] sm:$0xf0] }
 0x1b1   : > { %2668 = vmatpush.bf16.xpose.msra.mxu0 %v3608_v16  ;;  %v2242_v53 = vadd.f32 %v2241_v50, %v2229_v49  ;;  %v4036_v16 = vor.u32 %v4329_v4, %v4033_v6  ;;  %v4332_v50 = vld [vmem:[%s4993_s8 + $0x40c] sm:$0xf]  ;;  %v4234_v4 = vld [vmem:[%s4993_s8 + $0xfc] sm:$0xf] }
 0x1b2   : > { %2681 = vmatpush.bf16.xpose.msra.mxu1 %v3612_v18  ;;  %2694 = vmatpush.bf16.xpose.msra.mxu2 %v3616_v19  ;;  %v4044_v19 = vor.u32 %v4330_v11, %v4041_v12  ;;  %v907_v7 = vld [vmem:[#allocation1] sm:$0xff]  ;;  %v908_v8 = vld [vmem:[#allocation1 + $0x9] sm:$0xff] }
 0x1b3   : > { %2707 = vmatpush.bf16.xpose.msra.mxu3 %v3620_v20  ;;  %v3639_v20 = vld [vmem:[%s4993_s8 + $0xe0] sm:$0xf]  ;;  %v910_v12 = vld [vmem:[#allocation1 + $0x1b] sm:$0xff] }
 0x1b4   : > { %v3640_v32 = vor.u32 %v4280_v21, %v3639_v20  ;;  %v4382_v20 = vld [vmem:[%s4993_s8 + $0x594] sm:$0xf0]  ;;  %v4333_v21 = vld [vmem:[%s4993_s8 + $0x414] sm:$0xf] }
 0x1b5   : > { %v2254_v10 = vpop.f32.mrf.mxu0 }
 0x1b6   : > { %v2230_v5 = vpop.f32.mrf.mxu2  ;;  %v2255_v13 = vadd.f32 %v2254_v10, %v2242_v53  ;;  %v2267_v14 = vpop.f32.mrf.mxu1  ;;  %v4056_v53 = vor.u32 %v4381_v48, %v4055_v43  ;;  %v4285_v43 = vld [vmem:[%s4993_s8 + $0x28c] sm:$0xf0] }
 0x1b7   : > { %v2243_v9 = vpop.f32.mrf.mxu3 }
 0x1b8   : > { %v2268_v18 = vadd.f32 %v2267_v14, %v2255_v13  ;;  %2669 = vmatmul.bf16.vlgmr.msra.gmra.mxu0 %v897_v54  ;;  %v909_v9 = vld [vmem:[#allocation1 + $0x12] sm:$0xff]  ;;  %v5296_v14 = vld [vmem:[#allocation1 + $0x24] sm:$0xff] }
 0x1b9   : > { %2719 = vmatpush.bf16.xpose.msrb.mxu0 %v4016_v35  ;;  %2682 = vmatmul.bf16.vlgmr.msra.gmra.mxu1 %v898_v55  ;;  %v4060_v55 = vor.u32 %v4332_v50, %v4057_v45  ;;  %v4236_v50 = vld [vmem:[%s4993_s8 + $0x10c] sm:$0xf]  ;;  %v3681_v45 = vld [vmem:[%s4993_s8 + $0x290] sm:$0xf0] }
 0x1ba   : > { %2732 = vmatpush.bf16.xpose.msrb.mxu1 %v4020_v33  ;;  %2745 = vmatpush.bf16.xpose.msrb.mxu2 %v4024_v36  ;;  %v3644_v33 = vor.u32 %v4231_v22, %v3641_v24  ;;  %v3648_v36 = vor.u32 %v4281_v26, %v3647_v25  ;;  %v4071_v24 = vld [vmem:[%s4993_s8 + $0x418] sm:$0xf]  ;;  %v4383_v25 = vld [vmem:[%s4993_s8 + $0x59c] sm:$0xf0] }
 0x1bb   : > { %2758 = vmatpush.bf16.xpose.msrb.mxu3 %v4028_v38  ;;  %2695 = vmatmul.bf16.vlgmr.msra.gmra.mxu2 %v899_v56  ;;  %v4047_v38 = vld [vmem:[%s4993_s8 + $0x400] sm:$0xf]  ;;  %v3655_v56 = vld [vmem:[%s4993_s8 + $0xf0] sm:$0xf] }
 0x1bc   : > { %2708 = vmatmul.bf16.vlgmr.msra.gmra.mxu3 %v900_v59  ;;  %v4048_v52 = vor.u32 %v4380_v39, %v4047_v38  ;;  %v4284_v38 = vld [vmem:[%s4993_s8 + $0x284] sm:$0xf0]  ;;  %v4235_v39 = vld [vmem:[%s4993_s8 + $0x104] sm:$0xf] }
 0x1bd   : > { %v2256_v29 = vpop.f32.mrf.mxu0 }
 0x1be   : > { %v2280_v23 = vpop.f32.mrf.mxu2  ;;  %v2269_v34 = vpop.f32.mrf.mxu1  ;;  %v4073_v29 = vld [vmem:[%s4993_s8 + $0x5a0] sm:$0xf0] }
 0x1bf   : > { %v2281_v27 = vadd.f32 %v2280_v23, %v2268_v18  ;;  %v2293_v28 = vpop.f32.mrf.mxu3  ;;  %v634_v18 = vld [vmem:[%s4991_s7 + $0x40] sm:$0xff] }
 0x1c0   : > { %v4065_v23 = vld [vmem:[%s4993_s8 + $0x598] sm:$0xf0] }
 0x1c1   : > { %2720 = vmatpush.bf16.xpose.msrb.mxu0 %v3624_v47  ;;  %v2294_v35 = vadd.f32 %v2293_v28, %v2281_v27  ;;  %v4052_v47 = vor.u32 %v4331_v40, %v4049_v42  ;;  %v4334_v28 = vld [vmem:[%s4993_s8 + $0x41c] sm:$0xf]  ;;  %v3679_v42 = vld [vmem:[%s4993_s8 + $0x108] sm:$0xf] }
 0x1c2   : > { %2733 = vmatpush.bf16.xpose.msrb.mxu1 %v3628_v57  ;;  %2746 = vmatpush.bf16.xpose.msrb.mxu2 %v3632_v58  ;;  %v4282_v57 = vld [vmem:[%s4993_s8 + $0x274] sm:$0xf0]  ;;  %v4233_v58 = vld [vmem:[%s4993_s8 + $0xf4] sm:$0xf] }
 0x1c3   : > { %2759 = vmatpush.bf16.xpose.msrb.mxu3 %v3636_v60  ;;  %v3657_v60 = vld [vmem:[%s4993_s8 + $0x278] sm:$0xf0] }
 0x1c4   : > { %v3660_v10 = vor.u32 %v4233_v58, %v3657_v60  ;;  %v4087_v60 = vld [vmem:[%s4993_s8 + $0x428] sm:$0xf] }
 0x1c5   : > { %v2306_v49 = vpop.f32.mrf.mxu0 }
 0x1c6   : > { %v2282_v41 = vpop.f32.mrf.mxu2  ;;  %v2307_v51 = vadd.f32 %v2306_v49, %v2294_v35  ;;  %v2319_v46 = vpop.f32.mrf.mxu1  ;;  %v4072_v35 = vor.u32 %v4383_v25, %v4071_v24 }
 0x1c7   : > { %v2295_v44 = vpop.f32.mrf.mxu3  ;;  %v3673_v41 = vld [vmem:[%s4993_s8 + $0x288] sm:$0xf0] }
 0x1c8   : > { %v2320_v54 = vadd.f32 %v2319_v46, %v2307_v51  ;;  %2721 = vmatmul.bf16.vlgmr.msrb.gmra.mxu0 %v5251_v61  ;;  %v4283_v61 = vld [vmem:[%s4993_s8 + $0x27c] sm:$0xf0] }
 0x1c9   : > { %2771 = vmatpush.bf16.xpose.msra.mxu0 %v4032_v15  ;;  %2734 = vmatmul.bf16.vlgmr.msrb.gmra.mxu1 %v5253_v62  ;;  %v3664_v11 = vor.u32 %v4283_v61, %v3663_v1  ;;  %v5298_v15 = vld [vmem:[#allocation1 + $0x2d] sm:$0xff]  ;;  %v4385_v1 = vld [vmem:[%s4993_s8 + $0x5ac] sm:$0xf0] }
 0x1ca   : > { %2784 = vmatpush.bf16.xpose.msra.mxu1 %v4036_v16  ;;  %2797 = vmatpush.bf16.xpose.msra.mxu2 %v4040_v17  ;;  %v5300_v16 = vld [vmem:[#allocation1 + $0x36] sm:$0xff]  ;;  %v5302_v17 = vld [vmem:[#allocation1 + $0x3f] sm:$0xff] }
 0x1cb   : > { %2810 = vmatpush.bf16.xpose.msra.mxu3 %v4044_v19  ;;  %2747 = vmatmul.bf16.vlgmr.msrb.gmra.mxu2 %v5255_v63  ;;  %v3665_v63 = vld [vmem:[%s4993_s8 + $0x280] sm:$0xf0]  ;;  %916 = vst [vmem:[#allocation1] ss:$9 sm:$0xff] %v634_v18  ;;  %v4063_v19 = vld [vmem:[%s4993_s8 + $0x410] sm:$0xf] }
 0x1cc   : > { %2760 = vmatmul.bf16.vlgmr.msrb.gmra.mxu3 %v5257_v0  ;;  %v3656_v0 = vor.u32 %v4282_v57, %v3655_v56  ;;  %v3668_v13 = vor.u32 %v4234_v4, %v3665_v63  ;;  %v4064_v34 = vor.u32 %v4382_v20, %v4063_v19  ;;  %v4384_v56 = vld [vmem:[%s4993_s8 + $0x5a4] sm:$0xf0]  ;;  %v4335_v57 = vld [vmem:[%s4993_s8 + $0x424] sm:$0xf]  ;;  %v3695_v18 = vld [vmem:[%s4993_s8 + $0x118] sm:$0xf] }
 0x1cd   : > { %v2308_v62 = vpop.f32.mrf.mxu0 }
 0x1ce   : > { %v2332_v59 = vpop.f32.mrf.mxu2  ;;  %v2321_v5 = vpop.f32.mrf.mxu1  ;;  %v4089_v62 = vld [vmem:[%s4993_s8 + $0x5b0] sm:$0xf0] }
 0x1cf   : > { %v2333_v2 = vadd.f32 %v2332_v59, %v2320_v54  ;;  %v2345_v3 = vpop.f32.mrf.mxu3  ;;  %v3684_v54 = vor.u32 %v4236_v50, %v3681_v45  ;;  %v4081_v59 = vld [vmem:[%s4993_s8 + $0x5a8] sm:$0xf0] }
 0x1d1   : > { %2772 = vmatpush.bf16.xpose.msra.mxu0 %v3640_v32  ;;  %v2346_v6 = vadd.f32 %v2345_v3, %v2333_v2  ;;  %v4068_v32 = vor.u32 %v4333_v21, %v4065_v23  ;;  %v4336_v3 = vld [vmem:[%s4993_s8 + $0x42c] sm:$0xf]  ;;  %v4238_v21 = vld [vmem:[%s4993_s8 + $0x11c] sm:$0xf] }
 0x1d2   : > { %2785 = vmatpush.bf16.xpose.msra.mxu1 %v3644_v33  ;;  %2798 = vmatpush.bf16.xpose.msra.mxu2 %v3648_v36  ;;  %v4076_v36 = vor.u32 %v4334_v28, %v4073_v29  ;;  %v917_v24 = vld [vmem:[#allocation1] sm:$0xff]  ;;  %v918_v25 = vld [vmem:[#allocation1 + $0x9] sm:$0xff] }
 0x1d3   : > { %2811 = vmatpush.bf16.xpose.msra.mxu3 %v3652_v37  ;;  %v3671_v37 = vld [vmem:[%s4993_s8 + $0x100] sm:$0xf]  ;;  %v920_v29 = vld [vmem:[#allocation1 + $0x1b] sm:$0xff] }
 0x1d4   : > { %v3672_v46 = vor.u32 %v4284_v38, %v3671_v37  ;;  %v4386_v37 = vld [vmem:[%s4993_s8 + $0x5b4] sm:$0xf0]  ;;  %v4337_v38 = vld [vmem:[%s4993_s8 + $0x434] sm:$0xf] }
 0x1d5   : > { %v2358_v27 = vpop.f32.mrf.mxu0 }
 0x1d6   : > { %v2334_v22 = vpop.f32.mrf.mxu2  ;;  %v2359_v30 = vadd.f32 %v2358_v27, %v2346_v6  ;;  %v2371_v31 = vpop.f32.mrf.mxu1  ;;  %v4088_v6 = vor.u32 %v4385_v1, %v4087_v60  ;;  %v4289_v60 = vld [vmem:[%s4993_s8 + $0x2ac] sm:$0xf0] }
 0x1d7   : > { %v2347_v26 = vpop.f32.mrf.mxu3 }
 0x1d8   : > { %v2372_v33 = vadd.f32 %v2371_v31, %v2359_v30  ;;  %2773 = vmatmul.bf16.vlgmr.msra.gmra.mxu0 %v907_v7  ;;  %v919_v26 = vld [vmem:[#allocation1 + $0x12] sm:$0xff]  ;;  %v5341_v31 = vld [vmem:[#allocation1 + $0x24] sm:$0xff] }
 0x1d9   : > { %2823 = vmatpush.bf16.xpose.msrb.mxu0 %v4048_v52  ;;  %2786 = vmatmul.bf16.vlgmr.msra.gmra.mxu1 %v908_v8  ;;  %v4092_v8 = vor.u32 %v4336_v3, %v4089_v62  ;;  %v4240_v3 = vld [vmem:[%s4993_s8 + $0x12c] sm:$0xf]  ;;  %v3713_v62 = vld [vmem:[%s4993_s8 + $0x2b0] sm:$0xf0] }
 0x1da   : > { %2836 = vmatpush.bf16.xpose.msrb.mxu1 %v4052_v47  ;;  %2849 = vmatpush.bf16.xpose.msrb.mxu2 %v4056_v53  ;;  %v3676_v47 = vor.u32 %v4235_v39, %v3673_v41  ;;  %v3680_v53 = vor.u32 %v4285_v43, %v3679_v42  ;;  %v4103_v41 = vld [vmem:[%s4993_s8 + $0x438] sm:$0xf]  ;;  %v4387_v42 = vld [vmem:[%s4993_s8 + $0x5bc] sm:$0xf0] }
 0x1db   : > { %2862 = vmatpush.bf16.xpose.msrb.mxu3 %v4060_v55  ;;  %2799 = vmatmul.bf16.vlgmr.msra.gmra.mxu2 %v909_v9  ;;  %v4079_v55 = vld [vmem:[%s4993_s8 + $0x420] sm:$0xf]  ;;  %v3687_v9 = vld [vmem:[%s4993_s8 + $0x110] sm:$0xf] }
 0x1dc   : > { %2812 = vmatmul.bf16.vlgmr.msra.gmra.mxu3 %v910_v12  ;;  %v4080_v5 = vor.u32 %v4384_v56, %v4079_v55  ;;  %v4288_v55 = vld [vmem:[%s4993_s8 + $0x2a4] sm:$0xf0]  ;;  %v4239_v56 = vld [vmem:[%s4993_s8 + $0x124] sm:$0xf] }
 0x1dd   : > { %v2360_v49 = vpop.f32.mrf.mxu0 }
 0x1de   : > { %v2384_v40 = vpop.f32.mrf.mxu2  ;;  %v2373_v51 = vpop.f32.mrf.mxu1  ;;  %v4105_v49 = vld [vmem:[%s4993_s8 + $0x5c0] sm:$0xf0] }
 0x1df   : > { %v2385_v48 = vadd.f32 %v2384_v40, %v2372_v33  ;;  %v2397_v44 = vpop.f32.mrf.mxu3  ;;  %v635_v33 = vld [vmem:[%s4991_s7 + $0x48] sm:$0xff] }
 0x1e0   : > { %v4097_v40 = vld [vmem:[%s4993_s8 + $0x5b8] sm:$0xf0] }
 0x1e1   : > { %2824 = vmatpush.bf16.xpose.msrb.mxu0 %v3656_v0  ;;  %v2398_v52 = vadd.f32 %v2397_v44, %v2385_v48  ;;  %v4084_v0 = vor.u32 %v4335_v57, %v4081_v59  ;;  %v4338_v44 = vld [vmem:[%s4993_s8 + $0x43c] sm:$0xf]  ;;  %v3711_v59 = vld [vmem:[%s4993_s8 + $0x128] sm:$0xf] }
 0x1e2   : > { %2837 = vmatpush.bf16.xpose.msrb.mxu1 %v3660_v10  ;;  %2850 = vmatpush.bf16.xpose.msrb.mxu2 %v3664_v11  ;;  %v4286_v10 = vld [vmem:[%s4993_s8 + $0x294] sm:$0xf0]  ;;  %v4237_v11 = vld [vmem:[%s4993_s8 + $0x114] sm:$0xf] }
 0x1e3   : > { %2863 = vmatpush.bf16.xpose.msrb.mxu3 %v3668_v13  ;;  %v3689_v13 = vld [vmem:[%s4993_s8 + $0x298] sm:$0xf0] }
 0x1e4   : > { %v3692_v27 = vor.u32 %v4237_v11, %v3689_v13  ;;  %v4119_v13 = vld [vmem:[%s4993_s8 + $0x448] sm:$0xf] }
 0x1e5   : > { %v2410_v2 = vpop.f32.mrf.mxu0 }
 0x1e6   : > { %v2386_v58 = vpop.f32.mrf.mxu2  ;;  %v2411_v4 = vadd.f32 %v2410_v2, %v2398_v52  ;;  %v2423_v63 = vpop.f32.mrf.mxu1  ;;  %v4104_v52 = vor.u32 %v4387_v42, %v4103_v41 }
 0x1e7   : > { %v2399_v61 = vpop.f32.mrf.mxu3  ;;  %v3705_v58 = vld [vmem:[%s4993_s8 + $0x2a8] sm:$0xf0] }
 0x1e8   : > { %v2424_v7 = vadd.f32 %v2423_v63, %v2411_v4  ;;  %2825 = vmatmul.bf16.vlgmr.msrb.gmra.mxu0 %v5296_v14  ;;  %v4287_v14 = vld [vmem:[%s4993_s8 + $0x29c] sm:$0xf0] }
 0x1e9   : > { %2875 = vmatpush.bf16.xpose.msra.mxu0 %v4064_v34  ;;  %2838 = vmatmul.bf16.vlgmr.msrb.gmra.mxu1 %v5298_v15  ;;  %v3696_v28 = vor.u32 %v4287_v14, %v3695_v18  ;;  %v5343_v34 = vld [vmem:[#allocation1 + $0x2d] sm:$0xff]  ;;  %v4389_v18 = vld [vmem:[%s4993_s8 + $0x5cc] sm:$0xf0] }
 0x1ea   : > { %2888 = vmatpush.bf16.xpose.msra.mxu1 %v4068_v32  ;;  %2901 = vmatpush.bf16.xpose.msra.mxu2 %v4072_v35  ;;  %v5345_v32 = vld [vmem:[#allocation1 + $0x36] sm:$0xff]  ;;  %v5347_v35 = vld [vmem:[#allocation1 + $0x3f] sm:$0xff] }
 0x1eb   : > { %2914 = vmatpush.bf16.xpose.msra.mxu3 %v4076_v36  ;;  %2851 = vmatmul.bf16.vlgmr.msrb.gmra.mxu2 %v5300_v16  ;;  %v3697_v16 = vld [vmem:[%s4993_s8 + $0x2a0] sm:$0xf0]  ;;  %926 = vst [vmem:[#allocation1] ss:$9 sm:$0xff] %v635_v33  ;;  %v4095_v36 = vld [vmem:[%s4993_s8 + $0x430] sm:$0xf] }
 0x1ec   : > { %2864 = vmatmul.bf16.vlgmr.msrb.gmra.mxu3 %v5302_v17  ;;  %v3688_v17 = vor.u32 %v4286_v10, %v3687_v9  ;;  %v3700_v30 = vor.u32 %v4238_v21, %v3697_v16  ;;  %v4096_v51 = vor.u32 %v4386_v37, %v4095_v36  ;;  %v4388_v9 = vld [vmem:[%s4993_s8 + $0x5c4] sm:$0xf0]  ;;  %v4339_v10 = vld [vmem:[%s4993_s8 + $0x444] sm:$0xf]  ;;  %v3727_v33 = vld [vmem:[%s4993_s8 + $0x138] sm:$0xf] }
 0x1ed   : > { %v2412_v15 = vpop.f32.mrf.mxu0 }
 0x1ee   : > { %v2436_v12 = vpop.f32.mrf.mxu2  ;;  %v2425_v22 = vpop.f32.mrf.mxu1  ;;  %v4121_v15 = vld [vmem:[%s4993_s8 + $0x5d0] sm:$0xf0] }
 0x1ef   : > { %v2437_v19 = vadd.f32 %v2436_v12, %v2424_v7  ;;  %v2449_v20 = vpop.f32.mrf.mxu3  ;;  %v3716_v7 = vor.u32 %v4240_v3, %v3713_v62  ;;  %v4113_v12 = vld [vmem:[%s4993_s8 + $0x5c8] sm:$0xf0] }
 0x1f1   : > { %2876 = vmatpush.bf16.xpose.msra.mxu0 %v3672_v46  ;;  %v2450_v23 = vadd.f32 %v2449_v20, %v2437_v19  ;;  %v4100_v46 = vor.u32 %v4337_v38, %v4097_v40  ;;  %v4340_v20 = vld [vmem:[%s4993_s8 + $0x44c] sm:$0xf]  ;;  %v4242_v38 = vld [vmem:[%s4993_s8 + $0x13c] sm:$0xf] }
 0x1f2   : > { %2889 = vmatpush.bf16.xpose.msra.mxu1 %v3676_v47  ;;  %2902 = vmatpush.bf16.xpose.msra.mxu2 %v3680_v53  ;;  %v4108_v53 = vor.u32 %v4338_v44, %v4105_v49  ;;  %v927_v41 = vld [vmem:[#allocation1] sm:$0xff]  ;;  %v928_v42 = vld [vmem:[#allocation1 + $0x9] sm:$0xff] }
 0x1f3   : > { %2915 = vmatpush.bf16.xpose.msra.mxu3 %v3684_v54  ;;  %v3703_v54 = vld [vmem:[%s4993_s8 + $0x120] sm:$0xf]  ;;  %v930_v49 = vld [vmem:[#allocation1 + $0x1b] sm:$0xff] }
 0x1f4   : > { %v3704_v63 = vor.u32 %v4288_v55, %v3703_v54  ;;  %v4390_v54 = vld [vmem:[%s4993_s8 + $0x5d4] sm:$0xf0]  ;;  %v4341_v55 = vld [vmem:[%s4993_s8 + $0x454] sm:$0xf] }
 0x1f5   : > { %v2462_v48 = vpop.f32.mrf.mxu0 }
 0x1f6   : > { %v2438_v39 = vpop.f32.mrf.mxu2  ;;  %v2463_v50 = vadd.f32 %v2462_v48, %v2450_v23  ;;  %v2475_v45 = vpop.f32.mrf.mxu1  ;;  %v4120_v23 = vor.u32 %v4389_v18, %v4119_v13  ;;  %v4293_v13 = vld [vmem:[%s4993_s8 + $0x2cc] sm:$0xf0] }
 0x1f7   : > { %v2451_v43 = vpop.f32.mrf.mxu3 }
 0x1f8   : > { %v2476_v47 = vadd.f32 %v2475_v45, %v2463_v50  ;;  %2877 = vmatmul.bf16.vlgmr.msra.gmra.mxu0 %v917_v24  ;;  %v929_v43 = vld [vmem:[#allocation1 + $0x12] sm:$0xff]  ;;  %v5386_v45 = vld [vmem:[#allocation1 + $0x24] sm:$0xff] }
 0x1f9   : > { %2927 = vmatpush.bf16.xpose.msrb.mxu0 %v4080_v5  ;;  %2890 = vmatmul.bf16.vlgmr.msra.gmra.mxu1 %v918_v25  ;;  %v4124_v25 = vor.u32 %v4340_v20, %v4121_v15  ;;  %v4244_v20 = vld [vmem:[%s4993_s8 + $0x14c] sm:$0xf]  ;;  %v3745_v15 = vld [vmem:[%s4993_s8 + $0x2d0] sm:$0xf0] }
 0x1fa   : > { %2940 = vmatpush.bf16.xpose.msrb.mxu1 %v4084_v0  ;;  %2953 = vmatpush.bf16.xpose.msrb.mxu2 %v4088_v6  ;;  %v3708_v0 = vor.u32 %v4239_v56, %v3705_v58  ;;  %v3712_v6 = vor.u32 %v4289_v60, %v3711_v59  ;;  %v4135_v58 = vld [vmem:[%s4993_s8 + $0x458] sm:$0xf]  ;;  %v4391_v59 = vld [vmem:[%s4993_s8 + $0x5dc] sm:$0xf0] }
 0x1fb   : > { %2966 = vmatpush.bf16.xpose.msrb.mxu3 %v4092_v8  ;;  %2903 = vmatmul.bf16.vlgmr.msra.gmra.mxu2 %v919_v26  ;;  %v4111_v8 = vld [vmem:[%s4993_s8 + $0x440] sm:$0xf]  ;;  %v3719_v26 = vld [vmem:[%s4993_s8 + $0x130] sm:$0xf] }
 0x1fc   : > { %2916 = vmatmul.bf16.vlgmr.msra.gmra.mxu3 %v920_v29  ;;  %v4112_v22 = vor.u32 %v4388_v9, %v4111_v8  ;;  %v4292_v8 = vld [vmem:[%s4993_s8 + $0x2c4] sm:$0xf0]  ;;  %v4243_v9 = vld [vmem:[%s4993_s8 + $0x144] sm:$0xf] }
 0x1fd   : > { %v2464_v2 = vpop.f32.mrf.mxu0 }
 0x1fe   : > { %v2488_v57 = vpop.f32.mrf.mxu2  ;;  %v2477_v4 = vpop.f32.mrf.mxu1  ;;  %v4137_v2 = vld [vmem:[%s4993_s8 + $0x5e0] sm:$0xf0] }
 0x1ff   : > { %v2489_v1 = vadd.f32 %v2488_v57, %v2476_v47  ;;  %v2501_v61 = vpop.f32.mrf.mxu3  ;;  %v636_v47 = vld [vmem:[%s4991_s7 + $0x50] sm:$0xff]  ;;  %v4129_v57 = vld [vmem:[%s4993_s8 + $0x5d8] sm:$0xf0] }
 0x201   : > { %2928 = vmatpush.bf16.xpose.msrb.mxu0 %v3688_v17  ;;  %v2502_v5 = vadd.f32 %v2501_v61, %v2489_v1  ;;  %v4116_v17 = vor.u32 %v4339_v10, %v4113_v12  ;;  %v4342_v61 = vld [vmem:[%s4993_s8 + $0x45c] sm:$0xf]  ;;  %v3743_v12 = vld [vmem:[%s4993_s8 + $0x148] sm:$0xf] }
 0x202   : > { %2941 = vmatpush.bf16.xpose.msrb.mxu1 %v3692_v27  ;;  %2954 = vmatpush.bf16.xpose.msrb.mxu2 %v3696_v28  ;;  %v4290_v27 = vld [vmem:[%s4993_s8 + $0x2b4] sm:$0xf0]  ;;  %v4241_v28 = vld [vmem:[%s4993_s8 + $0x134] sm:$0xf] }
 0x203   : > { %2967 = vmatpush.bf16.xpose.msrb.mxu3 %v3700_v30  ;;  %v3721_v30 = vld [vmem:[%s4993_s8 + $0x2b8] sm:$0xf0] }
 0x204   : > { %v3724_v48 = vor.u32 %v4241_v28, %v3721_v30  ;;  %v4151_v30 = vld [vmem:[%s4993_s8 + $0x468] sm:$0xf] }
 0x205   : > { %v2514_v19 = vpop.f32.mrf.mxu0 }
 0x206   : > { %v2490_v11 = vpop.f32.mrf.mxu2  ;;  %v2515_v21 = vadd.f32 %v2514_v19, %v2502_v5  ;;  %v2527_v16 = vpop.f32.mrf.mxu1  ;;  %v4136_v5 = vor.u32 %v4391_v59, %v4135_v58 }
 0x207   : > { %v2503_v14 = vpop.f32.mrf.mxu3  ;;  %v3737_v11 = vld [vmem:[%s4993_s8 + $0x2c8] sm:$0xf0] }
 0x208   : > { %v2528_v24 = vadd.f32 %v2527_v16, %v2515_v21  ;;  %2929 = vmatmul.bf16.vlgmr.msrb.gmra.mxu0 %v5341_v31  ;;  %v4291_v31 = vld [vmem:[%s4993_s8 + $0x2bc] sm:$0xf0] }
 0x209   : > { %2979 = vmatpush.bf16.xpose.msra.mxu0 %v4096_v51  ;;  %2942 = vmatmul.bf16.vlgmr.msrb.gmra.mxu1 %v5343_v34  ;;  %v3728_v44 = vor.u32 %v4291_v31, %v3727_v33  ;;  %v5388_v51 = vld [vmem:[#allocation1 + $0x2d] sm:$0xff]  ;;  %v4393_v33 = vld [vmem:[%s4993_s8 + $0x5ec] sm:$0xf0] }
 0x20a   : > { %2992 = vmatpush.bf16.xpose.msra.mxu1 %v4100_v46  ;;  %3005 = vmatpush.bf16.xpose.msra.mxu2 %v4104_v52  ;;  %v5390_v46 = vld [vmem:[#allocation1 + $0x36] sm:$0xff]  ;;  %v5392_v52 = vld [vmem:[#allocation1 + $0x3f] sm:$0xff] }
 0x20b   : > { %3018 = vmatpush.bf16.xpose.msra.mxu3 %v4108_v53  ;;  %2955 = vmatmul.bf16.vlgmr.msrb.gmra.mxu2 %v5345_v32  ;;  %v3729_v32 = vld [vmem:[%s4993_s8 + $0x2c0] sm:$0xf0]  ;;  %936 = vst [vmem:[#allocation1] ss:$9 sm:$0xff] %v636_v47  ;;  %v4127_v53 = vld [vmem:[%s4993_s8 + $0x450] sm:$0xf] }
 0x20c   : > { %2968 = vmatmul.bf16.vlgmr.msrb.gmra.mxu3 %v5347_v35  ;;  %v3720_v35 = vor.u32 %v4290_v27, %v3719_v26  ;;  %v3732_v50 = vor.u32 %v4242_v38, %v3729_v32  ;;  %v4128_v4 = vor.u32 %v4390_v54, %v4127_v53  ;;  %v4392_v26 = vld [vmem:[%s4993_s8 + $0x5e4] sm:$0xf0]  ;;  %v4343_v27 = vld [vmem:[%s4993_s8 + $0x464] sm:$0xf]  ;;  %v3759_v47 = vld [vmem:[%s4993_s8 + $0x158] sm:$0xf] }
 0x20d   : > { %v2516_v34 = vpop.f32.mrf.mxu0 }
 0x20e   : > { %v2540_v29 = vpop.f32.mrf.mxu2  ;;  %v2529_v39 = vpop.f32.mrf.mxu1  ;;  %v4153_v34 = vld [vmem:[%s4993_s8 + $0x5f0] sm:$0xf0] }
 0x20f   : > { %v2541_v36 = vadd.f32 %v2540_v29, %v2528_v24  ;;  %v2553_v37 = vpop.f32.mrf.mxu3  ;;  %v3748_v24 = vor.u32 %v4244_v20, %v3745_v15  ;;  %v4145_v29 = vld [vmem:[%s4993_s8 + $0x5e8] sm:$0xf0] }
 0x211   : > { %2980 = vmatpush.bf16.xpose.msra.mxu0 %v3704_v63  ;;  %v2554_v40 = vadd.f32 %v2553_v37, %v2541_v36  ;;  %v4132_v63 = vor.u32 %v4341_v55, %v4129_v57  ;;  %v4344_v37 = vld [vmem:[%s4993_s8 + $0x46c] sm:$0xf]  ;;  %v4246_v55 = vld [vmem:[%s4993_s8 + $0x15c] sm:$0xf] }
 0x212   : > { %2993 = vmatpush.bf16.xpose.msra.mxu1 %v3708_v0  ;;  %3006 = vmatpush.bf16.xpose.msra.mxu2 %v3712_v6  ;;  %v4140_v6 = vor.u32 %v4342_v61, %v4137_v2  ;;  %v937_v58 = vld [vmem:[#allocation1] sm:$0xff]  ;;  %v938_v59 = vld [vmem:[#allocation1 + $0x9] sm:$0xff] }
 0x213   : > { %3019 = vmatpush.bf16.xpose.msra.mxu3 %v3716_v7  ;;  %v3735_v7 = vld [vmem:[%s4993_s8 + $0x140] sm:$0xf]  ;;  %v940_v2 = vld [vmem:[#allocation1 + $0x1b] sm:$0xff] }
 0x214   : > { %v3736_v16 = vor.u32 %v4292_v8, %v3735_v7  ;;  %v4394_v7 = vld [vmem:[%s4993_s8 + $0x5f4] sm:$0xf0]  ;;  %v4345_v8 = vld [vmem:[%s4993_s8 + $0x474] sm:$0xf] }
 0x215   : > { %v2566_v1 = vpop.f32.mrf.mxu0 }
 0x216   : > { %v2542_v56 = vpop.f32.mrf.mxu2  ;;  %v2567_v3 = vadd.f32 %v2566_v1, %v2554_v40  ;;  %v2579_v62 = vpop.f32.mrf.mxu1  ;;  %v4152_v40 = vor.u32 %v4393_v33, %v4151_v30  ;;  %v4297_v30 = vld [vmem:[%s4993_s8 + $0x2ec] sm:$0xf0] }
 0x217   : > { %v2555_v60 = vpop.f32.mrf.mxu3 }
 0x218   : > { %v2580_v0 = vadd.f32 %v2579_v62, %v2567_v3  ;;  %2981 = vmatmul.bf16.vlgmr.msra.gmra.mxu0 %v927_v41  ;;  %v939_v60 = vld [vmem:[#allocation1 + $0x12] sm:$0xff]  ;;  %v5431_v62 = vld [vmem:[#allocation1 + $0x24] sm:$0xff] }
 0x219   : > { %3031 = vmatpush.bf16.xpose.msrb.mxu0 %v4112_v22  ;;  %2994 = vmatmul.bf16.vlgmr.msra.gmra.mxu1 %v928_v42  ;;  %v4156_v42 = vor.u32 %v4344_v37, %v4153_v34  ;;  %v4248_v37 = vld [vmem:[%s4993_s8 + $0x16c] sm:$0xf]  ;;  %v3777_v34 = vld [vmem:[%s4993_s8 + $0x2f0] sm:$0xf0] }
 0x21a   : > { %3044 = vmatpush.bf16.xpose.msrb.mxu1 %v4116_v17  ;;  %3057 = vmatpush.bf16.xpose.msrb.mxu2 %v4120_v23  ;;  %v3740_v17 = vor.u32 %v4243_v9, %v3737_v11  ;;  %v3744_v23 = vor.u32 %v4293_v13, %v3743_v12  ;;  %v4167_v11 = vld [vmem:[%s4993_s8 + $0x478] sm:$0xf]  ;;  %v4395_v12 = vld [vmem:[%s4993_s8 + $0x5fc] sm:$0xf0] }
 0x21b   : > { %3070 = vmatpush.bf16.xpose.msrb.mxu3 %v4124_v25  ;;  %3007 = vmatmul.bf16.vlgmr.msra.gmra.mxu2 %v929_v43  ;;  %v4143_v25 = vld [vmem:[%s4993_s8 + $0x460] sm:$0xf]  ;;  %v3751_v43 = vld [vmem:[%s4993_s8 + $0x150] sm:$0xf] }
 0x21c   : > { %3020 = vmatmul.bf16.vlgmr.msra.gmra.mxu3 %v930_v49  ;;  %v4144_v39 = vor.u32 %v4392_v26, %v4143_v25  ;;  %v4296_v25 = vld [vmem:[%s4993_s8 + $0x2e4] sm:$0xf0]  ;;  %v4247_v26 = vld [vmem:[%s4993_s8 + $0x164] sm:$0xf] }
 0x21d   : > { %v2568_v19 = vpop.f32.mrf.mxu0 }
 0x21e   : > { %v2592_v10 = vpop.f32.mrf.mxu2  ;;  %v2581_v21 = vpop.f32.mrf.mxu1  ;;  %v4169_v19 = vld [vmem:[%s4993_s8 + $0x600] sm:$0xf0] }
 0x21f   : > { %v2593_v18 = vadd.f32 %v2592_v10, %v2580_v0  ;;  %v2605_v14 = vpop.f32.mrf.mxu3  ;;  %v637_v0 = vld [vmem:[%s4991_s7 + $0x58] sm:$0xff]  ;;  %v4161_v10 = vld [vmem:[%s4993_s8 + $0x5f8] sm:$0xf0] }
 0x221   : > { %3032 = vmatpush.bf16.xpose.msrb.mxu0 %v3720_v35  ;;  %v2606_v22 = vadd.f32 %v2605_v14, %v2593_v18  ;;  %v4148_v35 = vor.u32 %v4343_v27, %v4145_v29  ;;  %v4346_v14 = vld [vmem:[%s4993_s8 + $0x47c] sm:$0xf]  ;;  %v3775_v29 = vld [vmem:[%s4993_s8 + $0x168] sm:$0xf] }
 0x222   : > { %3045 = vmatpush.bf16.xpose.msrb.mxu1 %v3724_v48  ;;  %3058 = vmatpush.bf16.xpose.msrb.mxu2 %v3728_v44  ;;  %v4294_v48 = vld [vmem:[%s4993_s8 + $0x2d4] sm:$0xf0]  ;;  %v4245_v44 = vld [vmem:[%s4993_s8 + $0x154] sm:$0xf] }
 0x223   : > { %3071 = vmatpush.bf16.xpose.msrb.mxu3 %v3732_v50  ;;  %v3753_v50 = vld [vmem:[%s4993_s8 + $0x2d8] sm:$0xf0] }
 0x224   : > { %v3756_v1 = vor.u32 %v4245_v44, %v3753_v50  ;;  %v4183_v50 = vld [vmem:[%s4993_s8 + $0x488] sm:$0xf] }
 0x225   : > { %v2618_v36 = vpop.f32.mrf.mxu0 }
 0x226   : > { %v2594_v28 = vpop.f32.mrf.mxu2  ;;  %v2619_v38 = vadd.f32 %v2618_v36, %v2606_v22  ;;  %v2631_v32 = vpop.f32.mrf.mxu1  ;;  %v4168_v22 = vor.u32 %v4395_v12, %v4167_v11 }
 0x227   : > { %v2607_v31 = vpop.f32.mrf.mxu3  ;;  %v3769_v28 = vld [vmem:[%s4993_s8 + $0x2e8] sm:$0xf0] }
 0x228   : > { %v2632_v41 = vadd.f32 %v2631_v32, %v2619_v38  ;;  %3033 = vmatmul.bf16.vlgmr.msrb.gmra.mxu0 %v5386_v45  ;;  %v4295_v45 = vld [vmem:[%s4993_s8 + $0x2dc] sm:$0xf0] }
 0x229   : > { %3083 = vmatpush.bf16.xpose.msra.mxu0 %v4128_v4  ;;  %3046 = vmatmul.bf16.vlgmr.msrb.gmra.mxu1 %v5388_v51  ;;  %v3760_v61 = vor.u32 %v4295_v45, %v3759_v47  ;;  %v5433_v4 = vld [vmem:[#allocation1 + $0x2d] sm:$0xff]  ;;  %v4397_v47 = vld [vmem:[%s4993_s8 + $0x60c] sm:$0xf0] }
 0x22a   : > { %3096 = vmatpush.bf16.xpose.msra.mxu1 %v4132_v63  ;;  %3109 = vmatpush.bf16.xpose.msra.mxu2 %v4136_v5  ;;  %v5435_v63 = vld [vmem:[#allocation1 + $0x36] sm:$0xff]  ;;  %v5437_v5 = vld [vmem:[#allocation1 + $0x3f] sm:$0xff] }
 0x22b   : > { %3122 = vmatpush.bf16.xpose.msra.mxu3 %v4140_v6  ;;  %3059 = vmatmul.bf16.vlgmr.msrb.gmra.mxu2 %v5390_v46  ;;  %v3761_v46 = vld [vmem:[%s4993_s8 + $0x2e0] sm:$0xf0]  ;;  %946 = vst [vmem:[#allocation1] ss:$9 sm:$0xff] %v637_v0  ;;  %v4159_v6 = vld [vmem:[%s4993_s8 + $0x470] sm:$0xf] }
 0x22c   : > { %3072 = vmatmul.bf16.vlgmr.msrb.gmra.mxu3 %v5392_v52  ;;  %v3752_v52 = vor.u32 %v4294_v48, %v3751_v43  ;;  %v3764_v3 = vor.u32 %v4246_v55, %v3761_v46  ;;  %v4160_v21 = vor.u32 %v4394_v7, %v4159_v6  ;;  %v4396_v43 = vld [vmem:[%s4993_s8 + $0x604] sm:$0xf0]  ;;  %v4347_v48 = vld [vmem:[%s4993_s8 + $0x484] sm:$0xf]  ;;  %v3791_v0 = vld [vmem:[%s4993_s8 + $0x178] sm:$0xf] }
 0x22d   : > { %v2620_v51 = vpop.f32.mrf.mxu0 }
 0x22e   : > { %v2644_v49 = vpop.f32.mrf.mxu2  ;;  %v2633_v56 = vpop.f32.mrf.mxu1  ;;  %v4185_v51 = vld [vmem:[%s4993_s8 + $0x610] sm:$0xf0] }
 0x22f   : > { %v2645_v53 = vadd.f32 %v2644_v49, %v2632_v41  ;;  %v2657_v54 = vpop.f32.mrf.mxu3  ;;  %v3780_v41 = vor.u32 %v4248_v37, %v3777_v34  ;;  %v4177_v49 = vld [vmem:[%s4993_s8 + $0x608] sm:$0xf0]  ;;  %v3799_v34 = vld [vmem:[%s4993_s8 + $0x180] sm:$0xf] }
 0x231   : > { %3084 = vmatpush.bf16.xpose.msra.mxu0 %v3736_v16  ;;  %v2658_v57 = vadd.f32 %v2657_v54, %v2645_v53  ;;  %v4164_v16 = vor.u32 %v4345_v8, %v4161_v10  ;;  %v4348_v54 = vld [vmem:[%s4993_s8 + $0x48c] sm:$0xf]  ;;  %v4250_v8 = vld [vmem:[%s4993_s8 + $0x17c] sm:$0xf] }
 0x232   : > { %3097 = vmatpush.bf16.xpose.msra.mxu1 %v3740_v17  ;;  %3110 = vmatpush.bf16.xpose.msra.mxu2 %v3744_v23  ;;  %v4172_v23 = vor.u32 %v4346_v14, %v4169_v19  ;;  %v948_v10 = vld [vmem:[#allocation1 + $0x9] sm:$0xff]  ;;  %v949_v11 = vld [vmem:[#allocation1 + $0x12] sm:$0xff] }
 0x233   : > { %3123 = vmatpush.bf16.xpose.msra.mxu3 %v3748_v24  ;;  %v3767_v24 = vld [vmem:[%s4993_s8 + $0x160] sm:$0xf] }
 0x234   : > { %v3768_v32 = vor.u32 %v4296_v25, %v3767_v24  ;;  %v4398_v24 = vld [vmem:[%s4993_s8 + $0x614] sm:$0xf0] }
 0x235   : > { %v2670_v18 = vpop.f32.mrf.mxu0 }
 0x236   : > { %v2646_v9 = vpop.f32.mrf.mxu2  ;;  %v2671_v20 = vadd.f32 %v2670_v18, %v2658_v57  ;;  %v2683_v15 = vpop.f32.mrf.mxu1  ;;  %v4184_v57 = vor.u32 %v4397_v47, %v4183_v50  ;;  %v950_v18 = vld [vmem:[#allocation1 + $0x1b] sm:$0xff] }
 0x237   : > { %v2659_v13 = vpop.f32.mrf.mxu3 }
 0x238   : > { %v2684_v17 = vadd.f32 %v2683_v15, %v2671_v20  ;;  %3085 = vmatmul.bf16.vlgmr.msra.gmra.mxu0 %v937_v58  ;;  %v951_v20 = vld [vmem:[#allocation1 + $0x24] sm:$0xff]  ;;  %v952_v15 = vld [vmem:[#allocation1 + $0x2d] sm:$0xff] }
 0x239   : > { %3135 = vmatpush.bf16.xpose.msrb.mxu0 %v4144_v39  ;;  %3098 = vmatmul.bf16.vlgmr.msra.gmra.mxu1 %v938_v59  ;;  %v4188_v59 = vor.u32 %v4348_v54, %v4185_v51 }
 0x23a   : > { %3148 = vmatpush.bf16.xpose.msrb.mxu1 %v4148_v35  ;;  %3161 = vmatpush.bf16.xpose.msrb.mxu2 %v4152_v40  ;;  %v3772_v35 = vor.u32 %v4247_v26, %v3769_v28  ;;  %v3776_v40 = vor.u32 %v4297_v30, %v3775_v29  ;;  %v4349_v26 = vld [vmem:[%s4993_s8 + $0x494] sm:$0xf] }
 0x23b   : > { %3174 = vmatpush.bf16.xpose.msrb.mxu3 %v4156_v42  ;;  %3111 = vmatmul.bf16.vlgmr.msra.gmra.mxu2 %v939_v60  ;;  %v4175_v42 = vld [vmem:[%s4993_s8 + $0x480] sm:$0xf]  ;;  %v3783_v60 = vld [vmem:[%s4993_s8 + $0x170] sm:$0xf] }
 0x23c   : > { %3124 = vmatmul.bf16.vlgmr.msra.gmra.mxu3 %v940_v2  ;;  %v4176_v56 = vor.u32 %v4396_v43, %v4175_v42 }
 0x23d   : > { %v2672_v36 = vpop.f32.mrf.mxu0 }
 0x23e   : > { %v2696_v27 = vpop.f32.mrf.mxu2  ;;  %v2685_v38 = vpop.f32.mrf.mxu1 }
 0x23f   : > { %v2697_v33 = vadd.f32 %v2696_v27, %v2684_v17  ;;  %v2709_v31 = vpop.f32.mrf.mxu3  ;;  %v638_v17 = vld [vmem:[%s4991_s7 + $0x60] sm:$0x3]  ;;  %v4193_v27 = vld [vmem:[%s4993_s8 + $0x618] sm:$0xf0]  ;;  %v4300_v38 = vld [vmem:[%s4993_s8 + $0x304] sm:$0xf0] }
 0x240   : > { %v4196_v36 = vor.u32 %v4349_v26, %v4193_v27 }
 0x241   : > { %3136 = vmatpush.bf16.xpose.msrb.mxu0 %v3752_v52  ;;  %v2710_v39 = vadd.f32 %v2709_v31, %v2697_v33  ;;  %v4180_v52 = vor.u32 %v4347_v48, %v4177_v49  ;;  %v3800_v48 = vor.u32 %v4300_v38, %v3799_v34 }
 0x242   : > { %3149 = vmatpush.bf16.xpose.msrb.mxu1 %v3756_v1  ;;  %3162 = vmatpush.bf16.xpose.msrb.mxu2 %v3760_v61  ;;  %v4298_v1 = vld [vmem:[%s4993_s8 + $0x2f4] sm:$0xf0]  ;;  %v4249_v61 = vld [vmem:[%s4993_s8 + $0x174] sm:$0xf] }
 0x243   : > { %3175 = vmatpush.bf16.xpose.msrb.mxu3 %v3764_v3  ;;  %v3785_v3 = vld [vmem:[%s4993_s8 + $0x2f8] sm:$0xf0]  ;;  %v3784_v12 = vor.u32 %v4298_v1, %v3783_v60 }
 0x244   : > { %v3788_v14 = vor.u32 %v4249_v61, %v3785_v3 }
 0x245   : > { %v2722_v53 = vpop.f32.mrf.mxu0 }
 0x246   : > { %v2698_v44 = vpop.f32.mrf.mxu2  ;;  %v2723_v55 = vadd.f32 %v2722_v53, %v2710_v39  ;;  %v2735_v46 = vpop.f32.mrf.mxu1  ;;  %v4251_v39 = vld [vmem:[%s4993_s8 + $0x184] sm:$0xf] }
 0x247   : > { %v2711_v45 = vpop.f32.mrf.mxu3 }
 0x248   : > { %v2736_v58 = vadd.f32 %v2735_v46, %v2723_v55  ;;  %3137 = vmatmul.bf16.vlgmr.msrb.gmra.mxu0 %v5431_v62  ;;  %v4299_v62 = vld [vmem:[%s4993_s8 + $0x2fc] sm:$0xf0] }
 0x249   : > { %3187 = vmatpush.bf16.xpose.msra.mxu0 %v4160_v21  ;;  %3150 = vmatmul.bf16.vlgmr.msrb.gmra.mxu1 %v5433_v4  ;;  %v3792_v19 = vor.u32 %v4299_v62, %v3791_v0 }
 0x24a   : > { %3200 = vmatpush.bf16.xpose.msra.mxu1 %v4164_v16  ;;  %3213 = vmatpush.bf16.xpose.msra.mxu2 %v4168_v22  ;;  %v953_v16 = vld [vmem:[#allocation1 + $0x36] sm:$0xff]  ;;  %v954_v22 = vld [vmem:[#allocation1 + $0x3f] sm:$0xff] }
 0x24b   : > { %3226 = vmatpush.bf16.xpose.msra.mxu3 %v4172_v23  ;;  %3163 = vmatmul.bf16.vlgmr.msrb.gmra.mxu2 %v5435_v63  ;;  %v3793_v63 = vld [vmem:[%s4993_s8 + $0x300] sm:$0xf0]  ;;  %v4191_v23 = vld [vmem:[%s4993_s8 + $0x490] sm:$0xf] }
 0x24c   : > { %3176 = vmatmul.bf16.vlgmr.msrb.gmra.mxu3 %v5437_v5  ;;  %v947_v5 = vld [vmem:[#allocation1] sm:$0xff]  ;;  %v3796_v21 = vor.u32 %v4250_v8, %v3793_v63  ;;  %v4192_v31 = vor.u32 %v4398_v24, %v4191_v23 }
 0x24d   : > { %v2724_v4 = vpop.f32.mrf.mxu0  ;;  %956 = vst [vmem:[#allocation1] ss:$9 sm:$0xff] %v638_v17 }
 0x24e   : > { %v2748_v2 = vpop.f32.mrf.mxu2  ;;  %v2737_v9 = vpop.f32.mrf.mxu1 }
 0x24f   : > { %v2749_v6 = vadd.f32 %v2748_v2, %v2736_v58  ;;  %v2761_v7 = vpop.f32.mrf.mxu3 }
 0x251   : > { %3188 = vmatpush.bf16.xpose.msra.mxu0 %v3768_v32  ;;  %v2762_v13 = vadd.f32 %v2761_v7, %v2749_v6 }
 0x252   : > { %3201 = vmatpush.bf16.xpose.msra.mxu1 %v3772_v35  ;;  %3214 = vmatpush.bf16.xpose.msra.mxu2 %v3776_v40  ;;  %v3801_v35 = vld [vmem:[%s4993_s8 + $0x308] sm:$0xf0] }
 0x253   : > { %3227 = vmatpush.bf16.xpose.msra.mxu3 %v3780_v41  ;;  %v3804_v49 = vor.u32 %v4251_v39, %v3801_v35 }
 0x254   : > { %v957_v61 = vld [vmem:[#allocation1] sm:$0xff]  ;;  %v958_v0 = vld [vmem:[#allocation1 + $0x9] sm:$0xff] }
 0x255   : > { %v2774_v29 = vpop.f32.mrf.mxu0 }
 0x256   : > { %v2750_v25 = vpop.f32.mrf.mxu2  ;;  %v2775_v30 = vadd.f32 %v2774_v29, %v2762_v13  ;;  %v2787_v33 = vpop.f32.mrf.mxu1 }
 0x257   : > { %v2763_v28 = vpop.f32.mrf.mxu3 }
 0x258   : > { %v2788_v37 = vadd.f32 %v2787_v33, %v2775_v30  ;;  %3189 = vmatmul.bf16.vlgmr.msra.gmra.mxu0 %v947_v5 }
 0x259   : > { %3239 = vmatpush.bf16.xpose.msrb.mxu0 %v4176_v56  ;;  %3202 = vmatmul.bf16.vlgmr.msra.gmra.mxu1 %v948_v10 }
 0x25a   : > { %3252 = vmatpush.bf16.xpose.msrb.mxu1 %v4180_v52  ;;  %3265 = vmatpush.bf16.xpose.msrb.mxu2 %v4184_v57 }
 0x25b   : > { %3278 = vmatpush.bf16.xpose.msrb.mxu3 %v4188_v59  ;;  %3215 = vmatmul.bf16.vlgmr.msra.gmra.mxu2 %v949_v11 }
 0x25c   : > { %3228 = vmatmul.bf16.vlgmr.msra.gmra.mxu3 %v950_v18 }
 0x25d   : > { %v2776_v42 = vpop.f32.mrf.mxu0 }
 0x25e   : > { %v2800_v32 = vpop.f32.mrf.mxu2  ;;  %v2789_v43 = vpop.f32.mrf.mxu1 }
 0x25f   : > { %v2801_v40 = vadd.f32 %v2800_v32, %v2788_v37  ;;  %v2813_v41 = vpop.f32.mrf.mxu3 }
 0x261   : > { %3240 = vmatpush.bf16.xpose.msrb.mxu0 %v3784_v12  ;;  %v2814_v44 = vadd.f32 %v2813_v41, %v2801_v40 }
 0x262   : > { %3253 = vmatpush.bf16.xpose.msrb.mxu1 %v3788_v14  ;;  %3266 = vmatpush.bf16.xpose.msrb.mxu2 %v3792_v19 }
 0x263   : > { %3279 = vmatpush.bf16.xpose.msrb.mxu3 %v3796_v21 }
 0x265   : > { %v2826_v45 = vpop.f32.mrf.mxu0 }
 0x266   : > { %v2802_v50 = vpop.f32.mrf.mxu2  ;;  %v2827_v53 = vadd.f32 %v2826_v45, %v2814_v44  ;;  %v2839_v54 = vpop.f32.mrf.mxu1 }
 0x267   : > { %v2815_v47 = vpop.f32.mrf.mxu3 }
 0x268   : > { %v2840_v51 = vadd.f32 %v2839_v54, %v2827_v53  ;;  %3241 = vmatmul.bf16.vlgmr.msrb.gmra.mxu0 %v951_v20 }
 0x269   : > { %3291 = vmatpush.bf16.xpose.msra.mxu0 %v4192_v31  ;;  %3254 = vmatmul.bf16.vlgmr.msrb.gmra.mxu1 %v952_v15 }
 0x26a   : > { %3304 = vmatpush.bf16.xpose.msra.mxu1 %v4196_v36 }
 0x26b   : > { %3267 = vmatmul.bf16.vlgmr.msrb.gmra.mxu2 %v953_v16 }
 0x26c   : > { %3280 = vmatmul.bf16.vlgmr.msrb.gmra.mxu3 %v954_v22 }
 0x26d   : > { %v2828_v52 = vpop.f32.mrf.mxu0 }
 0x26e   : > { %v2852_v55 = vpop.f32.mrf.mxu2  ;;  %v2841_v57 = vpop.f32.mrf.mxu1 }
 0x26f   : > { %v2853_v46 = vadd.f32 %v2852_v55, %v2840_v51  ;;  %v2865_v56 = vpop.f32.mrf.mxu3 }
 0x271   : > { %3292 = vmatpush.bf16.xpose.msra.mxu0 %v3800_v48  ;;  %v2866_v58 = vadd.f32 %v2865_v56, %v2853_v46 }
 0x272   : > { %3305 = vmatpush.bf16.xpose.msra.mxu1 %v3804_v49 }
 0x275   : > { %v2878_v1 = vpop.f32.mrf.mxu0 }
 0x276   : > { %v2854_v59 = vpop.f32.mrf.mxu2  ;;  %v2879_v2 = vadd.f32 %v2878_v1, %v2866_v58  ;;  %v2891_v3 = vpop.f32.mrf.mxu1 }
 0x277   : > { %v2867_v60 = vpop.f32.mrf.mxu3 }
 0x278   : > { %v2892_v62 = vadd.f32 %v2891_v3, %v2879_v2  ;;  %3293 = vmatmul.bf16.vlgmr.msra.gmra.mxu0 %v957_v61 }
 0x279   : > { %3306 = vmatmul.bf16.vlgmr.msra.gmra.mxu1 %v958_v0 }
 0x27d   : > { %v2880_v4 = vpop.f32.mrf.mxu0 }
 0x27e   : > { %v2904_v6 = vpop.f32.mrf.mxu2  ;;  %v2893_v8 = vpop.f32.mrf.mxu1 }
 0x27f   : > { %v2917_v7 = vpop.f32.mrf.mxu3  ;;  %v2905_v21 = vadd.f32 %v2904_v6, %v2892_v62 }
 0x281   : > { %v2918_v24 = vadd.f32 %v2917_v7, %v2905_v21 }
 0x285   : > { %v2930_v5 = vpop.f32.mrf.mxu0 }
 0x286   : > { %v2906_v63 = vpop.f32.mrf.mxu2  ;;  %v2943_v10 = vpop.f32.mrf.mxu1  ;;  %v2931_v25 = vadd.f32 %v2930_v5, %v2918_v24 }
 0x287   : > { %v2919_v9 = vpop.f32.mrf.mxu3 }
 0x288   : > { %v2944_v29 = vadd.f32 %v2943_v10, %v2931_v25 }
 0x28d   : > { %v2932_v13 = vpop.f32.mrf.mxu0 }
 0x28e   : > { %v2956_v11 = vpop.f32.mrf.mxu2  ;;  %v2945_v18 = vpop.f32.mrf.mxu1 }
 0x28f   : > { %v2969_v12 = vpop.f32.mrf.mxu3  ;;  %v2957_v33 = vadd.f32 %v2956_v11, %v2944_v29 }
 0x291   : > { %v2970_v31 = vadd.f32 %v2969_v12, %v2957_v33 }
 0x295   : > { %v2982_v20 = vpop.f32.mrf.mxu0 }
 0x296   : > { %v2958_v14 = vpop.f32.mrf.mxu2  ;;  %v2995_v15 = vpop.f32.mrf.mxu1  ;;  %v2983_v38 = vadd.f32 %v2982_v20, %v2970_v31 }
 0x297   : > { %v2971_v19 = vpop.f32.mrf.mxu3 }
 0x298   : > { %v2996_v39 = vadd.f32 %v2995_v15, %v2983_v38 }
 0x29d   : > { %v2984_v17 = vpop.f32.mrf.mxu0 }
 0x29e   : > { %v3008_v16 = vpop.f32.mrf.mxu2  ;;  %v2997_v23 = vpop.f32.mrf.mxu1 }
 0x29f   : > { %v3021_v22 = vpop.f32.mrf.mxu3  ;;  %v3009_v35 = vadd.f32 %v3008_v16, %v2996_v39 }
 0x2a1   : > { %v3022_v48 = vadd.f32 %v3021_v22, %v3009_v35 }
 0x2a5   : > { %v3034_v28 = vpop.f32.mrf.mxu0 }
 0x2a6   : > { %v3010_v26 = vpop.f32.mrf.mxu2  ;;  %v3047_v30 = vpop.f32.mrf.mxu1  ;;  %v3035_v44 = vadd.f32 %v3034_v28, %v3022_v48 }
 0x2a7   : > { %v3023_v27 = vpop.f32.mrf.mxu3 }
 0x2a8   : > { %v3048_v45 = vadd.f32 %v3047_v30, %v3035_v44 }
 0x2ad   : > { %v3036_v34 = vpop.f32.mrf.mxu0 }
 0x2ae   : > { %v3060_v36 = vpop.f32.mrf.mxu2  ;;  %v3049_v32 = vpop.f32.mrf.mxu1 }
 0x2af   : > { %v3073_v37 = vpop.f32.mrf.mxu3  ;;  %v3061_v54 = vadd.f32 %v3060_v36, %v3048_v45 }
 0x2b1   : > { %v3074_v51 = vadd.f32 %v3073_v37, %v3061_v54  ;;  %v625_v37 = vld [vmem:[#allocation2] sm:$0x3] }
 0x2b5   : > { %v3086_v42 = vpop.f32.mrf.mxu0 }
 0x2b6   : > { %v3062_v40 = vpop.f32.mrf.mxu2  ;;  %v3099_v43 = vpop.f32.mrf.mxu1  ;;  %v3087_v52 = vadd.f32 %v3086_v42, %v3074_v51 }
 0x2b7   : > { %v3075_v41 = vpop.f32.mrf.mxu3 }
 0x2b8   : > { %v3100_v58 = vadd.f32 %v3099_v43, %v3087_v52 }
 0x2bd   : > { %v3088_v47 = vpop.f32.mrf.mxu0 }
 0x2be   : > { %v3112_v49 = vpop.f32.mrf.mxu2  ;;  %v3101_v53 = vpop.f32.mrf.mxu1 }
 0x2bf   : > { %v3125_v50 = vpop.f32.mrf.mxu3  ;;  %v3113_v59 = vadd.f32 %v3112_v49, %v3100_v58 }
 0x2c1   : > { %v3126_v3 = vadd.f32 %v3125_v50, %v3113_v59 }
 0x2c5   : > { %v3138_v56 = vpop.f32.mrf.mxu0 }
 0x2c6   : > { %v3114_v55 = vpop.f32.mrf.mxu2  ;;  %v3151_v57 = vpop.f32.mrf.mxu1  ;;  %v3139_v0 = vadd.f32 %v3138_v56, %v3126_v3 }
 0x2c7   : > { %v3127_v46 = vpop.f32.mrf.mxu3 }
 0x2c8   : > { %v3152_v4 = vadd.f32 %v3151_v57, %v3139_v0 }
 0x2cd   : > { %v3140_v61 = vpop.f32.mrf.mxu0 }
 0x2ce   : > { %v3164_v60 = vpop.f32.mrf.mxu2  ;;  %v3153_v2 = vpop.f32.mrf.mxu1 }
 0x2cf   : > { %v3177_v1 = vpop.f32.mrf.mxu3  ;;  %v3165_v63 = vadd.f32 %v3164_v60, %v3152_v4 }
 0x2d1   : > { %v3178_v9 = vadd.f32 %v3177_v1, %v3165_v63 }
 0x2d5   : > { %v3190_v7 = vpop.f32.mrf.mxu0 }
 0x2d6   : > { %v3166_v62 = vpop.f32.mrf.mxu2  ;;  %v3203_v8 = vpop.f32.mrf.mxu1  ;;  %v3191_v12 = vadd.f32 %v3190_v7, %v3178_v9 }
 0x2d7   : > { %v3179_v6 = vpop.f32.mrf.mxu3 }
 0x2d8   : > { %v3204_v18 = vadd.f32 %v3203_v8, %v3191_v12 }
 0x2dd   : > { %v3192_v11 = vpop.f32.mrf.mxu0 }
 0x2de   : > { %v3216_v5 = vpop.f32.mrf.mxu2  ;;  %v3205_v13 = vpop.f32.mrf.mxu1 }
 0x2df   : > { %v3229_v10 = vpop.f32.mrf.mxu3  ;;  %v3217_v14 = vadd.f32 %v3216_v5, %v3204_v18 }
 0x2e1   : > { %v3230_v16 = vadd.f32 %v3229_v10, %v3217_v14 }
 0x2e5   : > { %v3242_v15 = vpop.f32.mrf.mxu0 }
 0x2e6   : > { %v3218_v19 = vpop.f32.mrf.mxu2  ;;  %v3255_v21 = vpop.f32.mrf.mxu1  ;;  %v3243_v22 = vadd.f32 %v3242_v15, %v3230_v16 }
 0x2e7   : > { %v3231_v20 = vpop.f32.mrf.mxu3 }
 0x2e8   : > { %v3256_v25 = vadd.f32 %v3255_v21, %v3243_v22 }
 0x2ed   : > { %v3244_v24 = vpop.f32.mrf.mxu0 }
 0x2ee   : > { %v3268_v17 = vpop.f32.mrf.mxu2  ;;  %v3257_v26 = vpop.f32.mrf.mxu1 }
 0x2ef   : > { %v3281_v23 = vpop.f32.mrf.mxu3  ;;  %v3269_v27 = vadd.f32 %v3268_v17, %v3256_v25 }
 0x2f1   : > { %v3282_v28 = vadd.f32 %v3281_v23, %v3269_v27 }
 0x2f5   : > { %v3294_v33 = vpop.f32.mrf.mxu0 }
 0x2f6   : > { %v3270_v29 = vpop.f32.mrf.mxu2  ;;  %v3295_v31 = vadd.f32 %v3294_v33, %v3282_v28  ;;  %v3307_v36 = vpop.f32.mrf.mxu1 }
 0x2f7   : > { %v3283_v30 = vpop.f32.mrf.mxu3 }
 0x2f8   : > { %v3308_v34 = vadd.f32 %v3307_v36, %v3295_v31 }
 0x2fa   : > { %v3311_v38 = vadd.f32 %v3308_v34, %v625_v37  ;;  %3317 = sbr.rel (%p4197_p11) target bundleno = 775 (0x307), region = 63 }
 0x2fc   : > { %3313 = vst.msk [vmem:[#allocation2] sm:$0x3] %vm3312_vm1, %v3311_v38 }
 0x2fd   : > { %v3296_v32 = vpop.f32.mrf.mxu0 }
 0x2fe   : > { %v3309_v39 = vpop.f32.mrf.mxu1 }
 0x2ff   : > { %v4449_v40 = vld [vmem:[%s5511_s2] ss:$0 sm:$0xff] }
 0x303   : > { %v3318_v35 = vld [vmem:[#allocation2] sm:$0x3] }
 0x304   : > { %v3323_v41 = vadd.f32 %v4449_v40, %v3318_v35 }
 0x306   : > { %3324 = vst.msk [vmem:[#allocation4] sm:$0x3] %vm3312_vm1, %v3323_v41 }
 0x307 PF: > { %p4405_p12 = scmp.eq.s32.totalorder %s3407_s17, 1  ;;  %s3335_s19 = sshll.u32 %s5512_s3, 4  ;;  %s3336_s19 = int_to_ptr.hbm [resolvable:$true] %s3335_s19 }
 0x308   : > { %s4523_s20 = smov [#allocation4]  }
 0x309   : > { %s3333_s22 = sshll.u32 %s4523_s20, 4  ;;  %s3334_s22 = int_to_ptr.vmem [resolvable:$true] %s3333_s22 }
 0x30a   : > { %4402 = dma.vmem_to_hbm [thread:$0]  (%p4405_p12), %s3334_s22, 32, %s3336_s19, [#allocation5]  }
 0x30b   : > { %4499 = dma.done.wait (%p4405_p12), [#allocation5], 32  }
 0x30c   : > { %4501 = vsyncadd (%p4405_p12), [#allocation5], 4294967264 }
 0x30d PF: > { %s14_s16 = sadd.s32 1, %s4520_s16   ;;  %s5513_s12 = smov %s4508_s13 }
 0x30e   : > { %p11_p13 = scmp.ge.s32.totalorder %s14_s16, 4   ;;  %s5514_s13 = smov %s4580_s21 }
 0x30f   : > { %s5515_s14 = smov %s4516_s15  ;;  %s5516_s15 = smov %s5518_s18 }
 0x310   :  { %13 = sbr.rel (!%p11_p13) target bundleno = 3 (0x3), region = 99 }
 0x315   :  { %3349 = vsyncpa [#allocation5], 1 }
 0x316   :  { %3351 = vsyncpa [#allocation5 + $0x1], 1 }

</bundles_post_ra>
